<compile_context>
chip_gen: v6e
topology: v6e:2x2x1
jax: 0.10.0
libtpu: 0.0.40
codegen_flags: <defaults>
</compile_context>

<pallas_src>
import functools

import jax
import jax.numpy as jnp
import numpy as np
from jax.experimental import pallas as pl
from jax.experimental.pallas import tpu as pltpu

LANE = 128      # channels padded to the TPU lane width
SUBLANE = 8     # padded width rounded to the sublane tile height


def _round_up(n, m):
    return (n + m - 1) // m * m


def _conv2d_kernel(x_ref, w_ref, b_ref, o_ref, *,
                   KH, KW, Hout, Wout, Wp, Cin_p, Cout_p):
    """One batch element: KHxKW conv as KH*KW lane-dense MXU matmuls.

    x_ref : (1, Hp, Wp, Cin_p)      spatially pre-padded, channel-padded (f32)
    w_ref : (KH, KW, Cin_p, Cout_p)
    b_ref : (1, Cout_p)
    o_ref : (1, Hout, Wout, Cout_p)
    """
    rows = Hout * Wp

    # One accumulator per kw tap offset; bias folded into the first one
    # (single explicit broadcast, hoisted out of the tap loops).
    accs = [jnp.broadcast_to(b_ref[...], (rows, Cout_p)).astype(jnp.float32)]
    accs += [jnp.zeros((rows, Cout_p), jnp.float32) for _ in range(KW - 1)]

    for kh in range(KH):
        # Whole-plane slice along the un-tiled leading axis, then a
        # layout-preserving reshape (Wp % 8 == 0, Cin_p % 128 == 0):
        # no sub-tile relayout copies feeding the MXU.
        p = x_ref[0, kh:kh + Hout, :, :].reshape(rows, Cin_p)
        for kw in range(KW):
            accs[kw] = accs[kw] + jnp.dot(
                p, w_ref[kh, kw], preferred_element_type=jnp.float32)

    # Combine the KW column-shifted accumulators.  Only KW-1 shifted slices
    # remain in the whole kernel (vs KH*KW in the naive per-tap formulation).
    out = accs[0].reshape(Hout, Wp, Cout_p)[:, 0:Wout, :]
    for kw in range(1, KW):
        out = out + accs[kw].reshape(Hout, Wp, Cout_p)[:, kw:kw + Wout, :]

    # Single large, contiguous, lane-dense store (Cout_p = 128 on lanes).
    o_ref[0] = out.astype(o_ref.dtype)


@functools.partial(jax.jit, static_argnames=("stride", "padding"))
def conv2d_pallas(x_nchw, w_oihw, bias, *, stride=1, padding=1):
    """ConvLayer forward.  x: (B, Cin, H, W) NCHW, weight OIHW, bias (Cout,)."""
    if stride != 1:
        # TODO(synk): strided conv (output-row decimation) not implemented.
        raise NotImplementedError("conv2d_pallas currently supports stride=1")

    B, Cin, H, W = x_nchw.shape
    Cout, Cin_w, KH, KW = w_oihw.shape
    assert Cin_w == Cin

    Hout = H + 2 * padding - KH + 1
    Wout = W + 2 * padding - KW + 1
    Hp = H + 2 * padding                        # rows needed: Hout + KH - 1
    Wp = _round_up(W + 2 * padding, SUBLANE)    # cols needed + alignment fill
    Cin_p = _round_up(Cin, LANE)
    Cout_p = _round_up(Cout, LANE)

    # ---- wrapper-side layout plumbing (plain XLA, outside the kernel) ----
    # NCHW -> NHWC, explicit f32 cast, zero-pad: conv halo + lane-dense channels.
    x = jnp.transpose(x_nchw, (0, 2, 3, 1)).astype(jnp.float32)
    x = jnp.pad(x, ((0, 0),
                    (padding, Hp - H - padding),
                    (padding, Wp - W - padding),
                    (0, Cin_p - Cin)))
    # OIHW -> (KH, KW, Cin_p, Cout_p), zero-padded channels.
    w = jnp.transpose(w_oihw, (2, 3, 1, 0)).astype(jnp.float32)
    w = jnp.pad(w, ((0, 0), (0, 0), (0, Cin_p - Cin), (0, Cout_p - Cout)))
    b = jnp.pad(bias.astype(jnp.float32), (0, Cout_p - Cout)).reshape(1, Cout_p)

    kernel = functools.partial(
        _conv2d_kernel, KH=KH, KW=KW, Hout=Hout, Wout=Wout, Wp=Wp,
        Cin_p=Cin_p, Cout_p=Cout_p)

    out_p = pl.pallas_call(
        kernel,
        out_shape=jax.ShapeDtypeStruct((B, Hout, Wout, Cout_p), jnp.float32),
        grid=(B,),
        in_specs=[
            pl.BlockSpec((1, Hp, Wp, Cin_p), lambda bb: (bb, 0, 0, 0)),
            pl.BlockSpec((KH, KW, Cin_p, Cout_p), lambda bb: (0, 0, 0, 0)),
            pl.BlockSpec((1, Cout_p), lambda bb: (0, 0)),
        ],
        out_specs=pl.BlockSpec((1, Hout, Wout, Cout_p),
                               lambda bb: (bb, 0, 0, 0)),
        compiler_params=pltpu.CompilerParams(
            dimension_semantics=("parallel",)),
    )(x, w, b)

    # Drop the channel padding, back to NCHW to match the PyTorch module.
    return jnp.transpose(out_p[:, :, :, :Cout], (0, 3, 1, 2))


def _reference(x, w, b, *, stride=1, padding=1):
    """Plain-JAX reference (NCHW / OIHW), mirrors nn.Conv2d forward."""
    dn = ("NCHW", "OIHW", "NCHW")
    out = jax.lax.conv_general_dilated(
        x, w, window_strides=(stride, stride),
        padding=((padding, padding), (padding, padding)),
        dimension_numbers=dn)
    return out + b[None, :, None, None]


if __name__ == "__main__":
    B, Cin, H, W = 2, 4, 16, 16
    Cout, K, stride, padding = 8, 3, 1, 1

    key = jax.random.PRNGKey(0)
    kx, kw, kb = jax.random.split(key, 3)

    # Deterministic Conv2d-like fan_in init.
    fan_in = Cin * K * K
    bound = 1.0 / np.sqrt(fan_in)
    x = jax.random.normal(kx, (B, Cin, H, W), dtype=jnp.float32)
    w = jax.random.uniform(kw, (Cout, Cin, K, K), jnp.float32, -bound, bound)
    b = jax.random.uniform(kb, (Cout,), jnp.float32, -bound, bound)

    out = conv2d_pallas(x, w, b, stride=stride, padding=padding)
    out = jax.block_until_ready(out)

    ref = _reference(x, w, b, stride=stride, padding=padding)
    np.testing.assert_allclose(np.asarray(out), np.asarray(ref),
                               rtol=1e-4, atol=1e-4)

    print("KERNEL_OK")
</pallas_src>

<mosaic_0001>
module attributes {stable_mosaic.version = 11 : i64} {
  func.func @_conv2d_kernel(%arg0: i32, %arg1: memref<1x18x24x128xf32, #tpu.memory_space<vmem>>, %arg2: memref<3x3x128x128xf32, #tpu.memory_space<vmem>>, %arg3: memref<1x128xf32, #tpu.memory_space<vmem>>, %arg4: memref<1x16x16x128xf32, #tpu.memory_space<vmem>>) attributes {dimension_semantics = [#tpu.dimension_semantics<parallel>], iteration_bounds = array<i64: 2>, scalar_prefetch = 0 : i64, scratch_operands = 0 : i64, tpu.core_type = #tpu.core_type<tc>, window_params = [{transform_indices = @transform_0, window_bounds = array<i64: 1, 18, 24, 128>}, {pipeline_mode = #tpu.pipeline_mode<synchronous>, transform_indices = @transform_1, window_bounds = array<i64: 3, 3, 128, 128>}, {pipeline_mode = #tpu.pipeline_mode<synchronous>, transform_indices = @transform_2, window_bounds = array<i64: 1, 128>}, {transform_indices = @transform_3, window_bounds = array<i64: 1, 16, 16, 128>}]} {
    %c0 = arith.constant 0 : index
    %c0_0 = arith.constant 0 : index
    %0 = vector.load %arg3[%c0, %c0_0] : memref<1x128xf32, #tpu.memory_space<vmem>>, vector<1x128xf32>
    %1 = vector.shape_cast %0 : vector<1x128xf32> to vector<1x128xf32>
    %2 = vector.broadcast %1 : vector<1x128xf32> to vector<384x128xf32>
    %cst = arith.constant 0.000000e+00 : f32
    %3 = vector.broadcast %cst : f32 to vector<384x128xf32>
    %cst_1 = arith.constant 0.000000e+00 : f32
    %4 = vector.broadcast %cst_1 : f32 to vector<384x128xf32>
    %c0_2 = arith.constant 0 : index
    %c0_3 = arith.constant 0 : index
    %c0_4 = arith.constant 0 : index
    %c0_5 = arith.constant 0 : index
    %5 = vector.load %arg1[%c0_2, %c0_3, %c0_4, %c0_5] : memref<1x18x24x128xf32, #tpu.memory_space<vmem>>, vector<1x16x24x128xf32>
    %6 = vector.shape_cast %5 : vector<1x16x24x128xf32> to vector<16x24x128xf32>
    %7 = vector.shape_cast %6 : vector<16x24x128xf32> to vector<384x128xf32>
    %c0_6 = arith.constant 0 : index
    %c0_7 = arith.constant 0 : index
    %c0_8 = arith.constant 0 : index
    %c0_9 = arith.constant 0 : index
    %8 = vector.load %arg2[%c0_6, %c0_7, %c0_8, %c0_9] : memref<3x3x128x128xf32, #tpu.memory_space<vmem>>, vector<1x1x128x128xf32>
    %9 = vector.shape_cast %8 : vector<1x1x128x128xf32> to vector<128x128xf32>
    %cst_10 = arith.constant dense<0.000000e+00> : vector<384x128xf32>
    %10 = tpu.matmul %7, %9, %cst_10 {dimension_numbers = #tpu.dot_dimension_numbers<[1], [0], [0], [1], [0, 0, 1, 1], [], []>} : vector<384x128xf32>, vector<128x128xf32>, vector<384x128xf32> -> vector<384x128xf32>
    %11 = arith.addf %2, %10 : vector<384x128xf32>
    %c0_11 = arith.constant 0 : index
    %c1 = arith.constant 1 : index
    %c0_12 = arith.constant 0 : index
    %c0_13 = arith.constant 0 : index
    %12 = vector.load %arg2[%c0_11, %c1, %c0_12, %c0_13] : memref<3x3x128x128xf32, #tpu.memory_space<vmem>>, vector<1x1x128x128xf32>
    %13 = vector.shape_cast %12 : vector<1x1x128x128xf32> to vector<128x128xf32>
    %cst_14 = arith.constant dense<0.000000e+00> : vector<384x128xf32>
    %14 = tpu.matmul %7, %13, %cst_14 {dimension_numbers = #tpu.dot_dimension_numbers<[1], [0], [0], [1], [0, 0, 1, 1], [], []>} : vector<384x128xf32>, vector<128x128xf32>, vector<384x128xf32> -> vector<384x128xf32>
    %15 = arith.addf %3, %14 : vector<384x128xf32>
    %c0_15 = arith.constant 0 : index
    %c2 = arith.constant 2 : index
    %c0_16 = arith.constant 0 : index
    %c0_17 = arith.constant 0 : index
    %16 = vector.load %arg2[%c0_15, %c2, %c0_16, %c0_17] : memref<3x3x128x128xf32, #tpu.memory_space<vmem>>, vector<1x1x128x128xf32>
    %17 = vector.shape_cast %16 : vector<1x1x128x128xf32> to vector<128x128xf32>
    %cst_18 = arith.constant dense<0.000000e+00> : vector<384x128xf32>
    %18 = tpu.matmul %7, %17, %cst_18 {dimension_numbers = #tpu.dot_dimension_numbers<[1], [0], [0], [1], [0, 0, 1, 1], [], []>} : vector<384x128xf32>, vector<128x128xf32>, vector<384x128xf32> -> vector<384x128xf32>
    %19 = arith.addf %4, %18 : vector<384x128xf32>
    %c0_19 = arith.constant 0 : index
    %c1_20 = arith.constant 1 : index
    %c0_21 = arith.constant 0 : index
    %c0_22 = arith.constant 0 : index
    %20 = vector.load %arg1[%c0_19, %c1_20, %c0_21, %c0_22] : memref<1x18x24x128xf32, #tpu.memory_space<vmem>>, vector<1x16x24x128xf32>
    %21 = vector.shape_cast %20 : vector<1x16x24x128xf32> to vector<16x24x128xf32>
    %22 = vector.shape_cast %21 : vector<16x24x128xf32> to vector<384x128xf32>
    %c1_23 = arith.constant 1 : index
    %c0_24 = arith.constant 0 : index
    %c0_25 = arith.constant 0 : index
    %c0_26 = arith.constant 0 : index
    %23 = vector.load %arg2[%c1_23, %c0_24, %c0_25, %c0_26] : memref<3x3x128x128xf32, #tpu.memory_space<vmem>>, vector<1x1x128x128xf32>
    %24 = vector.shape_cast %23 : vector<1x1x128x128xf32> to vector<128x128xf32>
    %cst_27 = arith.constant dense<0.000000e+00> : vector<384x128xf32>
    %25 = tpu.matmul %22, %24, %cst_27 {dimension_numbers = #tpu.dot_dimension_numbers<[1], [0], [0], [1], [0, 0, 1, 1], [], []>} : vector<384x128xf32>, vector<128x128xf32>, vector<384x128xf32> -> vector<384x128xf32>
    %26 = arith.addf %11, %25 : vector<384x128xf32>
    %c1_28 = arith.constant 1 : index
    %c1_29 = arith.constant 1 : index
    %c0_30 = arith.constant 0 : index
    %c0_31 = arith.constant 0 : index
    %27 = vector.load %arg2[%c1_28, %c1_29, %c0_30, %c0_31] : memref<3x3x128x128xf32, #tpu.memory_space<vmem>>, vector<1x1x128x128xf32>
    %28 = vector.shape_cast %27 : vector<1x1x128x128xf32> to vector<128x128xf32>
    %cst_32 = arith.constant dense<0.000000e+00> : vector<384x128xf32>
    %29 = tpu.matmul %22, %28, %cst_32 {dimension_numbers = #tpu.dot_dimension_numbers<[1], [0], [0], [1], [0, 0, 1, 1], [], []>} : vector<384x128xf32>, vector<128x128xf32>, vector<384x128xf32> -> vector<384x128xf32>
    %30 = arith.addf %15, %29 : vector<384x128xf32>
    %c1_33 = arith.constant 1 : index
    %c2_34 = arith.constant 2 : index
    %c0_35 = arith.constant 0 : index
    %c0_36 = arith.constant 0 : index
    %31 = vector.load %arg2[%c1_33, %c2_34, %c0_35, %c0_36] : memref<3x3x128x128xf32, #tpu.memory_space<vmem>>, vector<1x1x128x128xf32>
    %32 = vector.shape_cast %31 : vector<1x1x128x128xf32> to vector<128x128xf32>
    %cst_37 = arith.constant dense<0.000000e+00> : vector<384x128xf32>
    %33 = tpu.matmul %22, %32, %cst_37 {dimension_numbers = #tpu.dot_dimension_numbers<[1], [0], [0], [1], [0, 0, 1, 1], [], []>} : vector<384x128xf32>, vector<128x128xf32>, vector<384x128xf32> -> vector<384x128xf32>
    %34 = arith.addf %19, %33 : vector<384x128xf32>
    %c0_38 = arith.constant 0 : index
    %c2_39 = arith.constant 2 : index
    %c0_40 = arith.constant 0 : index
    %c0_41 = arith.constant 0 : index
    %35 = vector.load %arg1[%c0_38, %c2_39, %c0_40, %c0_41] : memref<1x18x24x128xf32, #tpu.memory_space<vmem>>, vector<1x16x24x128xf32>
    %36 = vector.shape_cast %35 : vector<1x16x24x128xf32> to vector<16x24x128xf32>
    %37 = vector.shape_cast %36 : vector<16x24x128xf32> to vector<384x128xf32>
    %c2_42 = arith.constant 2 : index
    %c0_43 = arith.constant 0 : index
    %c0_44 = arith.constant 0 : index
    %c0_45 = arith.constant 0 : index
    %38 = vector.load %arg2[%c2_42, %c0_43, %c0_44, %c0_45] : memref<3x3x128x128xf32, #tpu.memory_space<vmem>>, vector<1x1x128x128xf32>
    %39 = vector.shape_cast %38 : vector<1x1x128x128xf32> to vector<128x128xf32>
    %cst_46 = arith.constant dense<0.000000e+00> : vector<384x128xf32>
    %40 = tpu.matmul %37, %39, %cst_46 {dimension_numbers = #tpu.dot_dimension_numbers<[1], [0], [0], [1], [0, 0, 1, 1], [], []>} : vector<384x128xf32>, vector<128x128xf32>, vector<384x128xf32> -> vector<384x128xf32>
    %41 = arith.addf %26, %40 : vector<384x128xf32>
    %c2_47 = arith.constant 2 : index
    %c1_48 = arith.constant 1 : index
    %c0_49 = arith.constant 0 : index
    %c0_50 = arith.constant 0 : index
    %42 = vector.load %arg2[%c2_47, %c1_48, %c0_49, %c0_50] : memref<3x3x128x128xf32, #tpu.memory_space<vmem>>, vector<1x1x128x128xf32>
    %43 = vector.shape_cast %42 : vector<1x1x128x128xf32> to vector<128x128xf32>
    %cst_51 = arith.constant dense<0.000000e+00> : vector<384x128xf32>
    %44 = tpu.matmul %37, %43, %cst_51 {dimension_numbers = #tpu.dot_dimension_numbers<[1], [0], [0], [1], [0, 0, 1, 1], [], []>} : vector<384x128xf32>, vector<128x128xf32>, vector<384x128xf32> -> vector<384x128xf32>
    %45 = arith.addf %30, %44 : vector<384x128xf32>
    %c2_52 = arith.constant 2 : index
    %c2_53 = arith.constant 2 : index
    %c0_54 = arith.constant 0 : index
    %c0_55 = arith.constant 0 : index
    %46 = vector.load %arg2[%c2_52, %c2_53, %c0_54, %c0_55] : memref<3x3x128x128xf32, #tpu.memory_space<vmem>>, vector<1x1x128x128xf32>
    %47 = vector.shape_cast %46 : vector<1x1x128x128xf32> to vector<128x128xf32>
    %cst_56 = arith.constant dense<0.000000e+00> : vector<384x128xf32>
    %48 = tpu.matmul %37, %47, %cst_56 {dimension_numbers = #tpu.dot_dimension_numbers<[1], [0], [0], [1], [0, 0, 1, 1], [], []>} : vector<384x128xf32>, vector<128x128xf32>, vector<384x128xf32> -> vector<384x128xf32>
    %49 = arith.addf %34, %48 : vector<384x128xf32>
    %50 = vector.shape_cast %41 : vector<384x128xf32> to vector<16x24x128xf32>
    %51 = vector.extract_strided_slice %50 {offsets = [0, 0, 0], sizes = [16, 16, 128], strides = [1, 1, 1]} : vector<16x24x128xf32> to vector<16x16x128xf32>
    %52 = vector.shape_cast %45 : vector<384x128xf32> to vector<16x24x128xf32>
    %53 = vector.extract_strided_slice %52 {offsets = [0, 1, 0], sizes = [16, 16, 128], strides = [1, 1, 1]} : vector<16x24x128xf32> to vector<16x16x128xf32>
    %54 = arith.addf %51, %53 : vector<16x16x128xf32>
    %55 = vector.shape_cast %49 : vector<384x128xf32> to vector<16x24x128xf32>
    %56 = vector.extract_strided_slice %55 {offsets = [0, 2, 0], sizes = [16, 16, 128], strides = [1, 1, 1]} : vector<16x24x128xf32> to vector<16x16x128xf32>
    %57 = arith.addf %54, %56 : vector<16x16x128xf32>
    %c0_57 = arith.constant 0 : index
    %c0_58 = arith.constant 0 : index
    %c0_59 = arith.constant 0 : index
    %c0_60 = arith.constant 0 : index
    %58 = vector.load %arg4[%c0_57, %c0_58, %c0_59, %c0_60] : memref<1x16x16x128xf32, #tpu.memory_space<vmem>>, vector<1x16x16x128xf32>
    %59 = vector.shape_cast %58 : vector<1x16x16x128xf32> to vector<16x16x128xf32>
    %60 = vector.shape_cast %57 : vector<16x16x128xf32> to vector<1x16x16x128xf32>
    tpu.vector_store %arg4[%c0_57, %c0_58, %c0_59, %c0_60], %60 {strides = array<i32>} : memref<1x16x16x128xf32, #tpu.memory_space<vmem>>, vector<1x16x16x128xf32>,
    return
  }
  func.func @transform_0(%arg0: i32) -> (i32, i32, i32, i32) {
    %c0_i32 = arith.constant 0 : i32
    %c0_i32_0 = arith.constant 0 : i32
    %c0_i32_1 = arith.constant 0 : i32
    %c0_i32_2 = arith.constant 0 : i32
    return %arg0, %c0_i32, %c0_i32_0, %c0_i32_1 : i32, i32, i32, i32
  }
  func.func @transform_1(%arg0: i32) -> (i32, i32, i32, i32) {
    %c0_i32 = arith.constant 0 : i32
    %c0_i32_0 = arith.constant 0 : i32
    %c0_i32_1 = arith.constant 0 : i32
    %c0_i32_2 = arith.constant 0 : i32
    %c0_i32_3 = arith.constant 0 : i32
    return %c0_i32, %c0_i32_0, %c0_i32_1, %c0_i32_2 : i32, i32, i32, i32
  }
  func.func @transform_2(%arg0: i32) -> (i32, i32) {
    %c0_i32 = arith.constant 0 : i32
    %c0_i32_0 = arith.constant 0 : i32
    %c0_i32_1 = arith.constant 0 : i32
    return %c0_i32, %c0_i32_0 : i32, i32
  }
  func.func @transform_3(%arg0: i32) -> (i32, i32, i32, i32) {
    %c0_i32 = arith.constant 0 : i32
    %c0_i32_0 = arith.constant 0 : i32
    %c0_i32_1 = arith.constant 0 : i32
    %c0_i32_2 = arith.constant 0 : i32
    return %arg0, %c0_i32, %c0_i32_0, %c0_i32_1 : i32, i32, i32, i32
  }
}

</mosaic_0001>

<bundles_post_ra>
// kernel: conv2d_pallas.1
= control target key start
LH: loop header
LB: loop body
LE: loop exit
PB: predicated region body
PF: predicated region fallthrough
CT: control target
= control target key end

     0   :  { %s5703_s12 = smov 0   ;;  %s8054_s0 = inlined_call_operand.vmem [shape: f32[2,18,24,128], index: 0, kind: input, shape index: {}]   ;;  %s8055_s1 = inlined_call_operand.vmem [shape: f32[3,3,128,128], index: 1, kind: input, shape index: {}]   ;;  %s8056_s2 = inlined_call_operand.vmem [shape: f32[1,128], index: 2, kind: input, shape index: {}]   ;;  %s8057_s3 = inlined_call_operand.vmem [shape: f32[2,16,16,128], index: 3, kind: output, shape index: {}]  }
   0x1 LB: > { %s3838_s13 = sadd.s32 4294967295, %s5681_s12   ;;  %p3842_p0 = scmp.ge.s32.totalorder %s5681_s12, 1  ;;  %s5681_s12 = sphi %s5703_s12, %s13_s12  }
   0x2   : > { %p137_p1 = scmp.lt.s32.totalorder %s5681_s12, 3 }
   0x4   : > { %p138_p2 = pnand %p3842_p0, %p137_p1 }
   0x6   : > { %141 = sbr.rel (%p138_p2) target bundleno = 686 (0x2ae), region = 32 }
   0xb   : > { %v241_v0 = vld [vmem:[%s8055_s1 + $0x78] sm:$0xff]  ;;  %v240_v1 = vld [vmem:[%s8055_s1 + $0x70] sm:$0xff]  ;;  %v239_v2 = vld [vmem:[%s8055_s1 + $0x68] sm:$0xff]  ;;  %p161_p3 = scmp.lt.s32.totalorder %s3838_s13, 1  ;;  %vm3413_vm0 = vcmask 1046528   ;;  %vm3606_vm1 = vcmask 1045504  }
   0xc   : > { %4650 = vmatprep.subr.mxu0 %v241_v0  ;;  %5586 = vmatprep.subr.mxu1 %v241_v0  ;;  %v238_v3 = vld [vmem:[%s8055_s1 + $0x60] sm:$0xff]  ;;  %v237_v4 = vld [vmem:[%s8055_s1 + $0x58] sm:$0xff]  ;;  %v236_v5 = vld [vmem:[%s8055_s1 + $0x50] sm:$0xff] }
   0xd   : > { %4651 = vmatpush3.msra.mxu0 %v241_v0  ;;  %5602 = vmatpush3.msra.mxu1 %v241_v0  ;;  %v235_v6 = vld [vmem:[%s8055_s1 + $0x48] sm:$0xff]  ;;  %v234_v7 = vld [vmem:[%s8055_s1 + $0x40] sm:$0xff]  ;;  %v233_v8 = vld [vmem:[%s8055_s1 + $0x38] sm:$0xff]  ;;  %s8461_s13 = smov (!%p161_p3, %s3838_s13), 1 }
   0xe   : > { %4652 = vmatprep.subr.mxu0 %v240_v1  ;;  %5587 = vmatprep.subr.mxu1 %v240_v1  ;;  %v232_v9 = vld [vmem:[%s8055_s1 + $0x30] sm:$0xff]  ;;  %v231_v10 = vld [vmem:[%s8055_s1 + $0x28] sm:$0xff]  ;;  %v230_v11 = vld [vmem:[%s8055_s1 + $0x20] sm:$0xff]  ;;  %s5618_s15 = smul.u32 432, %s8461_s13 }
   0xf   : > { %4653 = vmatpush3.msra.mxu0 %v240_v1  ;;  %5603 = vmatpush3.msra.mxu1 %v240_v1  ;;  %v229_v12 = vld [vmem:[%s8055_s1 + $0x18] sm:$0xff]  ;;  %v228_v13 = vld [vmem:[%s8055_s1 + $0x10] sm:$0xff]  ;;  %v227_v14 = vld [vmem:[%s8055_s1 + $0x8] sm:$0xff] }
  0x10   : > { %4654 = vmatprep.subr.mxu0 %v239_v2  ;;  %5588 = vmatprep.subr.mxu1 %v239_v2  ;;  %s5766_s22 = scalar_lea.vmem %s8054_s0, %s5618_s15  ;;  %v226_v15 = vld [vmem:[%s8055_s1] sm:$0xff]  ;;  %v3942_v20 = vld [vmem:[%s8055_s1 + $0x1f8] sm:$0xff]  ;;  %v3941_v24 = vld [vmem:[%s8055_s1 + $0x1f0] sm:$0xff] }
  0x11   : > { %4655 = vmatpush3.msra.mxu0 %v239_v2  ;;  %5604 = vmatpush3.msra.mxu1 %v239_v2  ;;  %v5772_v16 = vld [vmem:[%s5766_s22] sm:$0xff]  ;;  %v5778_v18 = vld [vmem:[%s5766_s22 + $0x8] sm:$0xff]  ;;  %v3958_v21 = vld [vmem:[%s8055_s1 + $0x278] sm:$0xff] }
  0x12   : > { %4656 = vmatprep.subr.mxu0 %v238_v3  ;;  %5589 = vmatprep.subr.mxu1 %v238_v3  ;;  %v5775_v17 = vld [vmem:[%s5766_s22 + $0xc0] sm:$0xff]  ;;  %v5781_v19 = vld [vmem:[%s5766_s22 + $0xc8] sm:$0xff]  ;;  %v5792_v22 = vld [vmem:[%s5766_s22 + $0x10] sm:$0xff] }
  0x13   : > { %4657 = vmatpush3.msra.mxu0 %v238_v3  ;;  %5605 = vmatpush3.msra.mxu1 %v238_v3  ;;  %v5797_v23 = vld [vmem:[%s5766_s22 + $0xd0] sm:$0xff]  ;;  %v5803_v25 = vld [vmem:[%s5766_s22 + $0xd8] sm:$0xff]  ;;  %v3940_v28 = vld [vmem:[%s8055_s1 + $0x1e8] sm:$0xff] }
  0x14   : > { %4658 = vmatprep.subr.mxu0 %v237_v4  ;;  %5590 = vmatprep.subr.mxu1 %v237_v4  ;;  %v5807_v26 = vld [vmem:[%s5766_s22 + $0x18] sm:$0xff]  ;;  %v3957_v27 = vld [vmem:[%s8055_s1 + $0x270] sm:$0xff]  ;;  %v5818_v29 = vld [vmem:[%s5766_s22 + $0x20] sm:$0xff] }
  0x15   : > { %4659 = vmatpush3.msra.mxu0 %v237_v4  ;;  %5606 = vmatpush3.msra.mxu1 %v237_v4  ;;  %v5822_v30 = vld [vmem:[%s5766_s22 + $0xe0] sm:$0xff]  ;;  %v5825_v31 = vld [vmem:[%s5766_s22 + $0x28] sm:$0xff]  ;;  %v5841_v35 = vld [vmem:[%s5766_s22 + $0x30] sm:$0xff] }
  0x16   : > { %4660 = vmatprep.subr.mxu0 %v236_v5  ;;  %5591 = vmatprep.subr.mxu1 %v236_v5  ;;  %v5828_v32 = vld [vmem:[%s5766_s22 + $0xe8] sm:$0xff]  ;;  %v3939_v34 = vld [vmem:[%s8055_s1 + $0x1e0] sm:$0xff]  ;;  %v5844_v36 = vld [vmem:[%s5766_s22 + $0xf0] sm:$0xff] }
  0x17   : > { %4661 = vmatpush3.msra.mxu0 %v236_v5  ;;  %5607 = vmatpush3.msra.mxu1 %v236_v5  ;;  %v3956_v33 = vld [vmem:[%s8055_s1 + $0x268] sm:$0xff]  ;;  %v3955_v37 = vld [vmem:[%s8055_s1 + $0x260] sm:$0xff]  ;;  %v5850_v38 = vld [vmem:[%s5766_s22 + $0x38] sm:$0xff] }
  0x18   : > { %4662 = vmatprep.subr.mxu0 %v235_v6  ;;  %5592 = vmatprep.subr.mxu1 %v235_v6  ;;  %v5853_v39 = vld [vmem:[%s5766_s22 + $0xf8] sm:$0xff]  ;;  %v5865_v42 = vld [vmem:[%s5766_s22 + $0x40] sm:$0xff]  ;;  %v3937_v44 = vld [vmem:[%s8055_s1 + $0x1d0] sm:$0xff] }
  0x19   : > { %4663 = vmatpush3.msra.mxu0 %v235_v6  ;;  %5608 = vmatpush3.msra.mxu1 %v235_v6  ;;  %v3938_v40 = vld [vmem:[%s8055_s1 + $0x1d8] sm:$0xff]  ;;  %v5869_v43 = vld [vmem:[%s5766_s22 + $0x100] sm:$0xff]  ;;  %v5875_v45 = vld [vmem:[%s5766_s22 + $0x108] sm:$0xff] }
  0x1a   : > { %4664 = vmatprep.subr.mxu0 %v234_v7  ;;  %5593 = vmatprep.subr.mxu1 %v234_v7  ;;  %v3954_v41 = vld [vmem:[%s8055_s1 + $0x258] sm:$0xff]  ;;  %v5879_v46 = vld [vmem:[%s5766_s22 + $0x48] sm:$0xff]  ;;  %v3953_v47 = vld [vmem:[%s8055_s1 + $0x250] sm:$0xff] }
  0x1b   : > { %4665 = vmatpush3.msra.mxu0 %v234_v7  ;;  %5609 = vmatpush3.msra.mxu1 %v234_v7  ;;  %v3936_v48 = vld [vmem:[%s8055_s1 + $0x1c8] sm:$0xff]  ;;  %v5890_v49 = vld [vmem:[%s5766_s22 + $0x50] sm:$0xff]  ;;  %v5897_v51 = vld [vmem:[%s5766_s22 + $0x58] sm:$0xff] }
  0x1c   : > { %4666 = vmatprep.subr.mxu0 %v233_v8  ;;  %5594 = vmatprep.subr.mxu1 %v233_v8  ;;  %v5894_v50 = vld [vmem:[%s5766_s22 + $0x110] sm:$0xff]  ;;  %v5900_v52 = vld [vmem:[%s5766_s22 + $0x118] sm:$0xff]  ;;  %v3952_v53 = vld [vmem:[%s8055_s1 + $0x248] sm:$0xff] }
  0x1d   : > { %4667 = vmatpush3.msra.mxu0 %v233_v8  ;;  %5610 = vmatpush3.msra.mxu1 %v233_v8  ;;  %v3935_v54 = vld [vmem:[%s8055_s1 + $0x1c0] sm:$0xff]  ;;  %v5922_v58 = vld [vmem:[%s5766_s22 + $0x68] sm:$0xff]  ;;  %v3934_v60 = vld [vmem:[%s8055_s1 + $0x1b8] sm:$0xff] }
  0x1e   : > { %4668 = vmatprep.subr.mxu0 %v232_v9  ;;  %5595 = vmatprep.subr.mxu1 %v232_v9  ;;  %v5913_v55 = vld [vmem:[%s5766_s22 + $0x60] sm:$0xff]  ;;  %v5925_v59 = vld [vmem:[%s5766_s22 + $0x128] sm:$0xff]  ;;  %v3950_v61 = vld [vmem:[%s8055_s1 + $0x238] sm:$0xff] }
  0x1f   : > { %4669 = vmatpush3.msra.mxu0 %v232_v9  ;;  %5611 = vmatpush3.msra.mxu1 %v232_v9  ;;  %v5916_v56 = vld [vmem:[%s5766_s22 + $0x120] sm:$0xff]  ;;  %v5937_v62 = vld [vmem:[%s5766_s22 + $0x70] sm:$0xff]  ;;  %v5947_v1 = vld [vmem:[%s5766_s22 + $0x138] sm:$0xff] }
  0x20   : > { %4670 = vmatprep.subr.mxu0 %v231_v10  ;;  %5596 = vmatprep.subr.mxu1 %v231_v10  ;;  %v3951_v57 = vld [vmem:[%s8055_s1 + $0x240] sm:$0xff]  ;;  %v5941_v63 = vld [vmem:[%s5766_s22 + $0x130] sm:$0xff]  ;;  %v5951_v2 = vld [vmem:[%s5766_s22 + $0x78] sm:$0xff] }
  0x21   : > { %4671 = vmatpush3.msra.mxu0 %v231_v10  ;;  %5612 = vmatpush3.msra.mxu1 %v231_v10  ;;  %v3933_v0 = vld [vmem:[%s8055_s1 + $0x1b0] sm:$0xff]  ;;  %v3932_v4 = vld [vmem:[%s8055_s1 + $0x1a8] sm:$0xff]  ;;  %v5962_v5 = vld [vmem:[%s5766_s22 + $0x80] sm:$0xff] }
  0x22   : > { %4672 = vmatprep.subr.mxu0 %v230_v11  ;;  %5597 = vmatprep.subr.mxu1 %v230_v11  ;;  %v3949_v3 = vld [vmem:[%s8055_s1 + $0x230] sm:$0xff]  ;;  %v5966_v6 = vld [vmem:[%s5766_s22 + $0x140] sm:$0xff]  ;;  %v5969_v7 = vld [vmem:[%s5766_s22 + $0x88] sm:$0xff] }
  0x23   : > { %4673 = vmatpush3.msra.mxu0 %v230_v11  ;;  %5613 = vmatpush3.msra.mxu1 %v230_v11  ;;  %v5972_v8 = vld [vmem:[%s5766_s22 + $0x148] sm:$0xff]  ;;  %v3931_v10 = vld [vmem:[%s8055_s1 + $0x1a0] sm:$0xff]  ;;  %v5985_v11 = vld [vmem:[%s5766_s22 + $0x90] sm:$0xff] }
  0x24   : > { %4674 = vmatprep.subr.mxu0 %v229_v12  ;;  %5598 = vmatprep.subr.mxu1 %v229_v12  ;;  %v3948_v9 = vld [vmem:[%s8055_s1 + $0x228] sm:$0xff] }
  0x25   : > { %4675 = vmatpush3.msra.mxu0 %v229_v12  ;;  %5614 = vmatpush3.msra.mxu1 %v229_v12  ;;  %v5988_v12 = vld [vmem:[%s5766_s22 + $0x150] sm:$0xff] }
  0x26   : > { %4676 = vmatprep.subr.mxu0 %v228_v13  ;;  %5599 = vmatprep.subr.mxu1 %v228_v13 }
  0x27   : > { %4677 = vmatpush3.msra.mxu0 %v228_v13  ;;  %5615 = vmatpush3.msra.mxu1 %v228_v13  ;;  %v3947_v13 = vld [vmem:[%s8055_s1 + $0x220] sm:$0xff] }
  0x28   : > { %4678 = vmatprep.subr.mxu0 %v227_v14  ;;  %5600 = vmatprep.subr.mxu1 %v227_v14 }
  0x29   : > { %4679 = vmatpush3.msra.mxu0 %v227_v14  ;;  %5616 = vmatpush3.msra.mxu1 %v227_v14  ;;  %v5994_v14 = vld [vmem:[%s5766_s22 + $0x98] sm:$0xff] }
  0x2a   : > { %4680 = vmatprep.subr.mxu0 %v226_v15  ;;  %5601 = vmatprep.subr.mxu1 %v226_v15 }
  0x2b   : > { %4681 = vmatpush3.msra.mxu0 %v226_v15  ;;  %5617 = vmatpush3.msra.mxu1 %v226_v15  ;;  %v5997_v15 = vld [vmem:[%s5766_s22 + $0x158] sm:$0xff] }
  0x2c   : > { %4682 = vmatprep.mubr.f32.mxu0 %v5772_v16  ;;  %4718 = vmatprep.mubr.f32.mxu1 %v5775_v17 }
  0x2d   : > { %4683 = vmatmul.mubr.f32.vlgmr.msra.gmra.mxu0 %v5778_v18  ;;  %4719 = vmatmul.mubr.f32.vlgmr.msra.gmra.mxu1 %v5781_v19 }
  0x2e   : > { %4754 = vmatprep.subr.mxu1 %v3942_v20  ;;  %4858 = vmatprep.subr.mxu0 %v3958_v21 }
  0x2f   : > { %4755 = vmatpush3.msra.mxu1 %v3942_v20  ;;  %4685 = vmatprep.mubr.f32.mxu0 %v5792_v22  ;;  %v3930_v20 = vld [vmem:[%s8055_s1 + $0x198] sm:$0xff] }
  0x30   : > { %4721 = vmatprep.mubr.f32.mxu1 %v5797_v23  ;;  %4756 = vmatprep.subr.mxu1 %v3941_v24 }
  0x31   : > { %4859 = vmatpush3.msra.mxu0 %v3958_v21  ;;  %4722 = vmatmul.mubr.f32.gmra.mxu1 %v5803_v25  ;;  %v3946_v21 = vld [vmem:[%s8055_s1 + $0x218] sm:$0xff] }
  0x32   : > { %4686 = vmatmul.mubr.f32.gmra.mxu0 %v5807_v26  ;;  %4757 = vmatpush3.msra.mxu1 %v3941_v24  ;;  %v6009_v24 = vld [vmem:[%s5766_s22 + $0xa0] sm:$0xff] }
  0x33   : > { %4860 = vmatprep.subr.mxu0 %v3957_v27  ;;  %4758 = vmatprep.subr.mxu1 %v3940_v28 }
  0x34   : > { %4861 = vmatpush3.msra.mxu0 %v3957_v27  ;;  %4688 = vmatprep.mubr.f32.mxu0 %v5818_v29  ;;  %v6013_v27 = vld [vmem:[%s5766_s22 + $0x160] sm:$0xff] }
  0x35   : > { %4724 = vmatprep.mubr.f32.mxu1 %v5822_v30  ;;  %4759 = vmatpush3.msra.mxu1 %v3940_v28  ;;  %v3929_v28 = vld [vmem:[%s8055_s1 + $0x190] sm:$0xff] }
  0x36   : > { %4689 = vmatmul.mubr.f32.gmra.mxu0 %v5825_v31  ;;  %4725 = vmatmul.mubr.f32.gmra.mxu1 %v5828_v32 }
  0x37   : > { %4862 = vmatprep.subr.mxu0 %v3956_v33  ;;  %4760 = vmatprep.subr.mxu1 %v3939_v34 }
  0x38   : > { %4863 = vmatpush3.msra.mxu0 %v3956_v33  ;;  %4761 = vmatpush3.msra.mxu1 %v3939_v34  ;;  %v6019_v33 = vld [vmem:[%s5766_s22 + $0x168] sm:$0xff] }
  0x39   : > { %4691 = vmatprep.mubr.f32.mxu0 %v5841_v35  ;;  %4727 = vmatprep.mubr.f32.mxu1 %v5844_v36  ;;  %v6023_v34 = vld [vmem:[%s5766_s22 + $0xa8] sm:$0xff] }
  0x3a   : > { %4864 = vmatprep.subr.mxu0 %v3955_v37  ;;  %4692 = vmatmul.mubr.f32.gmra.mxu0 %v5850_v38 }
  0x3b   : > { %4728 = vmatmul.mubr.f32.gmra.mxu1 %v5853_v39  ;;  %4762 = vmatprep.subr.mxu1 %v3938_v40 }
  0x3c   : > { %4865 = vmatpush3.msra.mxu0 %v3955_v37  ;;  %4763 = vmatpush3.msra.mxu1 %v3938_v40  ;;  %v3945_v37 = vld [vmem:[%s8055_s1 + $0x210] sm:$0xff]  ;;  %v3928_v40 = vld [vmem:[%s8055_s1 + $0x188] sm:$0xff] }
  0x3d   : > { %4866 = vmatprep.subr.mxu0 %v3954_v41  ;;  %4694 = vmatprep.mubr.f32.mxu0 %v5865_v42 }
  0x3e   : > { %4730 = vmatprep.mubr.f32.mxu1 %v5869_v43  ;;  %4764 = vmatprep.subr.mxu1 %v3937_v44 }
  0x3f   : > { %4867 = vmatpush3.msra.mxu0 %v3954_v41  ;;  %4731 = vmatmul.mubr.f32.gmra.mxu1 %v5875_v45  ;;  %v6034_v41 = vld [vmem:[%s5766_s22 + $0xb0] sm:$0xff] }
  0x40   : > { %4695 = vmatmul.mubr.f32.gmra.mxu0 %v5879_v46  ;;  %4765 = vmatpush3.msra.mxu1 %v3937_v44  ;;  %v6038_v44 = vld [vmem:[%s5766_s22 + $0x170] sm:$0xff] }
  0x41   : > { %4868 = vmatprep.subr.mxu0 %v3953_v47  ;;  %4766 = vmatprep.subr.mxu1 %v3936_v48 }
  0x42   : > { %4869 = vmatpush3.msra.mxu0 %v3953_v47  ;;  %4697 = vmatprep.mubr.f32.mxu0 %v5890_v49  ;;  %v6041_v47 = vld [vmem:[%s5766_s22 + $0xb8] sm:$0xff] }
  0x43   : > { %4733 = vmatprep.mubr.f32.mxu1 %v5894_v50  ;;  %4767 = vmatpush3.msra.mxu1 %v3936_v48  ;;  %v6044_v48 = vld [vmem:[%s5766_s22 + $0x178] sm:$0xff] }
  0x44   : > { %4698 = vmatmul.mubr.f32.gmra.mxu0 %v5897_v51  ;;  %4734 = vmatmul.mubr.f32.gmra.mxu1 %v5900_v52 }
  0x45   : > { %4870 = vmatprep.subr.mxu0 %v3952_v53  ;;  %4768 = vmatprep.subr.mxu1 %v3935_v54 }
  0x46   : > { %4871 = vmatpush3.msra.mxu0 %v3952_v53  ;;  %4769 = vmatpush3.msra.mxu1 %v3935_v54  ;;  %v3944_v53 = vld [vmem:[%s8055_s1 + $0x208] sm:$0xff]  ;;  %v3927_v54 = vld [vmem:[%s8055_s1 + $0x180] sm:$0xff] }
  0x47   : > { %4700 = vmatprep.mubr.f32.mxu0 %v5913_v55  ;;  %4736 = vmatprep.mubr.f32.mxu1 %v5916_v56 }
  0x48   : > { %4872 = vmatprep.subr.mxu0 %v3951_v57  ;;  %4701 = vmatmul.mubr.f32.gmra.mxu0 %v5922_v58 }
  0x49   : > { %4737 = vmatmul.mubr.f32.gmra.mxu1 %v5925_v59  ;;  %4770 = vmatprep.subr.mxu1 %v3934_v60 }
  0x4a   : > { %4873 = vmatpush3.msra.mxu0 %v3951_v57  ;;  %4771 = vmatpush3.msra.mxu1 %v3934_v60  ;;  %v3943_v57 = vld [vmem:[%s8055_s1 + $0x200] sm:$0xff]  ;;  %v3862_v60 = vld [vmem:[%s8055_s1 + $0xf8] sm:$0xff] }
  0x4b   : > { %4874 = vmatprep.subr.mxu0 %v3950_v61  ;;  %4703 = vmatprep.mubr.f32.mxu0 %v5937_v62 }
  0x4c   : > { %4739 = vmatprep.mubr.f32.mxu1 %v5941_v63  ;;  %4772 = vmatprep.subr.mxu1 %v3933_v0 }
  0x4d   : > { %4875 = vmatpush3.msra.mxu0 %v3950_v61  ;;  %4740 = vmatmul.mubr.f32.gmra.mxu1 %v5947_v1  ;;  %v3974_v61 = vld [vmem:[%s8055_s1 + $0x2f8] sm:$0xff] }
  0x4e   : > { %4704 = vmatmul.mubr.f32.gmra.mxu0 %v5951_v2  ;;  %4773 = vmatpush3.msra.mxu1 %v3933_v0  ;;  %v3861_v0 = vld [vmem:[%s8055_s1 + $0xf0] sm:$0xff] }
  0x4f   : > { %4876 = vmatprep.subr.mxu0 %v3949_v3  ;;  %4774 = vmatprep.subr.mxu1 %v3932_v4 }
  0x50   : > { %4877 = vmatpush3.msra.mxu0 %v3949_v3  ;;  %4706 = vmatprep.mubr.f32.mxu0 %v5962_v5  ;;  %v3973_v3 = vld [vmem:[%s8055_s1 + $0x2f0] sm:$0xff] }
  0x51   : > { %4742 = vmatprep.mubr.f32.mxu1 %v5966_v6  ;;  %4775 = vmatpush3.msra.mxu1 %v3932_v4  ;;  %v3860_v4 = vld [vmem:[%s8055_s1 + $0xe8] sm:$0xff] }
  0x52   : > { %4707 = vmatmul.mubr.f32.gmra.mxu0 %v5969_v7  ;;  %4743 = vmatmul.mubr.f32.gmra.mxu1 %v5972_v8 }
  0x53   : > { %4878 = vmatprep.subr.mxu0 %v3948_v9  ;;  %4776 = vmatprep.subr.mxu1 %v3931_v10 }
  0x54   : > { %4879 = vmatpush3.msra.mxu0 %v3948_v9  ;;  %4777 = vmatpush3.msra.mxu1 %v3931_v10  ;;  %v3972_v9 = vld [vmem:[%s8055_s1 + $0x2e8] sm:$0xff]  ;;  %v3859_v10 = vld [vmem:[%s8055_s1 + $0xe0] sm:$0xff] }
  0x55   : > { %4709 = vmatprep.mubr.f32.mxu0 %v5985_v11  ;;  %4745 = vmatprep.mubr.f32.mxu1 %v5988_v12 }
  0x56   : > { %4880 = vmatprep.subr.mxu0 %v3947_v13  ;;  %4710 = vmatmul.mubr.f32.gmra.mxu0 %v5994_v14 }
  0x57   : > { %4746 = vmatmul.mubr.f32.gmra.mxu1 %v5997_v15  ;;  %4778 = vmatprep.subr.mxu1 %v3930_v20 }
  0x58   : > { %4881 = vmatpush3.msra.mxu0 %v3947_v13  ;;  %4779 = vmatpush3.msra.mxu1 %v3930_v20  ;;  %v3971_v13 = vld [vmem:[%s8055_s1 + $0x2e0] sm:$0xff]  ;;  %v3858_v20 = vld [vmem:[%s8055_s1 + $0xd8] sm:$0xff] }
  0x59   : > { %4882 = vmatprep.subr.mxu0 %v3946_v21  ;;  %4712 = vmatprep.mubr.f32.mxu0 %v6009_v24 }
  0x5a   : > { %4748 = vmatprep.mubr.f32.mxu1 %v6013_v27  ;;  %4780 = vmatprep.subr.mxu1 %v3929_v28 }
  0x5b   : > { %4883 = vmatpush3.msra.mxu0 %v3946_v21  ;;  %4749 = vmatmul.mubr.f32.gmra.mxu1 %v6019_v33  ;;  %v3970_v21 = vld [vmem:[%s8055_s1 + $0x2d8] sm:$0xff] }
  0x5c   : > { %4713 = vmatmul.mubr.f32.gmra.mxu0 %v6023_v34  ;;  %4781 = vmatpush3.msra.mxu1 %v3929_v28  ;;  %v3857_v28 = vld [vmem:[%s8055_s1 + $0xd0] sm:$0xff] }
  0x5d   : > { %4884 = vmatprep.subr.mxu0 %v3945_v37  ;;  %4782 = vmatprep.subr.mxu1 %v3928_v40 }
  0x5e   : > { %4885 = vmatpush3.msra.mxu0 %v3945_v37  ;;  %4715 = vmatprep.mubr.f32.mxu0 %v6034_v41  ;;  %v3969_v37 = vld [vmem:[%s8055_s1 + $0x2d0] sm:$0xff] }
  0x5f   : > { %4751 = vmatprep.mubr.f32.mxu1 %v6038_v44  ;;  %4783 = vmatpush3.msra.mxu1 %v3928_v40  ;;  %v3856_v40 = vld [vmem:[%s8055_s1 + $0xc8] sm:$0xff] }
  0x60   : > { %4716 = vmatmul.mubr.f32.gmra.mxu0 %v6041_v47  ;;  %4752 = vmatmul.mubr.f32.gmra.mxu1 %v6044_v48 }
  0x61   : > { %4886 = vmatprep.subr.mxu0 %v3944_v53  ;;  %4784 = vmatprep.subr.mxu1 %v3927_v54 }
  0x62   : > { %4887 = vmatpush3.msra.mxu0 %v3944_v53  ;;  %4785 = vmatpush3.msra.mxu1 %v3927_v54  ;;  %v3968_v53 = vld [vmem:[%s8055_s1 + $0x2c8] sm:$0xff]  ;;  %v3855_v54 = vld [vmem:[%s8055_s1 + $0xc0] sm:$0xff] }
  0x63   : > { %4888 = vmatprep.subr.mxu0 %v3943_v57  ;;  %4786 = vmatprep.mubr.f32.mxu1 %v5807_v26 }
  0x64   : > { %4889 = vmatpush3.msra.mxu0 %v3943_v57  ;;  %4890 = vmatprep.mubr.f32.mxu0 %v5807_v26  ;;  %v3967_v57 = vld [vmem:[%s8055_s1 + $0x2c0] sm:$0xff] }
  0x65   : > { %4787 = vmatmul.mubr.f32.vlgmr.msra.gmra.mxu1 %v5818_v29  ;;  %4891 = vmatmul.mubr.f32.vlgmr.msra.gmra.mxu0 %v5818_v29 }
  0x66   : > { %4962 = vmatprep.subr.mxu1 %v3862_v60  ;;  %5066 = vmatprep.subr.mxu0 %v3974_v61 }
  0x67   : > { %4963 = vmatpush3.msra.mxu1 %v3862_v60  ;;  %4789 = vmatprep.mubr.f32.mxu1 %v5825_v31  ;;  %v3854_v60 = vld [vmem:[%s8055_s1 + $0xb8] sm:$0xff] }
  0x68   : > { %4893 = vmatprep.mubr.f32.mxu0 %v5825_v31  ;;  %5067 = vmatpush3.msra.mxu0 %v3974_v61  ;;  %v3966_v61 = vld [vmem:[%s8055_s1 + $0x2b8] sm:$0xff] }
  0x69   : > { %4790 = vmatmul.mubr.f32.gmra.mxu1 %v5841_v35  ;;  %4894 = vmatmul.mubr.f32.gmra.mxu0 %v5841_v35 }
  0x6a   : > { %4964 = vmatprep.subr.mxu1 %v3861_v0  ;;  %4792 = vmatprep.mubr.f32.mxu1 %v5850_v38 }
  0x6b   : > { %4896 = vmatprep.mubr.f32.mxu0 %v5850_v38  ;;  %4965 = vmatpush3.msra.mxu1 %v3861_v0  ;;  %v3853_v0 = vld [vmem:[%s8055_s1 + $0xb0] sm:$0xff] }
  0x6c   : > { %5068 = vmatprep.subr.mxu0 %v3973_v3  ;;  %4966 = vmatprep.subr.mxu1 %v3860_v4 }
  0x6d   : > { %4793 = vmatmul.mubr.f32.gmra.mxu1 %v5865_v42  ;;  %4897 = vmatmul.mubr.f32.gmra.mxu0 %v5865_v42 }
  0x6e   : > { %5069 = vmatpush3.msra.mxu0 %v3973_v3  ;;  %4795 = vmatprep.mubr.f32.mxu1 %v5879_v46  ;;  %v3965_v3 = vld [vmem:[%s8055_s1 + $0x2b0] sm:$0xff] }
  0x6f   : > { %4899 = vmatprep.mubr.f32.mxu0 %v5879_v46  ;;  %4967 = vmatpush3.msra.mxu1 %v3860_v4  ;;  %v3852_v4 = vld [vmem:[%s8055_s1 + $0xa8] sm:$0xff] }
  0x70   : > { %5070 = vmatprep.subr.mxu0 %v3972_v9  ;;  %4968 = vmatprep.subr.mxu1 %v3859_v10 }
  0x71   : > { %4796 = vmatmul.mubr.f32.gmra.mxu1 %v5890_v49  ;;  %4900 = vmatmul.mubr.f32.gmra.mxu0 %v5890_v49 }
  0x72   : > { %4798 = vmatprep.mubr.f32.mxu1 %v5897_v51  ;;  %4902 = vmatprep.mubr.f32.mxu0 %v5897_v51 }
  0x73   : > { %5071 = vmatpush3.msra.mxu0 %v3972_v9  ;;  %4969 = vmatpush3.msra.mxu1 %v3859_v10  ;;  %v3964_v9 = vld [vmem:[%s8055_s1 + $0x2a8] sm:$0xff]  ;;  %v3851_v10 = vld [vmem:[%s8055_s1 + $0xa0] sm:$0xff] }
  0x74   : > { %5072 = vmatprep.subr.mxu0 %v3971_v13  ;;  %4970 = vmatprep.subr.mxu1 %v3858_v20 }
  0x75   : > { %4799 = vmatmul.mubr.f32.gmra.mxu1 %v5913_v55  ;;  %4903 = vmatmul.mubr.f32.gmra.mxu0 %v5913_v55 }
  0x76   : > { %4801 = vmatprep.mubr.f32.mxu1 %v5922_v58  ;;  %4905 = vmatprep.mubr.f32.mxu0 %v5922_v58 }
  0x77   : > { %5073 = vmatpush3.msra.mxu0 %v3971_v13  ;;  %4971 = vmatpush3.msra.mxu1 %v3858_v20  ;;  %v3963_v13 = vld [vmem:[%s8055_s1 + $0x2a0] sm:$0xff]  ;;  %v3850_v20 = vld [vmem:[%s8055_s1 + $0x98] sm:$0xff] }
  0x78   : > { %5074 = vmatprep.subr.mxu0 %v3970_v21  ;;  %4972 = vmatprep.subr.mxu1 %v3857_v28 }
  0x79   : > { %4802 = vmatmul.mubr.f32.gmra.mxu1 %v5937_v62  ;;  %4906 = vmatmul.mubr.f32.gmra.mxu0 %v5937_v62 }
  0x7a   : > { %4804 = vmatprep.mubr.f32.mxu1 %v5951_v2  ;;  %4908 = vmatprep.mubr.f32.mxu0 %v5951_v2 }
  0x7b   : > { %5075 = vmatpush3.msra.mxu0 %v3970_v21  ;;  %4973 = vmatpush3.msra.mxu1 %v3857_v28  ;;  %v3962_v21 = vld [vmem:[%s8055_s1 + $0x298] sm:$0xff]  ;;  %v3849_v28 = vld [vmem:[%s8055_s1 + $0x90] sm:$0xff] }
  0x7c   : > { %5076 = vmatprep.subr.mxu0 %v3969_v37  ;;  %4974 = vmatprep.subr.mxu1 %v3856_v40 }
  0x7d   : > { %4805 = vmatmul.mubr.f32.gmra.mxu1 %v5962_v5  ;;  %4909 = vmatmul.mubr.f32.gmra.mxu0 %v5962_v5 }
  0x7e   : > { %4807 = vmatprep.mubr.f32.mxu1 %v5969_v7  ;;  %4911 = vmatprep.mubr.f32.mxu0 %v5969_v7 }
  0x7f   : > { %5077 = vmatpush3.msra.mxu0 %v3969_v37  ;;  %4975 = vmatpush3.msra.mxu1 %v3856_v40  ;;  %v3961_v37 = vld [vmem:[%s8055_s1 + $0x290] sm:$0xff]  ;;  %v3848_v40 = vld [vmem:[%s8055_s1 + $0x88] sm:$0xff] }
  0x80   : > { %5078 = vmatprep.subr.mxu0 %v3968_v53  ;;  %4976 = vmatprep.subr.mxu1 %v3855_v54 }
  0x81   : > { %4808 = vmatmul.mubr.f32.gmra.mxu1 %v5985_v11  ;;  %4912 = vmatmul.mubr.f32.gmra.mxu0 %v5985_v11 }
  0x82   : > { %4810 = vmatprep.mubr.f32.mxu1 %v5994_v14  ;;  %4914 = vmatprep.mubr.f32.mxu0 %v5994_v14 }
  0x83   : > { %5079 = vmatpush3.msra.mxu0 %v3968_v53  ;;  %4977 = vmatpush3.msra.mxu1 %v3855_v54  ;;  %v3960_v53 = vld [vmem:[%s8055_s1 + $0x288] sm:$0xff]  ;;  %v3847_v54 = vld [vmem:[%s8055_s1 + $0x80] sm:$0xff] }
  0x84   : > { %5080 = vmatprep.subr.mxu0 %v3967_v57  ;;  %4978 = vmatprep.subr.mxu1 %v3854_v60 }
  0x85   : > { %4811 = vmatmul.mubr.f32.gmra.mxu1 %v6009_v24  ;;  %4915 = vmatmul.mubr.f32.gmra.mxu0 %v6009_v24 }
  0x86   : > { %4813 = vmatprep.mubr.f32.mxu1 %v6023_v34  ;;  %4917 = vmatprep.mubr.f32.mxu0 %v6023_v34 }
  0x87   : > { %5081 = vmatpush3.msra.mxu0 %v3967_v57  ;;  %4979 = vmatpush3.msra.mxu1 %v3854_v60  ;;  %v3959_v57 = vld [vmem:[%s8055_s1 + $0x280] sm:$0xff]  ;;  %v3878_v60 = vld [vmem:[%s8055_s1 + $0x178] sm:$0xff] }
  0x88   : > { %5082 = vmatprep.subr.mxu0 %v3966_v61  ;;  %4980 = vmatprep.subr.mxu1 %v3853_v0 }
  0x89   : > { %4814 = vmatmul.mubr.f32.gmra.mxu1 %v6034_v41  ;;  %4918 = vmatmul.mubr.f32.gmra.mxu0 %v6034_v41 }
  0x8a   : > { %4816 = vmatprep.mubr.f32.mxu1 %v6041_v47  ;;  %4920 = vmatprep.mubr.f32.mxu0 %v6041_v47 }
  0x8b   : > { %5083 = vmatpush3.msra.mxu0 %v3966_v61  ;;  %4981 = vmatpush3.msra.mxu1 %v3853_v0  ;;  %v4038_v61 = vld [vmem:[%s8055_s1 + $0x378] sm:$0xff]  ;;  %v6252_v0 = vld [vmem:[%s5766_s22 + $0x180] sm:$0xff] }
  0x8c   : > { %5084 = vmatprep.subr.mxu0 %v3965_v3  ;;  %4982 = vmatprep.subr.mxu1 %v3852_v4 }
  0x8d   : > { %4817 = vmatmul.mubr.f32.gmra.mxu1 %v5775_v17  ;;  %4921 = vmatmul.mubr.f32.gmra.mxu0 %v5775_v17 }
  0x8e   : > { %4819 = vmatprep.mubr.f32.mxu1 %v5781_v19  ;;  %4923 = vmatprep.mubr.f32.mxu0 %v5781_v19 }
  0x8f   : > { %5085 = vmatpush3.msra.mxu0 %v3965_v3  ;;  %4983 = vmatpush3.msra.mxu1 %v3852_v4  ;;  %v6255_v3 = vld [vmem:[%s5766_s22 + $0x188] sm:$0xff]  ;;  %v6262_v4 = vld [vmem:[%s5766_s22 + $0x190] sm:$0xff] }
  0x90   : > { %5086 = vmatprep.subr.mxu0 %v3964_v9  ;;  %4984 = vmatprep.subr.mxu1 %v3851_v10 }
  0x91   : > { %4820 = vmatmul.mubr.f32.gmra.mxu1 %v5797_v23  ;;  %4924 = vmatmul.mubr.f32.gmra.mxu0 %v5797_v23 }
  0x92   : > { %4822 = vmatprep.mubr.f32.mxu1 %v5803_v25  ;;  %4926 = vmatprep.mubr.f32.mxu0 %v5803_v25 }
  0x93   : > { %5087 = vmatpush3.msra.mxu0 %v3964_v9  ;;  %4985 = vmatpush3.msra.mxu1 %v3851_v10  ;;  %v3877_v9 = vld [vmem:[%s8055_s1 + $0x170] sm:$0xff] }
  0x94   : > { %5088 = vmatprep.subr.mxu0 %v3963_v13  ;;  %4986 = vmatprep.subr.mxu1 %v3850_v20  ;;  %v4037_v10 = vld [vmem:[%s8055_s1 + $0x370] sm:$0xff] }
  0x95   : > { %4823 = vmatmul.mubr.f32.gmra.mxu1 %v5822_v30  ;;  %4927 = vmatmul.mubr.f32.gmra.mxu0 %v5822_v30 }
  0x96   : > { %4825 = vmatprep.mubr.f32.mxu1 %v5828_v32  ;;  %4929 = vmatprep.mubr.f32.mxu0 %v5828_v32 }
  0x97   : > { %5089 = vmatpush3.msra.mxu0 %v3963_v13  ;;  %4987 = vmatpush3.msra.mxu1 %v3850_v20  ;;  %v3867_v13 = vld [vmem:[%s8055_s1 + $0x120] sm:$0xff] }
  0x98   : > { %5090 = vmatprep.subr.mxu0 %v3962_v21  ;;  %4988 = vmatprep.subr.mxu1 %v3849_v28 }
  0x99   : > { %4826 = vmatmul.mubr.f32.gmra.mxu1 %v5844_v36  ;;  %4930 = vmatmul.mubr.f32.gmra.mxu0 %v5844_v36 }
  0x9a   : > { %4828 = vmatprep.mubr.f32.mxu1 %v5853_v39  ;;  %4932 = vmatprep.mubr.f32.mxu0 %v5853_v39 }
  0x9b   : > { %5091 = vmatpush3.msra.mxu0 %v3962_v21  ;;  %4989 = vmatpush3.msra.mxu1 %v3849_v28  ;;  %v6397_v21 = vld [vmem:[%s5766_s22 + $0xc0] sm:$0xff] }
  0x9c   : > { %5092 = vmatprep.subr.mxu0 %v3961_v37  ;;  %4990 = vmatprep.subr.mxu1 %v3848_v40 }
  0x9d   : > { %4829 = vmatmul.mubr.f32.gmra.mxu1 %v5869_v43  ;;  %4933 = vmatmul.mubr.f32.gmra.mxu0 %v5869_v43 }
  0x9e   : > { %4831 = vmatprep.mubr.f32.mxu1 %v5875_v45  ;;  %4935 = vmatprep.mubr.f32.mxu0 %v5875_v45 }
  0x9f   : > { %5093 = vmatpush3.msra.mxu0 %v3961_v37  ;;  %4991 = vmatpush3.msra.mxu1 %v3848_v40  ;;  %v6404_v37 = vld [vmem:[%s5766_s22 + $0xc8] sm:$0xff]  ;;  %v3865_v40 = vld [vmem:[%s8055_s1 + $0x110] sm:$0xff] }
  0xa0   : > { %5094 = vmatprep.subr.mxu0 %v3960_v53  ;;  %4992 = vmatprep.subr.mxu1 %v3847_v54 }
  0xa1   : > { %4832 = vmatmul.mubr.f32.gmra.mxu1 %v5894_v50  ;;  %4936 = vmatmul.mubr.f32.gmra.mxu0 %v5894_v50 }
  0xa2   : > { %4834 = vmatprep.mubr.f32.mxu1 %v5900_v52  ;;  %4938 = vmatprep.mubr.f32.mxu0 %v5900_v52 }
  0xa3   : > { %5095 = vmatpush3.msra.mxu0 %v3960_v53  ;;  %4993 = vmatpush3.msra.mxu1 %v3847_v54  ;;  %v6415_v53 = vld [vmem:[%s5766_s22 + $0xd0] sm:$0xff] }
  0xa4   : > { %5096 = vmatprep.subr.mxu0 %v3959_v57  ;;  %5170 = vmatprep.subr.mxu1 %v3878_v60 }
  0xa5   : > { %4835 = vmatmul.mubr.f32.gmra.mxu1 %v5916_v56  ;;  %4939 = vmatmul.mubr.f32.gmra.mxu0 %v5916_v56 }
  0xa6   : > { %4837 = vmatprep.mubr.f32.mxu1 %v5925_v59  ;;  %4941 = vmatprep.mubr.f32.mxu0 %v5925_v59 }
  0xa7   : > { %5097 = vmatpush3.msra.mxu0 %v3959_v57 }
  0xa8   : > { %5274 = vmatprep.subr.mxu0 %v4038_v61 }
  0xa9   : > { %4838 = vmatmul.mubr.f32.gmra.mxu1 %v5941_v63  ;;  %4942 = vmatmul.mubr.f32.gmra.mxu0 %v5941_v63 }
  0xaa   : > { %4840 = vmatprep.mubr.f32.mxu1 %v5947_v1  ;;  %4944 = vmatprep.mubr.f32.mxu0 %v5947_v1 }
  0xad   : > { %4841 = vmatmul.mubr.f32.gmra.mxu1 %v5966_v6  ;;  %4945 = vmatmul.mubr.f32.gmra.mxu0 %v5966_v6 }
  0xae   : > { %4843 = vmatprep.mubr.f32.mxu1 %v5972_v8  ;;  %4947 = vmatprep.mubr.f32.mxu0 %v5972_v8 }
  0xb1   : > { %4844 = vmatmul.mubr.f32.gmra.mxu1 %v5988_v12  ;;  %4948 = vmatmul.mubr.f32.gmra.mxu0 %v5988_v12 }
  0xb2   : > { %4846 = vmatprep.mubr.f32.mxu1 %v5997_v15  ;;  %4950 = vmatprep.mubr.f32.mxu0 %v5997_v15 }
  0xb5   : > { %4847 = vmatmul.mubr.f32.gmra.mxu1 %v6013_v27  ;;  %4951 = vmatmul.mubr.f32.gmra.mxu0 %v6013_v27 }
  0xb6   : > { %4849 = vmatprep.mubr.f32.mxu1 %v6019_v33  ;;  %4953 = vmatprep.mubr.f32.mxu0 %v6019_v33 }
  0xb9   : > { %4850 = vmatmul.mubr.f32.gmra.mxu1 %v6038_v44  ;;  %4954 = vmatmul.mubr.f32.gmra.mxu0 %v6038_v44 }
  0xba   : > { %4852 = vmatprep.mubr.f32.mxu1 %v6044_v48  ;;  %4956 = vmatprep.mubr.f32.mxu0 %v6044_v48 }
  0xbd   : > { %4853 = vmatmul.mubr.f32.gmra.mxu1 %v6252_v0  ;;  %4957 = vmatmul.mubr.f32.gmra.mxu0 %v6252_v0 }
  0xbe   : > { %4855 = vmatprep.mubr.f32.mxu1 %v6255_v3  ;;  %4959 = vmatprep.mubr.f32.mxu0 %v6255_v3 }
  0xc1   : > { %4856 = vmatmul.mubr.f32.gmra.mxu1 %v6262_v4  ;;  %4960 = vmatmul.mubr.f32.gmra.mxu0 %v6262_v4 }
  0xc2   : > { %4994 = vmatprep.mubr.f32.mxu1 %v5772_v16  ;;  %5098 = vmatprep.mubr.f32.mxu0 %v5807_v26  ;;  %v3876_v16 = vld [vmem:[%s8055_s1 + $0x168] sm:$0xff] }
  0xc5   : > { %4995 = vmatmul.mubr.f32.vlgmr.msra.gmra.mxu1 %v5778_v18  ;;  %5099 = vmatmul.mubr.f32.vlgmr.msra.gmra.mxu0 %v5818_v29  ;;  %v4036_v18 = vld [vmem:[%s8055_s1 + $0x368] sm:$0xff] }
  0xc6   : > { %5171 = vmatpush3.msra.mxu1 %v3878_v60  ;;  %4997 = vmatprep.mubr.f32.mxu1 %v5792_v22  ;;  %v3875_v22 = vld [vmem:[%s8055_s1 + $0x160] sm:$0xff] }
  0xc7   : > { %5101 = vmatprep.mubr.f32.mxu0 %v5825_v31  ;;  %5275 = vmatpush3.msra.mxu0 %v4038_v61 }
  0xc8   : > { %5172 = vmatprep.subr.mxu1 %v3877_v9  ;;  %5276 = vmatprep.subr.mxu0 %v4037_v10 }
  0xc9   : > { %4998 = vmatmul.mubr.f32.gmra.mxu1 %v5807_v26  ;;  %5102 = vmatmul.mubr.f32.gmra.mxu0 %v5841_v35  ;;  %v4035_v26 = vld [vmem:[%s8055_s1 + $0x360] sm:$0xff] }
  0xca   : > { %5000 = vmatprep.mubr.f32.mxu1 %v5818_v29  ;;  %5104 = vmatprep.mubr.f32.mxu0 %v5850_v38  ;;  %v3874_v29 = vld [vmem:[%s8055_s1 + $0x158] sm:$0xff] }
  0xcb   : > { %5173 = vmatpush3.msra.mxu1 %v3877_v9  ;;  %5277 = vmatpush3.msra.mxu0 %v4037_v10  ;;  %v6424_v9 = vld [vmem:[%s5766_s22 + $0xd8] sm:$0xff]  ;;  %v4024_v10 = vld [vmem:[%s8055_s1 + $0x308] sm:$0xff] }
  0xcc   : > { %5174 = vmatprep.subr.mxu1 %v3876_v16  ;;  %5278 = vmatprep.subr.mxu0 %v4036_v18 }
  0xcd   : > { %5001 = vmatmul.mubr.f32.gmra.mxu1 %v5825_v31  ;;  %5105 = vmatmul.mubr.f32.gmra.mxu0 %v5865_v42  ;;  %v4034_v31 = vld [vmem:[%s8055_s1 + $0x358] sm:$0xff] }
  0xce   : > { %5003 = vmatprep.mubr.f32.mxu1 %v5841_v35  ;;  %5107 = vmatprep.mubr.f32.mxu0 %v5879_v46  ;;  %v3873_v35 = vld [vmem:[%s8055_s1 + $0x150] sm:$0xff] }
  0xcf   : > { %5175 = vmatpush3.msra.mxu1 %v3876_v16  ;;  %5279 = vmatpush3.msra.mxu0 %v4036_v18  ;;  %v6441_v18 = vld [vmem:[%s8056_s2] ss:$0 sm:$0xff] }
  0xd0   : > { %5176 = vmatprep.subr.mxu1 %v3875_v22  ;;  %5280 = vmatprep.subr.mxu0 %v4035_v26 }
  0xd1   : > { %5004 = vmatmul.mubr.f32.gmra.mxu1 %v5850_v38  ;;  %5108 = vmatmul.mubr.f32.gmra.mxu0 %v5890_v49  ;;  %v4033_v38 = vld [vmem:[%s8055_s1 + $0x350] sm:$0xff] }
  0xd2   : > { %5006 = vmatprep.mubr.f32.mxu1 %v5865_v42  ;;  %5110 = vmatprep.mubr.f32.mxu0 %v5897_v51  ;;  %v3872_v42 = vld [vmem:[%s8055_s1 + $0x148] sm:$0xff] }
  0xd3   : > { %5177 = vmatpush3.msra.mxu1 %v3875_v22  ;;  %5281 = vmatpush3.msra.mxu0 %v4035_v26 }
  0xd4   : > { %5178 = vmatprep.subr.mxu1 %v3874_v29  ;;  %5282 = vmatprep.subr.mxu0 %v4034_v31 }
  0xd5   : > { %5007 = vmatmul.mubr.f32.gmra.mxu1 %v5879_v46  ;;  %5111 = vmatmul.mubr.f32.gmra.mxu0 %v5913_v55  ;;  %v4032_v46 = vld [vmem:[%s8055_s1 + $0x348] sm:$0xff] }
  0xd6   : > { %5009 = vmatprep.mubr.f32.mxu1 %v5890_v49  ;;  %5113 = vmatprep.mubr.f32.mxu0 %v5922_v58  ;;  %v3871_v49 = vld [vmem:[%s8055_s1 + $0x140] sm:$0xff] }
  0xd7   : > { %5179 = vmatpush3.msra.mxu1 %v3874_v29  ;;  %5283 = vmatpush3.msra.mxu0 %v4034_v31  ;;  %v3863_v29 = vld [vmem:[%s8055_s1 + $0x100] sm:$0xff] }
  0xd8   : > { %5180 = vmatprep.subr.mxu1 %v3873_v35  ;;  %5284 = vmatprep.subr.mxu0 %v4033_v38  ;;  %v4023_v31 = vld [vmem:[%s8055_s1 + $0x300] sm:$0xff] }
  0xd9   : > { %5010 = vmatmul.mubr.f32.gmra.mxu1 %v5897_v51  ;;  %5114 = vmatmul.mubr.f32.gmra.mxu0 %v5937_v62  ;;  %v4031_v51 = vld [vmem:[%s8055_s1 + $0x340] sm:$0xff] }
  0xda   : > { %5012 = vmatprep.mubr.f32.mxu1 %v5913_v55  ;;  %5116 = vmatprep.mubr.f32.mxu0 %v5951_v2  ;;  %v3870_v55 = vld [vmem:[%s8055_s1 + $0x138] sm:$0xff] }
  0xdb   : > { %5181 = vmatpush3.msra.mxu1 %v3873_v35  ;;  %5285 = vmatpush3.msra.mxu0 %v4033_v38  ;;  %v6462_v35 = vld [vmem:[%s5766_s22 + $0xf0] sm:$0xff] }
  0xdc   : > { %5182 = vmatprep.subr.mxu1 %v3872_v42  ;;  %5286 = vmatprep.subr.mxu0 %v4032_v46 }
  0xdd   : > { %5013 = vmatmul.mubr.f32.gmra.mxu1 %v5922_v58  ;;  %5117 = vmatmul.mubr.f32.gmra.mxu0 %v5962_v5  ;;  %v4030_v58 = vld [vmem:[%s8055_s1 + $0x338] sm:$0xff] }
  0xde   : > { %5015 = vmatprep.mubr.f32.mxu1 %v5937_v62  ;;  %5119 = vmatprep.mubr.f32.mxu0 %v5969_v7  ;;  %v3869_v62 = vld [vmem:[%s8055_s1 + $0x130] sm:$0xff] }
  0xdf   : > { %5183 = vmatpush3.msra.mxu1 %v3872_v42  ;;  %5287 = vmatpush3.msra.mxu0 %v4032_v46 }
  0xe0   : > { %5184 = vmatprep.subr.mxu1 %v3871_v49  ;;  %5288 = vmatprep.subr.mxu0 %v4031_v51 }
  0xe1   : > { %5016 = vmatmul.mubr.f32.gmra.mxu1 %v5951_v2  ;;  %5120 = vmatmul.mubr.f32.gmra.mxu0 %v5985_v11  ;;  %v4029_v2 = vld [vmem:[%s8055_s1 + $0x330] sm:$0xff] }
  0xe2   : > { %5018 = vmatprep.mubr.f32.mxu1 %v5962_v5  ;;  %5122 = vmatprep.mubr.f32.mxu0 %v5994_v14  ;;  %v3868_v5 = vld [vmem:[%s8055_s1 + $0x128] sm:$0xff] }
  0xe3   : > { %5185 = vmatpush3.msra.mxu1 %v3871_v49  ;;  %5289 = vmatpush3.msra.mxu0 %v4031_v51  ;;  %v6472_v49 = vld [vmem:[%s5766_s22 + $0xf8] sm:$0xff] }
  0xe4   : > { %5186 = vmatprep.subr.mxu1 %v3870_v55  ;;  %5290 = vmatprep.subr.mxu0 %v4030_v58 }
  0xe5   : > { %5019 = vmatmul.mubr.f32.gmra.mxu1 %v5969_v7  ;;  %5123 = vmatmul.mubr.f32.gmra.mxu0 %v6009_v24  ;;  %v4028_v7 = vld [vmem:[%s8055_s1 + $0x328] sm:$0xff] }
  0xe6   : > { %5021 = vmatprep.mubr.f32.mxu1 %v5985_v11  ;;  %5125 = vmatprep.mubr.f32.mxu0 %v6023_v34 }
  0xe7   : > { %5187 = vmatpush3.msra.mxu1 %v3870_v55  ;;  %5291 = vmatpush3.msra.mxu0 %v4030_v58  ;;  %v6484_v55 = vld [vmem:[%s8055_s1 + $0x478] sm:$0xff] }
  0xe8   : > { %5188 = vmatprep.subr.mxu1 %v3869_v62  ;;  %5292 = vmatprep.subr.mxu0 %v4029_v2 }
  0xe9   : > { %5022 = vmatmul.mubr.f32.gmra.mxu1 %v5994_v14  ;;  %5126 = vmatmul.mubr.f32.gmra.mxu0 %v6034_v41 }
  0xea   : > { %5024 = vmatprep.mubr.f32.mxu1 %v6009_v24  ;;  %5128 = vmatprep.mubr.f32.mxu0 %v6041_v47  ;;  %v4027_v24 = vld [vmem:[%s8055_s1 + $0x320] sm:$0xff] }
  0xeb   : > { %5189 = vmatpush3.msra.mxu1 %v3869_v62  ;;  %5293 = vmatpush3.msra.mxu0 %v4029_v2 }
  0xec   : > { %5190 = vmatprep.subr.mxu1 %v3868_v5  ;;  %5294 = vmatprep.subr.mxu0 %v4028_v7 }
  0xed   : > { %5025 = vmatmul.mubr.f32.gmra.mxu1 %v6023_v34  ;;  %5129 = vmatmul.mubr.f32.gmra.mxu0 %v5775_v17  ;;  %v6370_v11 = vpop.f32.mrf.mxu0  ;;  %v6372_v14 = vpop.f32.mrf.mxu1 }
  0xee   : > { %5027 = vmatprep.mubr.f32.mxu1 %v6034_v41  ;;  %5131 = vmatprep.mubr.f32.mxu0 %v5781_v19  ;;  %v3866_v41 = vld [vmem:[%s8055_s1 + $0x118] sm:$0xff] }
  0xef   : > { %v6382_v34 = vpop.f32.mrf.mxu0  ;;  %v6384_v17 = vpop.f32.mrf.mxu1  ;;  %5191 = vmatpush3.msra.mxu1 %v3868_v5  ;;  %5295 = vmatpush3.msra.mxu0 %v4028_v7  ;;  %v4026_v19 = vld [vmem:[%s8055_s1 + $0x318] sm:$0xff]  ;;  %v6491_v5 = vld [vmem:[%s5766_s22 + $0x108] sm:$0xff] }
  0xf0   : > { %5192 = vmatprep.subr.mxu1 %v3867_v13  ;;  %5296 = vmatprep.subr.mxu0 %v4027_v24 }
  0xf1   : > { %5028 = vmatmul.mubr.f32.gmra.mxu1 %v6041_v47  ;;  %5132 = vmatmul.mubr.f32.gmra.mxu0 %v5797_v23  ;;  %v6388_v20 = vpop.f32.mrf.mxu1 }
  0xf2   : > { %5030 = vmatprep.mubr.f32.mxu1 %v6397_v21  ;;  %5134 = vmatprep.mubr.f32.mxu0 %v5803_v25  ;;  %v6401_v47 = vpop.f32.mrf.mxu0  ;;  %v4025_v25 = vld [vmem:[%s8055_s1 + $0x310] sm:$0xff] }
  0xf3   : > { %v430_v23 = vpop.f32.mrf.mxu1  ;;  %5193 = vmatpush3.msra.mxu1 %v3867_v13  ;;  %5297 = vmatpush3.msra.mxu0 %v4027_v24 }
  0xf4   : > { %v318_v28 = vpop.f32.mrf.mxu0  ;;  %5194 = vmatprep.subr.mxu1 %v3866_v41  ;;  %5298 = vmatprep.subr.mxu0 %v4026_v19 }
  0xf5   : > { %5031 = vmatmul.mubr.f32.gmra.mxu1 %v6404_v37  ;;  %5135 = vmatmul.mubr.f32.gmra.mxu0 %v5822_v30 }
  0xf6   : > { %5033 = vmatprep.mubr.f32.mxu1 %v6415_v53  ;;  %5137 = vmatprep.mubr.f32.mxu0 %v5828_v32  ;;  %v4690_v54 = vpop.f32.mrf.mxu0  ;;  %v4726_v57 = vpop.f32.mrf.mxu1  ;;  %v3864_v32 = vld [vmem:[%s8055_s1 + $0x108] sm:$0xff] }
  0xf7   : > { %5195 = vmatpush3.msra.mxu1 %v3866_v41  ;;  %5299 = vmatpush3.msra.mxu0 %v4026_v19 }
  0xf8   : > { %v6419_v60 = vpop.f32.mrf.mxu0  ;;  %v6421_v61 = vpop.f32.mrf.mxu1  ;;  %5196 = vmatprep.subr.mxu1 %v3865_v40  ;;  %5300 = vmatprep.subr.mxu0 %v4025_v25 }
  0xf9   : > { %5034 = vmatmul.mubr.f32.gmra.mxu1 %v6424_v9  ;;  %5138 = vmatmul.mubr.f32.gmra.mxu0 %v5844_v36 }
  0xfa   : > { %5036 = vmatprep.mubr.f32.mxu1 %v5822_v30  ;;  %5140 = vmatprep.mubr.f32.mxu0 %v5853_v39  ;;  %v6436_v16 = vpop.f32.mrf.mxu0  ;;  %v6449_v30 = vld [vmem:[%s5766_s22 + $0xe8] sm:$0xff] }
  0xfb   : > { %v4729_v36 = vpop.f32.mrf.mxu1  ;;  %5197 = vmatpush3.msra.mxu1 %v3865_v40  ;;  %5301 = vmatpush3.msra.mxu0 %v4025_v25 }
  0xfc   : > { %v6444_v22 = vadd.f32 %v4729_v36, %v6441_v18  ;;  %v6446_v26 = vpop.f32.mrf.mxu0  ;;  %5198 = vmatprep.subr.mxu1 %v3864_v32  ;;  %5302 = vmatprep.subr.mxu0 %v4024_v10 }
  0xfd   : > { %5037 = vmatmul.mubr.f32.gmra.mxu1 %v6449_v30  ;;  %5141 = vmatmul.mubr.f32.gmra.mxu0 %v5869_v43  ;;  %v6453_v39 = vpop.f32.mrf.mxu1 }
  0xfe   : > { %5039 = vmatprep.mubr.f32.mxu1 %v6462_v35  ;;  %5143 = vmatprep.mubr.f32.mxu0 %v5875_v45  ;;  %v6479_v45 = vld [vmem:[%s8055_s1 + $0x3f8] sm:$0xff] }
  0xff   : > { %v4732_v38 = vpop.f32.mrf.mxu1  ;;  %5199 = vmatpush3.msra.mxu1 %v3864_v32  ;;  %5303 = vmatpush3.msra.mxu0 %v4024_v10 }
 0x100   : > { %v6466_v42 = vpop.f32.mrf.mxu0  ;;  %v6469_v46 = vadd.f32 %v4732_v38, %v6441_v18  ;;  %5200 = vmatprep.subr.mxu1 %v3863_v29  ;;  %5304 = vmatprep.subr.mxu0 %v4023_v31 }
 0x101   : > { %5040 = vmatmul.mubr.f32.gmra.mxu1 %v6472_v49  ;;  %5144 = vmatmul.mubr.f32.gmra.mxu0 %v5894_v50  ;;  %v458_v51 = vpop.f32.mrf.mxu1 }
 0x102   : > { %5042 = vmatprep.mubr.f32.mxu1 %v5869_v43  ;;  %5146 = vmatprep.mubr.f32.mxu0 %v5900_v52  ;;  %v346_v58 = vpop.f32.mrf.mxu0 }
 0x103   : > { %5201 = vmatpush3.msra.mxu1 %v3863_v29  ;;  %5305 = vmatpush3.msra.mxu0 %v4023_v31 }
 0x104   : > { %v4699_v62 = vpop.f32.mrf.mxu0  ;;  %v4735_v2 = vpop.f32.mrf.mxu1  ;;  %5378 = vmatprep.subr.mxu1 %v6479_v45  ;;  %5482 = vmatprep.subr.mxu0 %v6484_v55 }
 0x105   : > { %5043 = vmatmul.mubr.f32.gmra.mxu1 %v6491_v5  ;;  %5147 = vmatmul.mubr.f32.gmra.mxu0 %v5916_v56 }
 0x106   : > { %5045 = vmatprep.mubr.f32.mxu1 %v5894_v50  ;;  %5149 = vmatprep.mubr.f32.mxu0 %v5925_v59  ;;  %v6497_v43 = vpop.f32.mrf.mxu0  ;;  %v467_v7 = vpop.f32.mrf.mxu1 }
 0x107   : > { %v6500_v13 = vadd.f32 %v6441_v18, %v467_v7 }
 0x108   : > { %v6502_v24 = vpop.f32.mrf.mxu0 }
 0x109   : > { %5046 = vmatmul.mubr.f32.gmra.mxu1 %v5900_v52  ;;  %5150 = vmatmul.mubr.f32.gmra.mxu0 %v5941_v63  ;;  %v4738_v41 = vpop.f32.mrf.mxu1 }
 0x10a   : > { %5048 = vmatprep.mubr.f32.mxu1 %v5916_v56  ;;  %5152 = vmatprep.mubr.f32.mxu0 %v5947_v1  ;;  %v6509_v50 = vadd.f32 %v4738_v41, %v6441_v18  ;;  %v6511_v19 = vpop.f32.mrf.mxu0  ;;  %v532_v41 = vadd.f32 %v6370_v11, %v6441_v18  ;;  %v531_v11 = vadd.f32 %v6441_v18, %v6382_v34 }
 0x10b   : > { %v476_v23 = vpop.f32.mrf.mxu1  ;;  %v533_v34 = vadd.f32 %v6401_v47, %v6441_v18  ;;  %v4068_v47 = vld [vmem:[%s8055_s1 + $0x468] sm:$0xff] }
 0x10c   : > { %v6514_v28 = vadd.f32 %v6441_v18, %v476_v23 }
 0x10d   : > { %5049 = vmatmul.mubr.f32.gmra.mxu1 %v5925_v59  ;;  %5153 = vmatmul.mubr.f32.gmra.mxu0 %v5966_v6  ;;  %v4741_v52 = vpop.f32.mrf.mxu1 }
 0x10e   : > { %5051 = vmatprep.mubr.f32.mxu1 %v5941_v63  ;;  %5155 = vmatprep.mubr.f32.mxu0 %v5972_v8  ;;  %v6520_v56 = vpop.f32.mrf.mxu0  ;;  %v6523_v40 = vadd.f32 %v4741_v52, %v6441_v18  ;;  %v5636_v52 = vld [vmem:[%s5766_s22 + $0x8] sm:$0xff] }
 0x10f   : > { %v486_v25 = vpop.f32.mrf.mxu1 }
 0x110   : > { %v374_v54 = vpop.f32.mrf.mxu0  ;;  %v4053_v25 = vld [vmem:[%s8055_s1 + $0x3f0] sm:$0xff] }
 0x111   : > { %5052 = vmatmul.mubr.f32.gmra.mxu1 %v5947_v1  ;;  %5156 = vmatmul.mubr.f32.gmra.mxu0 %v5988_v12  ;;  %v4069_v54 = vld [vmem:[%s8055_s1 + $0x470] sm:$0xff] }
 0x112   : > { %5054 = vmatprep.mubr.f32.mxu1 %v5966_v6  ;;  %5158 = vmatprep.mubr.f32.mxu0 %v5997_v15  ;;  %v4708_v59 = vpop.f32.mrf.mxu0  ;;  %v4744_v57 = vpop.f32.mrf.mxu1 }
 0x113   : > { %v5637_v57 = vld [vmem:[%s5766_s22 + $0x10] sm:$0xff] }
 0x114   : > { %v6529_v63 = vpop.f32.mrf.mxu0  ;;  %v495_v32 = vpop.f32.mrf.mxu1 }
 0x115   : > { %5055 = vmatmul.mubr.f32.gmra.mxu1 %v5972_v8  ;;  %5159 = vmatmul.mubr.f32.gmra.mxu0 %v6013_v27  ;;  %v6534_v10 = vadd.f32 %v6441_v18, %v495_v32  ;;  %v6598_v32 = vld [vmem:[%s5766_s22 + $0x48] sm:$0xff] }
 0x116   : > { %5057 = vmatprep.mubr.f32.mxu1 %v5988_v12  ;;  %5161 = vmatprep.mubr.f32.mxu0 %v6019_v33  ;;  %v6538_v1 = vpop.f32.mrf.mxu0 }
 0x117   : > { %v4747_v6 = vpop.f32.mrf.mxu1 }
 0x118   : > { %v6541_v36 = vadd.f32 %v4747_v6, %v6441_v18  ;;  %v6543_v29 = vpop.f32.mrf.mxu0 }
 0x119   : > { %5058 = vmatmul.mubr.f32.gmra.mxu1 %v5997_v15  ;;  %5162 = vmatmul.mubr.f32.gmra.mxu0 %v6038_v44  ;;  %v504_v8 = vpop.f32.mrf.mxu1 }
 0x11a   : > { %v6548_v31 = vadd.f32 %v6441_v18, %v504_v8  ;;  %5060 = vmatprep.mubr.f32.mxu1 %v6013_v27  ;;  %5164 = vmatprep.mubr.f32.mxu0 %v6044_v48  ;;  %v6562_v27 = vld [vmem:[%s5766_s22 + $0x30] sm:$0xff] }
 0x11b   : > { %v4750_v12 = vpop.f32.mrf.mxu1 }
 0x11c   : > { %v6552_v38 = vpop.f32.mrf.mxu0  ;;  %v6555_v51 = vadd.f32 %v4750_v12, %v6441_v18  ;;  %v6605_v12 = vld [vmem:[%s5766_s22 + $0x50] sm:$0xff] }
 0x11d   : > { %5061 = vmatmul.mubr.f32.gmra.mxu1 %v6019_v33  ;;  %5165 = vmatmul.mubr.f32.gmra.mxu0 %v6252_v0  ;;  %v514_v15 = vpop.f32.mrf.mxu1  ;;  %v5635_v0 = vld [vmem:[%s5766_s22] sm:$0xff] }
 0x11e   : > { %v402_v58 = vpop.f32.mrf.mxu0  ;;  %5063 = vmatprep.mubr.f32.mxu1 %v6038_v44  ;;  %5167 = vmatprep.mubr.f32.mxu0 %v6255_v3  ;;  %v6571_v44 = vld [vmem:[%s5766_s22 + $0x38] sm:$0xff] }
 0x120   : > { %v4717_v62 = vpop.f32.mrf.mxu0  ;;  %v4753_v2 = vpop.f32.mrf.mxu1 }
 0x121   : > { %5064 = vmatmul.mubr.f32.gmra.mxu1 %v6044_v48  ;;  %5168 = vmatmul.mubr.f32.gmra.mxu0 %v6262_v4  ;;  %v6579_v48 = vld [vmem:[%s5766_s22 + $0x40] sm:$0xff]  ;;  %v5638_v62 = vld [vmem:[%s5766_s22 + $0x18] sm:$0xff] }
 0x122   : > { %v6566_v33 = vpop.f32.mrf.mxu0  ;;  %v523_v7 = vpop.f32.mrf.mxu1  ;;  %5202 = vmatprep.mubr.f32.mxu1 %v5635_v0  ;;  %5306 = vmatprep.mubr.f32.mxu0 %v6562_v27  ;;  %v6626_v0 = vld [vmem:[%s5766_s22 + $0x58] sm:$0xff] }
 0x123   : > { %v6574_v3 = vadd.f32 %v6441_v18, %v523_v7  ;;  %v5639_v7 = vld [vmem:[%s5766_s22 + $0x20] sm:$0xff] }
 0x125   : > { %v4788_v4 = vpop.f32.mrf.mxu1  ;;  %v6581_v23 = vpop.f32.mrf.mxu0  ;;  %5203 = vmatmul.mubr.f32.vlgmr.msra.gmra.mxu1 %v5636_v52  ;;  %5307 = vmatmul.mubr.f32.vlgmr.msra.gmra.mxu0 %v6571_v44  ;;  %v6631_v52 = vld [vmem:[%s5766_s22 + $0x60] sm:$0xff] }
 0x126   : > { %8058 = vst [vmem:[#allocation2_spill] sm:$0xff] %v6581_v23  ;;  %v6593_v59 = vadd.f32 %v4788_v4, %v532_v41  ;;  %5379 = vmatpush3.msra.mxu1 %v6479_v45  ;;  %5205 = vmatprep.mubr.f32.mxu1 %v5637_v57  ;;  %v6729_v23 = vld [vmem:[%s5766_s22 + $0xa0] sm:$0xff] }
 0x127   : > { %v729_v6 = vpop.f32.mrf.mxu1  ;;  %v6600_v8 = vpop.f32.mrf.mxu0  ;;  %5309 = vmatprep.mubr.f32.mxu0 %v6579_v48  ;;  %5483 = vmatpush3.msra.mxu0 %v6484_v55  ;;  %v4052_v55 = vld [vmem:[%s8055_s1 + $0x3e8] sm:$0xff] }
 0x128   : > { %8059 = vst [vmem:[#allocation3_spill] sm:$0xff] %v6600_v8  ;;  %v6609_v15 = vadd.f32 %v729_v6, %v531_v11  ;;  %5380 = vmatprep.subr.mxu1 %v4053_v25  ;;  %5484 = vmatprep.subr.mxu0 %v4069_v54  ;;  %v5640_v6 = vld [vmem:[%s5766_s22 + $0x28] sm:$0xff] }
 0x129   : > { %v4791_v45 = vpop.f32.mrf.mxu1  ;;  %v6611_v58 = vpop.f32.mrf.mxu0  ;;  %5206 = vmatmul.mubr.f32.gmra.mxu1 %v5638_v62  ;;  %5310 = vmatmul.mubr.f32.gmra.mxu0 %v6598_v32  ;;  %v6648_v62 = vld [vmem:[%s5766_s22 + $0x68] sm:$0xff] }
 0x12a   : > { %8060 = vst [vmem:[#allocation4_spill] sm:$0xff] %v6611_v58  ;;  %v6621_v2 = vadd.f32 %v4791_v45, %v533_v34  ;;  %5208 = vmatprep.mubr.f32.mxu1 %v5639_v7  ;;  %5312 = vmatprep.mubr.f32.mxu0 %v6605_v12  ;;  %v4051_v34 = vld [vmem:[%s8055_s1 + $0x3e0] sm:$0xff]  ;;  %v5641_v45 = vld [vmem:[%s5766_s22 + $0x30] sm:$0xff]  ;;  %v5644_v8 = vld [vmem:[%s5766_s22 + $0x48] sm:$0xff] }
 0x12b   : > { %v739_v41 = vpop.f32.mrf.mxu1  ;;  %v6628_v4 = vpop.f32.mrf.mxu0  ;;  %5381 = vmatpush3.msra.mxu1 %v4053_v25  ;;  %5485 = vmatpush3.msra.mxu0 %v4069_v54  ;;  %v4067_v25 = vld [vmem:[%s8055_s1 + $0x460] sm:$0xff]  ;;  %v534_v54 = vadd.f32 %v6441_v18, %v6419_v60 }
 0x12c   : > { %8061 = vst [vmem:[#allocation5_spill] sm:$0xff] %v6621_v2  ;;  %8062 = vst [vmem:[#allocation6_spill] sm:$0xff] %v6628_v4  ;;  %5382 = vmatprep.subr.mxu1 %v4052_v55  ;;  %5486 = vmatprep.subr.mxu0 %v4068_v47  ;;  %v5642_v4 = vld [vmem:[%s5766_s22 + $0x38] sm:$0xff]  ;;  %v6681_v58 = vld [vmem:[%s5766_s22 + $0x80] sm:$0xff] }
 0x12d   : > { %v4794_v11 = vpop.f32.mrf.mxu1  ;;  %v6633_v57 = vpop.f32.mrf.mxu0  ;;  %5209 = vmatmul.mubr.f32.gmra.mxu1 %v5640_v6  ;;  %5313 = vmatmul.mubr.f32.gmra.mxu0 %v6626_v0  ;;  %v536_v6 = vadd.f32 %v6436_v16, %v6441_v18  ;;  %v4066_v16 = vld [vmem:[%s8055_s1 + $0x458] sm:$0xff] }
 0x12e   : > { %8063 = vst [vmem:[#allocation7_spill] sm:$0xff] %v6633_v57  ;;  %5211 = vmatprep.mubr.f32.mxu1 %v5641_v45  ;;  %5315 = vmatprep.mubr.f32.mxu0 %v6631_v52  ;;  %v6653_v11 = vld [vmem:[%s5766_s22 + $0x70] sm:$0xff]  ;;  %v5654_v2 = vld [vmem:[%s5766_s22 + $0x98] sm:$0xff] }
 0x12f   : > { %v748_v7 = vpop.f32.mrf.mxu1  ;;  %v6650_v41 = vpop.f32.mrf.mxu0  ;;  %5383 = vmatpush3.msra.mxu1 %v4052_v55  ;;  %5487 = vmatpush3.msra.mxu0 %v4068_v47  ;;  %v4050_v55 = vld [vmem:[%s8055_s1 + $0x3d8] sm:$0xff]  ;;  %v535_v47 = vadd.f32 %v6441_v18, %v6446_v26  ;;  %v537_v26 = vadd.f32 %v6466_v42, %v6441_v18  ;;  %v4065_v42 = vld [vmem:[%s8055_s1 + $0x450] sm:$0xff] }
 0x130   : > { %8064 = vst [vmem:[#allocation8_spill] sm:$0xff] %v6650_v41  ;;  %v6657_v60 = vadd.f32 %v748_v7, %v534_v54  ;;  %5384 = vmatprep.subr.mxu1 %v4051_v34  ;;  %5488 = vmatprep.subr.mxu0 %v4067_v25  ;;  %v5643_v7 = vld [vmem:[%s5766_s22 + $0x40] sm:$0xff] }
 0x131   : > { %v4797_v45 = vpop.f32.mrf.mxu1  ;;  %v6659_v57 = vpop.f32.mrf.mxu0  ;;  %5212 = vmatmul.mubr.f32.gmra.mxu1 %v5642_v4  ;;  %5316 = vmatmul.mubr.f32.gmra.mxu0 %v6648_v62  ;;  %v6676_v4 = vld [vmem:[%s5766_s22 + $0x78] sm:$0xff] }
 0x132   : > { %8065 = vst [vmem:[#allocation9_spill] sm:$0xff] %v6657_v60  ;;  %8066 = vst [vmem:[#allocation10_spill] sm:$0xff] %v6659_v57  ;;  %v6671_v54 = vadd.f32 %v4797_v45, %v536_v6  ;;  %5214 = vmatprep.mubr.f32.mxu1 %v5643_v7  ;;  %5318 = vmatprep.mubr.f32.mxu0 %v6653_v11 }
 0x133   : > { %v757_v57 = vpop.f32.mrf.mxu1  ;;  %v6678_v41 = vpop.f32.mrf.mxu0  ;;  %5385 = vmatpush3.msra.mxu1 %v4051_v34  ;;  %5489 = vmatpush3.msra.mxu0 %v4067_v25  ;;  %v4049_v34 = vld [vmem:[%s8055_s1 + $0x3d0] sm:$0xff] }
 0x134   : > { %8067 = vst [vmem:[#allocation11_spill] sm:$0xff] %v6671_v54  ;;  %8068 = vst [vmem:[#allocation12_spill] sm:$0xff] %v6678_v41  ;;  %v6685_v6 = vadd.f32 %v757_v57, %v535_v47  ;;  %5386 = vmatprep.subr.mxu1 %v4050_v55  ;;  %5490 = vmatprep.subr.mxu0 %v4066_v16  ;;  %v5645_v25 = vld [vmem:[%s5766_s22 + $0x50] sm:$0xff]  ;;  %v6702_v47 = vld [vmem:[%s5766_s22 + $0x88] sm:$0xff] }
 0x135   : > { %v4800_v45 = vpop.f32.mrf.mxu1  ;;  %v6687_v7 = vpop.f32.mrf.mxu0  ;;  %5215 = vmatmul.mubr.f32.gmra.mxu1 %v5644_v8  ;;  %5319 = vmatmul.mubr.f32.gmra.mxu0 %v6676_v4  ;;  %v6707_v41 = vld [vmem:[%s5766_s22 + $0x90] sm:$0xff]  ;;  %v5648_v54 = vld [vmem:[%s5766_s22 + $0x68] sm:$0xff] }
 0x136   : > { %8069 = vst [vmem:[#allocation13_spill] sm:$0xff] %v6685_v6  ;;  %8070 = vst [vmem:[#allocation14_spill] sm:$0xff] %v6687_v7  ;;  %v6697_v57 = vadd.f32 %v4800_v45, %v537_v26  ;;  %5217 = vmatprep.mubr.f32.mxu1 %v5645_v25  ;;  %5321 = vmatprep.mubr.f32.mxu0 %v6681_v58  ;;  %v5646_v25 = vld [vmem:[%s5766_s22 + $0x58] sm:$0xff] }
 0x137   : > { %v767_v8 = vpop.f32.mrf.mxu1  ;;  %v6704_v7 = vpop.f32.mrf.mxu0  ;;  %5387 = vmatpush3.msra.mxu1 %v4050_v55  ;;  %5491 = vmatpush3.msra.mxu0 %v4066_v16  ;;  %v538_v55 = vadd.f32 %v6441_v18, %v6497_v43  ;;  %v5647_v16 = vld [vmem:[%s5766_s22 + $0x60] sm:$0xff] }
 0x138   : > { %8071 = vst [vmem:[#allocation15_spill] sm:$0xff] %v6697_v57  ;;  %8072 = vst [vmem:[#allocation16_spill] sm:$0xff] %v6704_v7  ;;  %5388 = vmatprep.subr.mxu1 %v4049_v34  ;;  %5492 = vmatprep.subr.mxu0 %v4065_v42  ;;  %v4048_v8 = vld [vmem:[%s8055_s1 + $0x3c8] sm:$0xff]  ;;  %v540_v57 = vadd.f32 %v6502_v24, %v6441_v18  ;;  %v4063_v24 = vld [vmem:[%s8055_s1 + $0x440] sm:$0xff] }
 0x139   : > { %v4803_v26 = vpop.f32.mrf.mxu1  ;;  %v6709_v45 = vpop.f32.mrf.mxu0  ;;  %5218 = vmatmul.mubr.f32.gmra.mxu1 %v5646_v25  ;;  %5322 = vmatmul.mubr.f32.gmra.mxu0 %v6702_v47  ;;  %v4064_v7 = vld [vmem:[%s8055_s1 + $0x448] sm:$0xff] }
 0x13a   : > { %8073 = vst [vmem:[#allocation17_spill] sm:$0xff] %v6709_v45  ;;  %5220 = vmatprep.mubr.f32.mxu1 %v5647_v16  ;;  %5324 = vmatprep.mubr.f32.mxu0 %v6707_v41  ;;  %v6724_v26 = vld [vmem:[%s5766_s22 + $0x98] sm:$0xff] }
 0x13b   : > { %v776_v25 = vpop.f32.mrf.mxu1  ;;  %v6726_v45 = vpop.f32.mrf.mxu0  ;;  %5389 = vmatpush3.msra.mxu1 %v4049_v34  ;;  %5493 = vmatpush3.msra.mxu0 %v4065_v42  ;;  %v4047_v34 = vld [vmem:[%s8055_s1 + $0x3c0] sm:$0xff]  ;;  %v539_v42 = vadd.f32 %v6441_v18, %v6511_v19  ;;  %v541_v19 = vadd.f32 %v6520_v56, %v6441_v18  ;;  %v4062_v56 = vld [vmem:[%s8055_s1 + $0x438] sm:$0xff] }
 0x13c   : > { %8074 = vst [vmem:[#allocation18_spill] sm:$0xff] %v6726_v45  ;;  %v6733_v43 = vadd.f32 %v776_v25, %v538_v55  ;;  %5390 = vmatprep.subr.mxu1 %v4048_v8  ;;  %5494 = vmatprep.subr.mxu0 %v4064_v7  ;;  %v5649_v25 = vld [vmem:[%s5766_s22 + $0x70] sm:$0xff] }
 0x13d   : > { %v4806_v16 = vpop.f32.mrf.mxu1  ;;  %v6735_v6 = vpop.f32.mrf.mxu0  ;;  %5221 = vmatmul.mubr.f32.gmra.mxu1 %v5648_v54  ;;  %5325 = vmatmul.mubr.f32.gmra.mxu0 %v6724_v26  ;;  %v6752_v54 = vld [vmem:[%s5766_s22 + $0xa8] sm:$0xff] }
 0x13e   : > { %8075 = vst [vmem:[#allocation19_spill] sm:$0xff] %v6733_v43  ;;  %8076 = vst [vmem:[#allocation20_spill] sm:$0xff] %v6735_v6  ;;  %v6747_v55 = vadd.f32 %v4806_v16, %v540_v57  ;;  %5223 = vmatprep.mubr.f32.mxu1 %v5649_v25  ;;  %5327 = vmatprep.mubr.f32.mxu0 %v6729_v23  ;;  %v6757_v43 = vld [vmem:[%s5766_s22 + $0xb0] sm:$0xff] }
 0x13f   : > { %v785_v6 = vpop.f32.mrf.mxu1  ;;  %v6754_v45 = vpop.f32.mrf.mxu0  ;;  %5391 = vmatpush3.msra.mxu1 %v4048_v8  ;;  %5495 = vmatpush3.msra.mxu0 %v4064_v7  ;;  %v4046_v7 = vld [vmem:[%s8055_s1 + $0x3b8] sm:$0xff]  ;;  %v5651_v8 = vld [vmem:[%s5766_s22 + $0x80] sm:$0xff] }
 0x140   : > { %8077 = vst [vmem:[#allocation21_spill] sm:$0xff] %v6747_v55  ;;  %8078 = vst [vmem:[#allocation22_spill] sm:$0xff] %v6754_v45  ;;  %v6761_v57 = vadd.f32 %v785_v6, %v539_v42  ;;  %5392 = vmatprep.subr.mxu1 %v4047_v34  ;;  %5496 = vmatprep.subr.mxu0 %v4063_v24  ;;  %v5650_v55 = vld [vmem:[%s5766_s22 + $0x78] sm:$0xff]  ;;  %v6783_v45 = vld [vmem:[%s5766_s22 + $0xc0] sm:$0xff] }
 0x141   : > { %v4809_v16 = vpop.f32.mrf.mxu1  ;;  %v6763_v25 = vpop.f32.mrf.mxu0  ;;  %5224 = vmatmul.mubr.f32.gmra.mxu1 %v5650_v55  ;;  %5328 = vmatmul.mubr.f32.gmra.mxu0 %v6752_v54  ;;  %v6778_v42 = vld [vmem:[%s5766_s22 + $0xb8] sm:$0xff] }
 0x142   : > { %8079 = vst [vmem:[#allocation23_spill] sm:$0xff] %v6761_v57  ;;  %8080 = vst [vmem:[#allocation24_spill] sm:$0xff] %v6763_v25  ;;  %v6773_v6 = vadd.f32 %v4809_v16, %v541_v19  ;;  %5226 = vmatprep.mubr.f32.mxu1 %v5651_v8  ;;  %5330 = vmatprep.mubr.f32.mxu0 %v6757_v43  ;;  %v5652_v8 = vld [vmem:[%s5766_s22 + $0x88] sm:$0xff]  ;;  %v544_v57 = vadd.f32 %v6538_v1, %v6441_v18 }
 0x143   : > { %v795_v55 = vpop.f32.mrf.mxu1  ;;  %v6780_v25 = vpop.f32.mrf.mxu0  ;;  %5393 = vmatpush3.msra.mxu1 %v4047_v34  ;;  %5497 = vmatpush3.msra.mxu0 %v4063_v24  ;;  %v542_v34 = vadd.f32 %v6441_v18, %v6529_v63  ;;  %v5653_v24 = vld [vmem:[%s5766_s22 + $0x90] sm:$0xff]  ;;  %v4060_v1 = vld [vmem:[%s8055_s1 + $0x428] sm:$0xff] }
 0x144   : > { %8081 = vst [vmem:[#allocation25_spill] sm:$0xff] %v6773_v6  ;;  %8082 = vst [vmem:[#allocation26_spill] sm:$0xff] %v6780_v25  ;;  %5394 = vmatprep.subr.mxu1 %v4046_v7  ;;  %5498 = vmatprep.subr.mxu0 %v4062_v56  ;;  %v4045_v55 = vld [vmem:[%s8055_s1 + $0x3b0] sm:$0xff] }
 0x145   : > { %v4812_v19 = vpop.f32.mrf.mxu1  ;;  %v6785_v16 = vpop.f32.mrf.mxu0  ;;  %5227 = vmatmul.mubr.f32.gmra.mxu1 %v5652_v8  ;;  %5331 = vmatmul.mubr.f32.gmra.mxu0 %v6778_v42  ;;  %v4061_v25 = vld [vmem:[%s8055_s1 + $0x430] sm:$0xff] }
 0x146   : > { %8083 = vst [vmem:[#allocation27_spill] sm:$0xff] %v6785_v16  ;;  %5229 = vmatprep.mubr.f32.mxu1 %v5653_v24  ;;  %5333 = vmatprep.mubr.f32.mxu0 %v6783_v45  ;;  %v6800_v19 = vld [vmem:[%s5766_s22 + $0xc8] sm:$0xff]  ;;  %v6805_v6 = vld [vmem:[%s5766_s22 + $0xd0] sm:$0xff] }
 0x147   : > { %v804_v8 = vpop.f32.mrf.mxu1  ;;  %v6802_v16 = vpop.f32.mrf.mxu0  ;;  %5395 = vmatpush3.msra.mxu1 %v4046_v7  ;;  %5499 = vmatpush3.msra.mxu0 %v4062_v56  ;;  %v4044_v7 = vld [vmem:[%s8055_s1 + $0x3a8] sm:$0xff]  ;;  %v543_v56 = vadd.f32 %v6441_v18, %v6543_v29  ;;  %v545_v29 = vadd.f32 %v6552_v38, %v6441_v18  ;;  %v4059_v38 = vld [vmem:[%s8055_s1 + $0x420] sm:$0xff] }
 0x148   : > { %8084 = vst [vmem:[#allocation28_spill] sm:$0xff] %v6802_v16  ;;  %v6809_v63 = vadd.f32 %v804_v8, %v542_v34  ;;  %5396 = vmatprep.subr.mxu1 %v4045_v55  ;;  %5500 = vmatprep.subr.mxu0 %v4061_v25  ;;  %v5655_v8 = vld [vmem:[%s5766_s22 + $0xa0] sm:$0xff] }
 0x149   : > { %v4815_v24 = vpop.f32.mrf.mxu1  ;;  %v6811_v60 = vpop.f32.mrf.mxu0  ;;  %5230 = vmatmul.mubr.f32.gmra.mxu1 %v5654_v2  ;;  %5334 = vmatmul.mubr.f32.gmra.mxu0 %v6800_v19  ;;  %v6828_v2 = vld [vmem:[%s5766_s22 + $0xd8] sm:$0xff] }
 0x14a   : > { %8085 = vst [vmem:[#allocation29_spill] sm:$0xff] %v6809_v63  ;;  %8086 = vst [vmem:[#allocation30_spill] sm:$0xff] %v6811_v60  ;;  %v6823_v34 = vadd.f32 %v4815_v24, %v544_v57  ;;  %5232 = vmatprep.mubr.f32.mxu1 %v5655_v8  ;;  %5336 = vmatprep.mubr.f32.mxu0 %v6805_v6  ;;  %v6833_v63 = vld [vmem:[%s5766_s22 + $0xe0] sm:$0xff] }
 0x14b   : > { %v813_v60 = vpop.f32.mrf.mxu1  ;;  %v6830_v16 = vpop.f32.mrf.mxu0  ;;  %5397 = vmatpush3.msra.mxu1 %v4045_v55  ;;  %5501 = vmatpush3.msra.mxu0 %v4061_v25  ;;  %v4043_v25 = vld [vmem:[%s8055_s1 + $0x3a0] sm:$0xff]  ;;  %v5657_v55 = vld [vmem:[%s5766_s22 + $0xb0] sm:$0xff] }
 0x14c   : > { %8087 = vst [vmem:[#allocation31_spill] sm:$0xff] %v6823_v34  ;;  %8088 = vst [vmem:[#allocation32_spill] sm:$0xff] %v6830_v16  ;;  %v6837_v57 = vadd.f32 %v813_v60, %v543_v56  ;;  %5398 = vmatprep.subr.mxu1 %v4044_v7  ;;  %5502 = vmatprep.subr.mxu0 %v4060_v1  ;;  %v5656_v34 = vld [vmem:[%s5766_s22 + $0xa8] sm:$0xff]  ;;  %v6859_v16 = vld [vmem:[%s5766_s22 + $0xf0] sm:$0xff] }
 0x14d   : > { %v4818_v24 = vpop.f32.mrf.mxu1  ;;  %v6839_v8 = vpop.f32.mrf.mxu0  ;;  %5233 = vmatmul.mubr.f32.gmra.mxu1 %v5656_v34  ;;  %5337 = vmatmul.mubr.f32.gmra.mxu0 %v6828_v2  ;;  %v6854_v56 = vld [vmem:[%s5766_s22 + $0xe8] sm:$0xff] }
 0x14e   : > { %8089 = vst [vmem:[#allocation33_spill] sm:$0xff] %v6837_v57  ;;  %8090 = vst [vmem:[#allocation34_spill] sm:$0xff] %v6839_v8  ;;  %v6849_v60 = vadd.f32 %v4818_v24, %v545_v29  ;;  %5235 = vmatprep.mubr.f32.mxu1 %v5657_v55  ;;  %5339 = vmatprep.mubr.f32.mxu0 %v6833_v63  ;;  %v5658_v24 = vld [vmem:[%s5766_s22 + $0xb8] sm:$0xff] }
 0x14f   : > { %v823_v34 = vpop.f32.mrf.mxu1  ;;  %v6856_v8 = vpop.f32.mrf.mxu0  ;;  %5399 = vmatpush3.msra.mxu1 %v4044_v7  ;;  %5503 = vmatpush3.msra.mxu0 %v4060_v1  ;;  %v4042_v55 = vld [vmem:[%s8055_s1 + $0x398] sm:$0xff]  ;;  %v546_v7 = vadd.f32 %v6441_v18, %v6566_v33 }
 0x150   : > { %8091 = vst [vmem:[#allocation35_spill] sm:$0xff] %v6849_v60  ;;  %8092 = vst [vmem:[#allocation36_spill] sm:$0xff] %v6856_v8  ;;  %5400 = vmatprep.subr.mxu1 %v4043_v25  ;;  %5504 = vmatprep.subr.mxu0 %v4059_v38  ;;  %v4058_v34 = vld [vmem:[%s8055_s1 + $0x418] sm:$0xff]  ;;  %v548_v8 = vadd.f32 %v6372_v14, %v6441_v18  ;;  %v4057_v14 = vld [vmem:[%s8055_s1 + $0x410] sm:$0xff] }
 0x151   : > { %v4821_v57 = vpop.f32.mrf.mxu1  ;;  %v6861_v29 = vpop.f32.mrf.mxu0  ;;  %5236 = vmatmul.mubr.f32.gmra.mxu1 %v5658_v24  ;;  %5340 = vmatmul.mubr.f32.gmra.mxu0 %v6854_v56  ;;  %v6876_v1 = vld [vmem:[%s5766_s22 + $0xf8] sm:$0xff] }
 0x152   : > { %8093 = vst [vmem:[#allocation37_spill] sm:$0xff] %v6861_v29  ;;  %5238 = vmatprep.mubr.f32.mxu1 %v6397_v21  ;;  %5342 = vmatprep.mubr.f32.mxu0 %v6859_v16  ;;  %v6881_v29 = vld [vmem:[%s5766_s22 + $0x100] sm:$0xff] }
 0x153   : > { %v832_v57 = vpop.f32.mrf.mxu1  ;;  %v6878_v24 = vpop.f32.mrf.mxu0  ;;  %5401 = vmatpush3.msra.mxu1 %v4043_v25  ;;  %5505 = vmatpush3.msra.mxu0 %v4059_v38  ;;  %v4041_v25 = vld [vmem:[%s8055_s1 + $0x390] sm:$0xff]  ;;  %v547_v38 = vadd.f32 %v6441_v18, %v6384_v17  ;;  %v549_v17 = vadd.f32 %v6388_v20, %v6441_v18  ;;  %v4056_v20 = vld [vmem:[%s8055_s1 + $0x408] sm:$0xff] }
 0x154   : > { %8094 = vst [vmem:[#allocation38_spill] sm:$0xff] %v6878_v24  ;;  %v6885_v60 = vadd.f32 %v832_v57, %v546_v7  ;;  %5402 = vmatprep.subr.mxu1 %v4042_v55  ;;  %5506 = vmatprep.subr.mxu0 %v4058_v34  ;;  %v6909_v24 = vld [vmem:[%s5766_s22 + $0x110] sm:$0xff] }
 0x155   : > { %v4824_v21 = vpop.f32.mrf.mxu1  ;;  %v6887_v33 = vpop.f32.mrf.mxu0  ;;  %5239 = vmatmul.mubr.f32.gmra.mxu1 %v6404_v37  ;;  %5343 = vmatmul.mubr.f32.gmra.mxu0 %v6876_v1  ;;  %v6904_v37 = vld [vmem:[%s5766_s22 + $0x108] sm:$0xff] }
 0x156   : > { %8095 = vst [vmem:[#allocation39_spill] sm:$0xff] %v6887_v33  ;;  %v6899_v7 = vadd.f32 %v4824_v21, %v548_v8  ;;  %5241 = vmatprep.mubr.f32.mxu1 %v6415_v53  ;;  %5345 = vmatprep.mubr.f32.mxu0 %v6881_v29 }
 0x157   : > { %v841_v57 = vpop.f32.mrf.mxu1  ;;  %v6906_v33 = vpop.f32.mrf.mxu0  ;;  %5403 = vmatpush3.msra.mxu1 %v4042_v55  ;;  %5507 = vmatpush3.msra.mxu0 %v4058_v34  ;;  %v4040_v55 = vld [vmem:[%s8055_s1 + $0x388] sm:$0xff] }
 0x158   : > { %8096 = vst [vmem:[#allocation40_spill] sm:$0xff] %v6906_v33  ;;  %v6913_v8 = vadd.f32 %v841_v57, %v547_v38  ;;  %5404 = vmatprep.subr.mxu1 %v4041_v25  ;;  %5508 = vmatprep.subr.mxu0 %v4057_v14  ;;  %v5659_v38 = vld [vmem:[%s5766_s22 + $0xe0] sm:$0xff]  ;;  %v6930_v57 = vld [vmem:[%s5766_s22 + $0x118] sm:$0xff] }
 0x159   : > { %v4827_v53 = vpop.f32.mrf.mxu1  ;;  %v6915_v21 = vpop.f32.mrf.mxu0  ;;  %5242 = vmatmul.mubr.f32.gmra.mxu1 %v6424_v9  ;;  %5346 = vmatmul.mubr.f32.gmra.mxu0 %v6904_v37  ;;  %v6935_v33 = vld [vmem:[%s5766_s22 + $0x120] sm:$0xff] }
 0x15a   : > { %8097 = vst [vmem:[#allocation41_spill] sm:$0xff] %v6913_v8  ;;  %8098 = vst [vmem:[#allocation42_spill] sm:$0xff] %v6915_v21  ;;  %v6925_v34 = vadd.f32 %v4827_v53, %v549_v17  ;;  %5244 = vmatprep.mubr.f32.mxu1 %v5659_v38  ;;  %5348 = vmatprep.mubr.f32.mxu0 %v6909_v24  ;;  %v4039_v53 = vld [vmem:[%s8055_s1 + $0x380] sm:$0xff]  ;;  %v6957_v38 = vld [vmem:[%s5766_s22 + $0x130] sm:$0xff] }
 0x15b   : > { %v851_v21 = vpop.f32.mrf.mxu1  ;;  %v6932_v9 = vpop.f32.mrf.mxu0  ;;  %5405 = vmatpush3.msra.mxu1 %v4041_v25  ;;  %5509 = vmatpush3.msra.mxu0 %v4057_v14  ;;  %v550_v25 = vadd.f32 %v6441_v18, %v6421_v61  ;;  %v6952_v14 = vld [vmem:[%s5766_s22 + $0x128] sm:$0xff] }
 0x15c   : > { %8099 = vst [vmem:[#allocation43_spill] sm:$0xff] %v6925_v34  ;;  %8100 = vst [vmem:[#allocation44_spill] sm:$0xff] %v6932_v9  ;;  %5406 = vmatprep.subr.mxu1 %v4040_v55  ;;  %5510 = vmatprep.subr.mxu0 %v4056_v20  ;;  %v4055_v21 = vld [vmem:[%s8055_s1 + $0x400] sm:$0xff] }
 0x15d   : > { %v4830_v8 = vpop.f32.mrf.mxu1  ;;  %v6937_v17 = vpop.f32.mrf.mxu0  ;;  %5245 = vmatmul.mubr.f32.gmra.mxu1 %v6449_v30  ;;  %5349 = vmatmul.mubr.f32.gmra.mxu0 %v6930_v57 }
 0x15e   : > { %8101 = vst [vmem:[#allocation45_spill] sm:$0xff] %v6937_v17  ;;  %5247 = vmatprep.mubr.f32.mxu1 %v6462_v35  ;;  %5351 = vmatprep.mubr.f32.mxu0 %v6935_v33 }
 0x15f   : > { %v860_v30 = vpop.f32.mrf.mxu1  ;;  %v6954_v8 = vpop.f32.mrf.mxu0  ;;  %5407 = vmatpush3.msra.mxu1 %v4040_v55  ;;  %5511 = vmatpush3.msra.mxu0 %v4056_v20  ;;  %v5660_v55 = vld [vmem:[%s5766_s22 + $0x100] sm:$0xff]  ;;  %v6973_v20 = vld [vmem:[%s5766_s22 + $0x138] sm:$0xff] }
 0x160   : > { %8102 = vst [vmem:[#allocation46_spill] sm:$0xff] %v6954_v8  ;;  %v6959_v17 = vadd.f32 %v860_v30, %v550_v25  ;;  %5408 = vmatprep.subr.mxu1 %v4039_v53  ;;  %5512 = vmatprep.subr.mxu0 %v4055_v21  ;;  %v551_v8 = vadd.f32 %v6441_v18, %v6453_v39 }
 0x161   : > { %v4833_v61 = vpop.f32.mrf.mxu1  ;;  %v6961_v35 = vpop.f32.mrf.mxu0  ;;  %5248 = vmatmul.mubr.f32.gmra.mxu1 %v6472_v49  ;;  %5352 = vmatmul.mubr.f32.gmra.mxu0 %v6952_v14  ;;  %v6978_v49 = vld [vmem:[%s5766_s22 + $0x140] sm:$0xff] }
 0x162   : > { %8103 = vst [vmem:[#allocation47_spill] sm:$0xff] %v6959_v17  ;;  %8104 = vst [vmem:[#allocation48_spill] sm:$0xff] %v6961_v35  ;;  %v6968_v9 = vadd.f32 %v4833_v61, %v6444_v22  ;;  %5250 = vmatprep.mubr.f32.mxu1 %v5660_v55  ;;  %5354 = vmatprep.mubr.f32.mxu0 %v6957_v38  ;;  %v5661_v55 = vld [vmem:[%s5766_s22 + $0x110] sm:$0xff]  ;;  %v5664_v35 = vld [vmem:[%s5766_s22 + $0x128] sm:$0xff] }
 0x163   : > { %v869_v25 = vpop.f32.mrf.mxu1  ;;  %v6975_v30 = vpop.f32.mrf.mxu0  ;;  %5409 = vmatpush3.msra.mxu1 %v4039_v53  ;;  %5513 = vmatpush3.msra.mxu0 %v4055_v21  ;;  %v6992_v53 = vld [vmem:[%s5766_s22 + $0x148] sm:$0xff] }
 0x164   : > { %8105 = vst [vmem:[#allocation49_spill] sm:$0xff] %v6968_v9  ;;  %8106 = vst [vmem:[#allocation50_spill] sm:$0xff] %v6975_v30  ;;  %v6980_v18 = vadd.f32 %v869_v25, %v551_v8  ;;  %v6997_v25 = vld [vmem:[%s5766_s22 + $0x150] sm:$0xff]  ;;  %v5662_v30 = vld [vmem:[%s5766_s22 + $0x118] sm:$0xff] }
 0x165   : > { %v4836_v22 = vpop.f32.mrf.mxu1  ;;  %v6982_v39 = vpop.f32.mrf.mxu0  ;;  %5251 = vmatmul.mubr.f32.gmra.mxu1 %v6491_v5  ;;  %5355 = vmatmul.mubr.f32.gmra.mxu0 %v6973_v20  ;;  %v5671_v9 = vld [vmem:[%s5766_s22 + $0x160] sm:$0xff] }
 0x166   : > { %8107 = vst [vmem:[#allocation51_spill] sm:$0xff] %v6980_v18  ;;  %8108 = vst [vmem:[#allocation52_spill] sm:$0xff] %v6982_v39  ;;  %v6987_v61 = vadd.f32 %v4836_v22, %v6469_v46  ;;  %5253 = vmatprep.mubr.f32.mxu1 %v5661_v55  ;;  %5357 = vmatprep.mubr.f32.mxu0 %v6978_v49  ;;  %v5663_v46 = vld [vmem:[%s5766_s22 + $0x120] sm:$0xff]  ;;  %v7006_v22 = vld [vmem:[%s5766_s22 + $0x158] sm:$0xff] }
 0x167   : > { %v879_v21 = vpop.f32.mrf.mxu1  ;;  %v6994_v8 = vpop.f32.mrf.mxu0  ;;  %v5668_v18 = vld [vmem:[%s5766_s22 + $0x148] sm:$0xff] }
 0x168   : > { %8109 = vst [vmem:[#allocation53_spill] sm:$0xff] %v6987_v61  ;;  %8110 = vst [vmem:[#allocation54_spill] sm:$0xff] %v6994_v8  ;;  %v7011_v8 = vld [vmem:[%s5766_s22 + $0x160] sm:$0xff]  ;;  %v5665_v61 = vld [vmem:[%s5766_s22 + $0x130] sm:$0xff] }
 0x169   : > { %v4839_v5 = vpop.f32.mrf.mxu1  ;;  %v6999_v39 = vpop.f32.mrf.mxu0  ;;  %5254 = vmatmul.mubr.f32.gmra.mxu1 %v5662_v30  ;;  %5358 = vmatmul.mubr.f32.gmra.mxu0 %v6992_v53 }
 0x16a   : > { %8111 = vst [vmem:[#allocation55_spill] sm:$0xff] %v6999_v39  ;;  %5256 = vmatprep.mubr.f32.mxu1 %v5663_v46  ;;  %5360 = vmatprep.mubr.f32.mxu0 %v6997_v25 }
 0x16b   : > { %v888_v55 = vpop.f32.mrf.mxu1  ;;  %v7008_v21 = vpop.f32.mrf.mxu0 }
 0x16c   : > { %8112 = vst [vmem:[#allocation56_spill] sm:$0xff] %v7008_v21  ;;  %v7014_v5 = vadd.f32 %v888_v55, %v6500_v13  ;;  %v7026_v21 = vld [vmem:[%s5766_s22 + $0x168] sm:$0xff] }
 0x16d   : > { %v4842_v30 = vpop.f32.mrf.mxu1  ;;  %v7016_v39 = vpop.f32.mrf.mxu0  ;;  %5257 = vmatmul.mubr.f32.gmra.mxu1 %v5664_v35  ;;  %5361 = vmatmul.mubr.f32.gmra.mxu0 %v7006_v22 }
 0x16e   : > { %8113 = vst [vmem:[#allocation57_spill] sm:$0xff] %v7014_v5  ;;  %8114 = vst [vmem:[#allocation58_spill] sm:$0xff] %v7016_v39  ;;  %v7021_v46 = vadd.f32 %v4842_v30, %v6509_v50  ;;  %5259 = vmatprep.mubr.f32.mxu1 %v5665_v61  ;;  %5363 = vmatprep.mubr.f32.mxu0 %v7011_v8  ;;  %v7031_v39 = vld [vmem:[%s5766_s22 + $0x170] sm:$0xff]  ;;  %v5666_v30 = vld [vmem:[%s5766_s22 + $0x138] sm:$0xff] }
 0x16f   : > { %v897_v13 = vpop.f32.mrf.mxu1  ;;  %v7028_v55 = vpop.f32.mrf.mxu0 }
 0x170   : > { %8115 = vst [vmem:[#allocation59_spill] sm:$0xff] %v7021_v46  ;;  %8116 = vst [vmem:[#allocation60_spill] sm:$0xff] %v7028_v55  ;;  %v7034_v35 = vadd.f32 %v897_v13, %v6514_v28  ;;  %v5667_v46 = vld [vmem:[%s5766_s22 + $0x140] sm:$0xff]  ;;  %v7046_v28 = vld [vmem:[%s5766_s22 + $0x178] sm:$0xff] }
 0x171   : > { %v4845_v5 = vpop.f32.mrf.mxu1  ;;  %v7036_v50 = vpop.f32.mrf.mxu0  ;;  %5260 = vmatmul.mubr.f32.gmra.mxu1 %v5666_v30  ;;  %5364 = vmatmul.mubr.f32.gmra.mxu0 %v7026_v21 }
 0x172   : > { %8117 = vst [vmem:[#allocation61_spill] sm:$0xff] %v7034_v35  ;;  %8118 = vst [vmem:[#allocation62_spill] sm:$0xff] %v7036_v50  ;;  %v7041_v61 = vadd.f32 %v4845_v5, %v6523_v40  ;;  %5262 = vmatprep.mubr.f32.mxu1 %v5667_v46  ;;  %5366 = vmatprep.mubr.f32.mxu0 %v7031_v39  ;;  %v7051_v50 = vld [vmem:[%s5766_s22 + $0x180] sm:$0xff]  ;;  %v5669_v40 = vld [vmem:[%s5766_s22 + $0x150] sm:$0xff] }
 0x173   : > { %v907_v13 = vpop.f32.mrf.mxu1  ;;  %v7048_v55 = vpop.f32.mrf.mxu0  ;;  %v7060_v5 = vld [vmem:[%s5766_s22 + $0x188] sm:$0xff] }
 0x174   : > { %8119 = vst [vmem:[#allocation63_spill] sm:$0xff] %v7041_v61  ;;  %8120 = vst [vmem:[#allocation64_spill] sm:$0xff] %v7048_v55  ;;  %v7065_v55 = vld [vmem:[%s5766_s22 + $0x190] sm:$0xff]  ;;  %v5670_v61 = vld [vmem:[%s5766_s22 + $0x158] sm:$0xff] }
 0x175   : > { %v4848_v30 = vpop.f32.mrf.mxu1  ;;  %v7053_v35 = vpop.f32.mrf.mxu0  ;;  %5263 = vmatmul.mubr.f32.gmra.mxu1 %v5668_v18  ;;  %5367 = vmatmul.mubr.f32.gmra.mxu0 %v7046_v28 }
 0x176   : > { %8121 = vst [vmem:[#allocation65_spill] sm:$0xff] %v7053_v35  ;;  %5265 = vmatprep.mubr.f32.mxu1 %v5669_v40  ;;  %5369 = vmatprep.mubr.f32.mxu0 %v7051_v50 }
 0x177   : > { %v916_v46 = vpop.f32.mrf.mxu1  ;;  %v7062_v13 = vpop.f32.mrf.mxu0 }
 0x178   : > { %8122 = vst [vmem:[#allocation66_spill] sm:$0xff] %v7062_v13  ;;  %v7068_v30 = vadd.f32 %v916_v46, %v6534_v10  ;;  %v7080_v13 = vld [vmem:[%s5766_s22 + $0x198] sm:$0xff] }
 0x179   : > { %v4851_v18 = vpop.f32.mrf.mxu1  ;;  %v7070_v35 = vpop.f32.mrf.mxu0  ;;  %5266 = vmatmul.mubr.f32.gmra.mxu1 %v5670_v61  ;;  %5370 = vmatmul.mubr.f32.gmra.mxu0 %v7060_v5 }
 0x17a   : > { %8123 = vst [vmem:[#allocation67_spill] sm:$0xff] %v7068_v30  ;;  %8124 = vst [vmem:[#allocation68_spill] sm:$0xff] %v7070_v35  ;;  %v7075_v40 = vadd.f32 %v4851_v18, %v6541_v36  ;;  %5268 = vmatprep.mubr.f32.mxu1 %v5671_v9  ;;  %5372 = vmatprep.mubr.f32.mxu0 %v7065_v55  ;;  %v7085_v30 = vld [vmem:[%s5766_s22 + $0x1a0] sm:$0xff]  ;;  %v5672_v36 = vld [vmem:[%s5766_s22 + $0x168] sm:$0xff] }
 0x17b   : > { %v925_v10 = vpop.f32.mrf.mxu1  ;;  %v7082_v46 = vpop.f32.mrf.mxu0  ;;  %v5673_v18 = vld [vmem:[%s5766_s22 + $0x170] sm:$0xff] }
 0x17c   : > { %8125 = vst [vmem:[#allocation69_spill] sm:$0xff] %v7075_v40  ;;  %8126 = vst [vmem:[#allocation70_spill] sm:$0xff] %v7082_v46  ;;  %v7088_v61 = vadd.f32 %v925_v10, %v6548_v31  ;;  %v7100_v46 = vld [vmem:[%s5766_s22 + $0x1a8] sm:$0xff] }
 0x17d   : > { %v4854_v35 = vpop.f32.mrf.mxu1  ;;  %v7090_v17 = vpop.f32.mrf.mxu0  ;;  %5269 = vmatmul.mubr.f32.gmra.mxu1 %v5672_v36  ;;  %5373 = vmatmul.mubr.f32.gmra.mxu0 %v7080_v13 }
 0x17e   : > { %8127 = vst [vmem:[#allocation71_spill] sm:$0xff] %v7090_v17  ;;  %v7095_v9 = vadd.f32 %v4854_v35, %v6555_v51  ;;  %5271 = vmatprep.mubr.f32.mxu1 %v5673_v18  ;;  %5375 = vmatprep.mubr.f32.mxu0 %v7085_v30  ;;  %v5674_v17 = vld [vmem:[%s5766_s22 + $0x178] sm:$0xff]  ;;  %s4073_s22 = sshll.u32 %s8461_s13, 8 }
 0x17f   : > { %v935_v40 = vpop.f32.mrf.mxu1  ;;  %v7102_v34 = vpop.f32.mrf.mxu0  ;;  %s7743_s19 = scalar_lea.vmem %s8057_s3, %s4073_s22 }
 0x180   : > { %8128 = vst [vmem:[#allocation72_spill] sm:$0xff] %v7102_v34 }
 0x181   : > { %v4857_v31 = vpop.f32.mrf.mxu1  ;;  %v7104_v10 = vpop.f32.mrf.mxu0  ;;  %5272 = vmatmul.mubr.f32.gmra.mxu1 %v5674_v17  ;;  %5376 = vmatmul.mubr.f32.gmra.mxu0 %v7100_v46 }
 0x182   : > { %8129 = vst [vmem:[#allocation73_spill] sm:$0xff] %v7104_v10  ;;  %5410 = vmatprep.mubr.f32.mxu1 %v6562_v27  ;;  %5514 = vmatprep.mubr.f32.mxu0 %v6562_v27 }
 0x183   : > { %v944_v51 = vpop.f32.mrf.mxu1  ;;  %v7110_v35 = vpop.f32.mrf.mxu0 }
 0x184   : > { %8130 = vst [vmem:[#allocation74_spill] sm:$0xff] %v7110_v35  ;;  %v7113_v36 = vadd.f32 %v944_v51, %v6574_v3 }
 0x185   : > { %v7115_v40 = vpop.f32.mrf.mxu1  ;;  %v7117_v18 = vpop.f32.mrf.mxu0  ;;  %5411 = vmatmul.mubr.f32.vlgmr.msra.gmra.mxu1 %v6571_v44  ;;  %5515 = vmatmul.mubr.f32.vlgmr.msra.gmra.mxu0 %v6571_v44 }
 0x186   : > { %5413 = vmatprep.mubr.f32.mxu1 %v6579_v48  ;;  %5517 = vmatprep.mubr.f32.mxu0 %v6579_v48 }
 0x187   : > { %v7123_v17 = vpop.f32.mrf.mxu1  ;;  %v7125_v27 = vpop.f32.mrf.mxu0 }
 0x189   : > { %v7127_v31 = vpop.f32.mrf.mxu1  ;;  %v7129_v3 = vpop.f32.mrf.mxu0  ;;  %5414 = vmatmul.mubr.f32.gmra.mxu1 %v6598_v32  ;;  %5518 = vmatmul.mubr.f32.gmra.mxu0 %v6598_v32 }
 0x18a   : > { %5416 = vmatprep.mubr.f32.mxu1 %v6605_v12  ;;  %5520 = vmatprep.mubr.f32.mxu0 %v6605_v12 }
 0x18b   : > { %v7135_v44 = vpop.f32.mrf.mxu1  ;;  %v7137_v51 = vpop.f32.mrf.mxu0 }
 0x18c   : > { %8131 = vst [vmem:[#allocation75_spill] sm:$0xff] %v7137_v51 }
 0x18d   : > { %v7139_v48 = vpop.f32.mrf.mxu1  ;;  %v7141_v35 = vpop.f32.mrf.mxu0  ;;  %5417 = vmatmul.mubr.f32.gmra.mxu1 %v6626_v0  ;;  %5521 = vmatmul.mubr.f32.gmra.mxu0 %v6626_v0 }
 0x18e   : > { %8132 = vst [vmem:[#allocation76_spill] sm:$0xff] %v7141_v35  ;;  %5419 = vmatprep.mubr.f32.mxu1 %v6631_v52  ;;  %5523 = vmatprep.mubr.f32.mxu0 %v6631_v52 }
 0x18f   : > { %v7147_v32 = vpop.f32.mrf.mxu1  ;;  %v7149_v10 = vpop.f32.mrf.mxu0 }
 0x190   : > { %8133 = vst [vmem:[#allocation77_spill] sm:$0xff] %v7149_v10 }
 0x191   : > { %v7151_v12 = vpop.f32.mrf.mxu1  ;;  %v7153_v34 = vpop.f32.mrf.mxu0  ;;  %5420 = vmatmul.mubr.f32.gmra.mxu1 %v6648_v62  ;;  %5524 = vmatmul.mubr.f32.gmra.mxu0 %v6648_v62 }
 0x192   : > { %8134 = vst [vmem:[#allocation78_spill] sm:$0xff] %v7153_v34  ;;  %5422 = vmatprep.mubr.f32.mxu1 %v6653_v11  ;;  %5526 = vmatprep.mubr.f32.mxu0 %v6653_v11 }
 0x193   : > { %v7159_v0 = vpop.f32.mrf.mxu1  ;;  %v7161_v35 = vpop.f32.mrf.mxu0 }
 0x194   : > { %8135 = vst [vmem:[#allocation79_spill] sm:$0xff] %v7161_v35 }
 0x195   : > { %v7163_v52 = vpop.f32.mrf.mxu1  ;;  %v7165_v51 = vpop.f32.mrf.mxu0  ;;  %5423 = vmatmul.mubr.f32.gmra.mxu1 %v6676_v4  ;;  %5527 = vmatmul.mubr.f32.gmra.mxu0 %v6676_v4 }
 0x196   : > { %8136 = vst [vmem:[#allocation80_spill] sm:$0xff] %v7165_v51  ;;  %5425 = vmatprep.mubr.f32.mxu1 %v6681_v58  ;;  %5529 = vmatprep.mubr.f32.mxu0 %v6681_v58 }
 0x197   : > { %v7171_v62 = vpop.f32.mrf.mxu1  ;;  %v7173_v34 = vpop.f32.mrf.mxu0 }
 0x198   : > { %8137 = vst [vmem:[#allocation81_spill] sm:$0xff] %v7173_v34 }
 0x199   : > { %v7175_v11 = vpop.f32.mrf.mxu1  ;;  %v7177_v10 = vpop.f32.mrf.mxu0  ;;  %5426 = vmatmul.mubr.f32.gmra.mxu1 %v6702_v47  ;;  %5530 = vmatmul.mubr.f32.gmra.mxu0 %v6702_v47 }
 0x19a   : > { %8138 = vst [vmem:[#allocation82_spill] sm:$0xff] %v7177_v10  ;;  %5428 = vmatprep.mubr.f32.mxu1 %v6707_v41  ;;  %5532 = vmatprep.mubr.f32.mxu0 %v6707_v41 }
 0x19b   : > { %v7183_v4 = vpop.f32.mrf.mxu1  ;;  %v7185_v51 = vpop.f32.mrf.mxu0 }
 0x19c   : > { %8139 = vst [vmem:[#allocation83_spill] sm:$0xff] %v7185_v51 }
 0x19d   : > { %v7187_v58 = vpop.f32.mrf.mxu1  ;;  %v7189_v35 = vpop.f32.mrf.mxu0  ;;  %5429 = vmatmul.mubr.f32.gmra.mxu1 %v6724_v26  ;;  %5533 = vmatmul.mubr.f32.gmra.mxu0 %v6724_v26 }
 0x19e   : > { %8140 = vst [vmem:[#allocation84_spill] sm:$0xff] %v7189_v35  ;;  %5431 = vmatprep.mubr.f32.mxu1 %v6729_v23  ;;  %5535 = vmatprep.mubr.f32.mxu0 %v6729_v23 }
 0x19f   : > { %v7195_v47 = vpop.f32.mrf.mxu1  ;;  %v7197_v10 = vpop.f32.mrf.mxu0 }
 0x1a0   : > { %8141 = vst [vmem:[#allocation85_spill] sm:$0xff] %v7197_v10 }
 0x1a1   : > { %v7199_v41 = vpop.f32.mrf.mxu1  ;;  %v7201_v34 = vpop.f32.mrf.mxu0  ;;  %5432 = vmatmul.mubr.f32.gmra.mxu1 %v6752_v54  ;;  %5536 = vmatmul.mubr.f32.gmra.mxu0 %v6752_v54 }
 0x1a2   : > { %8142 = vst [vmem:[#allocation86_spill] sm:$0xff] %v7201_v34  ;;  %5434 = vmatprep.mubr.f32.mxu1 %v6757_v43  ;;  %5538 = vmatprep.mubr.f32.mxu0 %v6757_v43 }
 0x1a3   : > { %v7207_v26 = vpop.f32.mrf.mxu1  ;;  %v7209_v35 = vpop.f32.mrf.mxu0 }
 0x1a4   : > { %8143 = vst [vmem:[#allocation87_spill] sm:$0xff] %v7209_v35 }
 0x1a5   : > { %v7211_v23 = vpop.f32.mrf.mxu1  ;;  %v7213_v51 = vpop.f32.mrf.mxu0  ;;  %5435 = vmatmul.mubr.f32.gmra.mxu1 %v6778_v42  ;;  %5539 = vmatmul.mubr.f32.gmra.mxu0 %v6778_v42 }
 0x1a6   : > { %8144 = vst [vmem:[#allocation88_spill] sm:$0xff] %v7213_v51  ;;  %5437 = vmatprep.mubr.f32.mxu1 %v6783_v45  ;;  %5541 = vmatprep.mubr.f32.mxu0 %v6783_v45 }
 0x1a7   : > { %v7219_v54 = vpop.f32.mrf.mxu1  ;;  %v7221_v34 = vpop.f32.mrf.mxu0 }
 0x1a8   : > { %8145 = vst [vmem:[#allocation89_spill] sm:$0xff] %v7221_v34 }
 0x1a9   : > { %v7223_v43 = vpop.f32.mrf.mxu1  ;;  %v7225_v10 = vpop.f32.mrf.mxu0  ;;  %5438 = vmatmul.mubr.f32.gmra.mxu1 %v6800_v19  ;;  %5542 = vmatmul.mubr.f32.gmra.mxu0 %v6800_v19 }
 0x1aa   : > { %8146 = vst [vmem:[#allocation90_spill] sm:$0xff] %v7225_v10  ;;  %5440 = vmatprep.mubr.f32.mxu1 %v6805_v6  ;;  %5544 = vmatprep.mubr.f32.mxu0 %v6805_v6 }
 0x1ab   : > { %v7231_v42 = vpop.f32.mrf.mxu1  ;;  %v7233_v51 = vpop.f32.mrf.mxu0 }
 0x1ac   : > { %8147 = vst [vmem:[#allocation91_spill] sm:$0xff] %v7233_v51 }
 0x1ad   : > { %v7235_v45 = vpop.f32.mrf.mxu1  ;;  %v7237_v35 = vpop.f32.mrf.mxu0  ;;  %5441 = vmatmul.mubr.f32.gmra.mxu1 %v6828_v2  ;;  %5545 = vmatmul.mubr.f32.gmra.mxu0 %v6828_v2 }
 0x1ae   : > { %8148 = vst [vmem:[#allocation92_spill] sm:$0xff] %v7237_v35  ;;  %5443 = vmatprep.mubr.f32.mxu1 %v6833_v63  ;;  %5547 = vmatprep.mubr.f32.mxu0 %v6833_v63 }
 0x1af   : > { %v7243_v19 = vpop.f32.mrf.mxu1  ;;  %v7245_v10 = vpop.f32.mrf.mxu0 }
 0x1b0   : > { %8149 = vst [vmem:[#allocation93_spill] sm:$0xff] %v7245_v10 }
 0x1b1   : > { %v7247_v6 = vpop.f32.mrf.mxu1  ;;  %v7249_v34 = vpop.f32.mrf.mxu0  ;;  %5444 = vmatmul.mubr.f32.gmra.mxu1 %v6854_v56  ;;  %5548 = vmatmul.mubr.f32.gmra.mxu0 %v6854_v56 }
 0x1b2   : > { %8150 = vst [vmem:[#allocation94_spill] sm:$0xff] %v7249_v34  ;;  %5446 = vmatprep.mubr.f32.mxu1 %v6859_v16  ;;  %5550 = vmatprep.mubr.f32.mxu0 %v6859_v16 }
 0x1b3   : > { %v7255_v2 = vpop.f32.mrf.mxu1  ;;  %v7257_v35 = vpop.f32.mrf.mxu0 }
 0x1b4   : > { %8151 = vst [vmem:[#allocation95_spill] sm:$0xff] %v7257_v35 }
 0x1b5   : > { %v7259_v63 = vpop.f32.mrf.mxu1  ;;  %v7261_v51 = vpop.f32.mrf.mxu0  ;;  %5447 = vmatmul.mubr.f32.gmra.mxu1 %v6876_v1  ;;  %5551 = vmatmul.mubr.f32.gmra.mxu0 %v6876_v1 }
 0x1b6   : > { %8152 = vst [vmem:[#allocation96_spill] sm:$0xff] %v7261_v51  ;;  %5449 = vmatprep.mubr.f32.mxu1 %v6881_v29  ;;  %5553 = vmatprep.mubr.f32.mxu0 %v6881_v29 }
 0x1b7   : > { %v7267_v56 = vpop.f32.mrf.mxu1  ;;  %v7269_v34 = vpop.f32.mrf.mxu0 }
 0x1b8   : > { %8153 = vst [vmem:[#allocation97_spill] sm:$0xff] %v7269_v34 }
 0x1b9   : > { %v7271_v16 = vpop.f32.mrf.mxu1  ;;  %v7273_v10 = vpop.f32.mrf.mxu0  ;;  %5450 = vmatmul.mubr.f32.gmra.mxu1 %v6904_v37  ;;  %5554 = vmatmul.mubr.f32.gmra.mxu0 %v6904_v37 }
 0x1ba   : > { %8154 = vst [vmem:[#allocation98_spill] sm:$0xff] %v7273_v10  ;;  %5452 = vmatprep.mubr.f32.mxu1 %v6909_v24  ;;  %5556 = vmatprep.mubr.f32.mxu0 %v6909_v24 }
 0x1bb   : > { %v7279_v1 = vpop.f32.mrf.mxu1  ;;  %v7281_v51 = vpop.f32.mrf.mxu0 }
 0x1bc   : > { %8155 = vst [vmem:[#allocation99_spill] sm:$0xff] %v7281_v51 }
 0x1bd   : > { %v7283_v29 = vpop.f32.mrf.mxu1  ;;  %v7285_v35 = vpop.f32.mrf.mxu0  ;;  %5453 = vmatmul.mubr.f32.gmra.mxu1 %v6930_v57  ;;  %5557 = vmatmul.mubr.f32.gmra.mxu0 %v6930_v57 }
 0x1be   : > { %8156 = vst [vmem:[#allocation100_spill] sm:$0xff] %v7285_v35  ;;  %5455 = vmatprep.mubr.f32.mxu1 %v6935_v33  ;;  %5559 = vmatprep.mubr.f32.mxu0 %v6935_v33 }
 0x1bf   : > { %v7291_v37 = vpop.f32.mrf.mxu1  ;;  %v7293_v10 = vpop.f32.mrf.mxu0 }
 0x1c0   : > { %8157 = vst [vmem:[#allocation101_spill] sm:$0xff] %v7293_v10 }
 0x1c1   : > { %v7295_v24 = vpop.f32.mrf.mxu1  ;;  %v7297_v34 = vpop.f32.mrf.mxu0  ;;  %5456 = vmatmul.mubr.f32.gmra.mxu1 %v6952_v14  ;;  %5560 = vmatmul.mubr.f32.gmra.mxu0 %v6952_v14 }
 0x1c2   : > { %8158 = vst [vmem:[#allocation102_spill] sm:$0xff] %v7297_v34  ;;  %5458 = vmatprep.mubr.f32.mxu1 %v6957_v38  ;;  %5562 = vmatprep.mubr.f32.mxu0 %v6957_v38 }
 0x1c3   : > { %v7303_v57 = vpop.f32.mrf.mxu1  ;;  %v7305_v35 = vpop.f32.mrf.mxu0 }
 0x1c4   : > { %8159 = vst [vmem:[#allocation103_spill] sm:$0xff] %v7305_v35 }
 0x1c5   : > { %v7307_v33 = vpop.f32.mrf.mxu1  ;;  %v7309_v51 = vpop.f32.mrf.mxu0  ;;  %5459 = vmatmul.mubr.f32.gmra.mxu1 %v6973_v20  ;;  %5563 = vmatmul.mubr.f32.gmra.mxu0 %v6973_v20 }
 0x1c6   : > { %8160 = vst [vmem:[#allocation104_spill] sm:$0xff] %v7309_v51  ;;  %5461 = vmatprep.mubr.f32.mxu1 %v6978_v49  ;;  %5565 = vmatprep.mubr.f32.mxu0 %v6978_v49 }
 0x1c7   : > { %v7315_v14 = vpop.f32.mrf.mxu1  ;;  %v7317_v34 = vpop.f32.mrf.mxu0 }
 0x1c8   : > { %8161 = vst [vmem:[#allocation105_spill] sm:$0xff] %v7317_v34 }
 0x1c9   : > { %v7319_v38 = vpop.f32.mrf.mxu1  ;;  %v7321_v10 = vpop.f32.mrf.mxu0  ;;  %5462 = vmatmul.mubr.f32.gmra.mxu1 %v6992_v53  ;;  %5566 = vmatmul.mubr.f32.gmra.mxu0 %v6992_v53 }
 0x1ca   : > { %8162 = vst [vmem:[#allocation106_spill] sm:$0xff] %v7319_v38  ;;  %8163 = vst [vmem:[#allocation107_spill] sm:$0xff] %v7321_v10  ;;  %5464 = vmatprep.mubr.f32.mxu1 %v6997_v25  ;;  %5568 = vmatprep.mubr.f32.mxu0 %v6997_v25 }
 0x1cb   : > { %v7327_v20 = vpop.f32.mrf.mxu1  ;;  %v7329_v51 = vpop.f32.mrf.mxu0 }
 0x1cc   : > { %8164 = vst [vmem:[#allocation108_spill] sm:$0xff] %v7327_v20  ;;  %8165 = vst [vmem:[#allocation109_spill] sm:$0xff] %v7329_v51 }
 0x1cd   : > { %v7331_v49 = vpop.f32.mrf.mxu1  ;;  %v7333_v35 = vpop.f32.mrf.mxu0  ;;  %5465 = vmatmul.mubr.f32.gmra.mxu1 %v7006_v22  ;;  %5569 = vmatmul.mubr.f32.gmra.mxu0 %v7006_v22 }
 0x1ce   : > { %8166 = vst [vmem:[#allocation110_spill] sm:$0xff] %v7331_v49  ;;  %8167 = vst [vmem:[#allocation111_spill] sm:$0xff] %v7333_v35  ;;  %5467 = vmatprep.mubr.f32.mxu1 %v7011_v8  ;;  %5571 = vmatprep.mubr.f32.mxu0 %v7011_v8 }
 0x1cf   : > { %v7339_v53 = vpop.f32.mrf.mxu1  ;;  %v7341_v10 = vpop.f32.mrf.mxu0 }
 0x1d0   : > { %8168 = vst [vmem:[#allocation112_spill] sm:$0xff] %v7339_v53  ;;  %8169 = vst [vmem:[#allocation113_spill] sm:$0xff] %v7341_v10  ;;  %v8196_v53 = vld [vmem:[#allocation11_spill] sm:$0xff] }
 0x1d1   : > { %v7343_v25 = vpop.f32.mrf.mxu1  ;;  %v7345_v34 = vpop.f32.mrf.mxu0  ;;  %5468 = vmatmul.mubr.f32.gmra.mxu1 %v7026_v21  ;;  %5572 = vmatmul.mubr.f32.gmra.mxu0 %v7026_v21 }
 0x1d2   : > { %8170 = vst [vmem:[#allocation114_spill] sm:$0xff] %v7343_v25  ;;  %8171 = vst [vmem:[#allocation115_spill] sm:$0xff] %v7345_v34  ;;  %5470 = vmatprep.mubr.f32.mxu1 %v7031_v39  ;;  %5574 = vmatprep.mubr.f32.mxu0 %v7031_v39 }
 0x1d3   : > { %v7351_v22 = vpop.f32.mrf.mxu1  ;;  %v7353_v35 = vpop.f32.mrf.mxu0 }
 0x1d4   : > { %8172 = vst [vmem:[#allocation116_spill] sm:$0xff] %v7351_v22  ;;  %8173 = vst [vmem:[#allocation117_spill] sm:$0xff] %v7353_v35  ;;  %v8193_v22 = vld [vmem:[#allocation9_spill] sm:$0xff] }
 0x1d5   : > { %v7355_v8 = vpop.f32.mrf.mxu1  ;;  %v7357_v51 = vpop.f32.mrf.mxu0  ;;  %5471 = vmatmul.mubr.f32.gmra.mxu1 %v7046_v28  ;;  %5575 = vmatmul.mubr.f32.gmra.mxu0 %v7046_v28 }
 0x1d6   : > { %8174 = vst [vmem:[#allocation118_spill] sm:$0xff] %v7355_v8  ;;  %8175 = vst [vmem:[#allocation119_spill] sm:$0xff] %v7357_v51  ;;  %5473 = vmatprep.mubr.f32.mxu1 %v7051_v50  ;;  %5577 = vmatprep.mubr.f32.mxu0 %v7051_v50 }
 0x1d7   : > { %v7363_v21 = vpop.f32.mrf.mxu1  ;;  %v7365_v34 = vpop.f32.mrf.mxu0 }
 0x1d8   : > { %8176 = vst [vmem:[#allocation120_spill] sm:$0xff] %v7363_v21  ;;  %8177 = vst [vmem:[#allocation121_spill] sm:$0xff] %v7365_v34 }
 0x1d9   : > { %v7367_v39 = vpop.f32.mrf.mxu1  ;;  %v7369_v10 = vpop.f32.mrf.mxu0  ;;  %5474 = vmatmul.mubr.f32.gmra.mxu1 %v7060_v5  ;;  %5578 = vmatmul.mubr.f32.gmra.mxu0 %v7060_v5 }
 0x1da   : > { %8178 = vst [vmem:[#allocation122_spill] sm:$0xff] %v7367_v39  ;;  %8179 = vst [vmem:[#allocation123_spill] sm:$0xff] %v7369_v10  ;;  %5476 = vmatprep.mubr.f32.mxu1 %v7065_v55  ;;  %5580 = vmatprep.mubr.f32.mxu0 %v7065_v55 }
 0x1db   : > { %v7375_v28 = vpop.f32.mrf.mxu1  ;;  %v7377_v51 = vpop.f32.mrf.mxu0 }
 0x1dc   : > { %8180 = vst [vmem:[#allocation124_spill] sm:$0xff] %v7375_v28  ;;  %8181 = vst [vmem:[#allocation125_spill] sm:$0xff] %v7377_v51 }
 0x1dd   : > { %v7379_v50 = vpop.f32.mrf.mxu1  ;;  %v7381_v35 = vpop.f32.mrf.mxu0  ;;  %5477 = vmatmul.mubr.f32.gmra.mxu1 %v7080_v13  ;;  %5581 = vmatmul.mubr.f32.gmra.mxu0 %v7080_v13 }
 0x1de   : > { %8182 = vst [vmem:[#allocation126_spill] sm:$0xff] %v7379_v50  ;;  %8183 = vst [vmem:[#allocation127_spill] sm:$0xff] %v7381_v35  ;;  %5479 = vmatprep.mubr.f32.mxu1 %v7085_v30  ;;  %5583 = vmatprep.mubr.f32.mxu0 %v7085_v30 }
 0x1df   : > { %v7387_v5 = vpop.f32.mrf.mxu1  ;;  %v7389_v10 = vpop.f32.mrf.mxu0 }
 0x1e0   : > { %8184 = vst [vmem:[#allocation128_spill] sm:$0xff] %v7387_v5  ;;  %8185 = vst [vmem:[#allocation129_spill] sm:$0xff] %v7389_v10 }
 0x1e1   : > { %v7391_v55 = vpop.f32.mrf.mxu1  ;;  %v7393_v34 = vpop.f32.mrf.mxu0  ;;  %5480 = vmatmul.mubr.f32.gmra.mxu1 %v7100_v46  ;;  %5584 = vmatmul.mubr.f32.gmra.mxu0 %v7100_v46  ;;  %v8191_v46 = vld [vmem:[#allocation5_spill] sm:$0xff] }
 0x1e2   : > { %8186 = vst [vmem:[#allocation130_spill] sm:$0xff] %v7391_v55  ;;  %8187 = vst [vmem:[#allocation131_spill] sm:$0xff] %v7393_v34 }
 0x1e3   : > { %v7397_v35 = vpop.f32.mrf.mxu1  ;;  %v7399_v51 = vpop.f32.mrf.mxu0 }
 0x1e4   : > { %8188 = vst [vmem:[#allocation132_spill] sm:$0xff] %v7397_v35  ;;  %8189 = vst [vmem:[#allocation133_spill] sm:$0xff] %v7399_v51 }
 0x1e5   : > { %v7401_v13 = vpop.f32.mrf.mxu1  ;;  %v5308_v50 = vpop.f32.mrf.mxu0 }
 0x1e6   : > { %v7404_v30 = vadd.f32 %v5308_v50, %v6593_v59 }
 0x1e7   : > { %v7406_v5 = vpop.f32.mrf.mxu1  ;;  %v2370_v10 = vpop.f32.mrf.mxu0 }
 0x1e8   : > { %8190 = vst [vmem:[#allocation134_spill] sm:$0xff] %v7404_v30  ;;  %v7409_v55 = vadd.f32 %v2370_v10, %v6609_v15  ;;  %v8202_v30 = vld [vmem:[#allocation15_spill] sm:$0xff] }
 0x1e9   : > { %v7411_v34 = vpop.f32.mrf.mxu1  ;;  %v5311_v28 = vpop.f32.mrf.mxu0 }
 0x1ea   : > { %v7414_v39 = vadd.f32 %v5311_v28, %v8191_v46 }
 0x1eb   : > { %v7416_v35 = vpop.f32.mrf.mxu1  ;;  %v2380_v51 = vpop.f32.mrf.mxu0 }
 0x1ec   : > { %8192 = vst [vmem:[#allocation5_spill] sm:$0xff] %v7414_v39  ;;  %v8199_v39 = vld [vmem:[#allocation13_spill] sm:$0xff] }
 0x1ed   : > { %v7418_v21 = vpop.f32.mrf.mxu1  ;;  %v5314_v8 = vpop.f32.mrf.mxu0 }
 0x1ef   : > { %v7420_v59 = vpop.f32.mrf.mxu1  ;;  %v2389_v50 = vpop.f32.mrf.mxu0 }
 0x1f0   : > { %v7423_v25 = vadd.f32 %v2389_v50, %v8193_v22 }
 0x1f1   : > { %v7425_v15 = vpop.f32.mrf.mxu1  ;;  %v5317_v10 = vpop.f32.mrf.mxu0 }
 0x1f2   : > { %8194 = vst [vmem:[#allocation9_spill] sm:$0xff] %v7423_v25  ;;  %8195 = vst [vmem:[#allocation135_spill] sm:$0xff] %v7425_v15  ;;  %v7428_v49 = vadd.f32 %v5317_v10, %v8196_v53 }
 0x1f3   : > { %v7430_v28 = vpop.f32.mrf.mxu1  ;;  %v2398_v46 = vpop.f32.mrf.mxu0 }
 0x1f4   : > { %8197 = vst [vmem:[#allocation11_spill] sm:$0xff] %v7428_v49  ;;  %8198 = vst [vmem:[#allocation136_spill] sm:$0xff] %v7430_v28  ;;  %v7433_v51 = vadd.f32 %v2398_v46, %v8199_v39  ;;  %v8207_v49 = vld [vmem:[#allocation19_spill] sm:$0xff] }
 0x1f5   : > { %v7435_v20 = vpop.f32.mrf.mxu1  ;;  %v5320_v8 = vpop.f32.mrf.mxu0 }
 0x1f6   : > { %8200 = vst [vmem:[#allocation13_spill] sm:$0xff] %v7433_v51  ;;  %8201 = vst [vmem:[#allocation137_spill] sm:$0xff] %v7435_v20  ;;  %v7438_v38 = vadd.f32 %v5320_v8, %v8202_v30  ;;  %v8210_v51 = vld [vmem:[#allocation21_spill] sm:$0xff] }
 0x1f7   : > { %v7440_v22 = vpop.f32.mrf.mxu1  ;;  %v2408_v50 = vpop.f32.mrf.mxu0 }
 0x1f8   : > { %8203 = vst [vmem:[#allocation15_spill] sm:$0xff] %v7438_v38  ;;  %8204 = vst [vmem:[#allocation138_spill] sm:$0xff] %v7440_v22  ;;  %v8213_v38 = vld [vmem:[#allocation23_spill] sm:$0xff] }
 0x1f9   : > { %v7442_v25 = vpop.f32.mrf.mxu1  ;;  %v5323_v15 = vpop.f32.mrf.mxu0 }
 0x1fa   : > { %8205 = vst [vmem:[#allocation139_spill] sm:$0xff] %v7442_v25 }
 0x1fb   : > { %v7444_v53 = vpop.f32.mrf.mxu1  ;;  %v2417_v10 = vpop.f32.mrf.mxu0 }
 0x1fc   : > { %8206 = vst [vmem:[#allocation140_spill] sm:$0xff] %v7444_v53  ;;  %v7447_v28 = vadd.f32 %v2417_v10, %v8207_v49  ;;  %v8216_v53 = vld [vmem:[#allocation25_spill] sm:$0xff] }
 0x1fd   : > { %v7449_v39 = vpop.f32.mrf.mxu1  ;;  %v5326_v46 = vpop.f32.mrf.mxu0 }
 0x1fe   : > { %8208 = vst [vmem:[#allocation19_spill] sm:$0xff] %v7447_v28  ;;  %8209 = vst [vmem:[#allocation141_spill] sm:$0xff] %v7449_v39  ;;  %v7452_v20 = vadd.f32 %v5326_v46, %v8210_v51 }
 0x1ff   : > { %v7454_v30 = vpop.f32.mrf.mxu1  ;;  %v2426_v8 = vpop.f32.mrf.mxu0 }
 0x200   : > { %8211 = vst [vmem:[#allocation21_spill] sm:$0xff] %v7452_v20  ;;  %8212 = vst [vmem:[#allocation142_spill] sm:$0xff] %v7454_v30  ;;  %v7457_v50 = vadd.f32 %v2426_v8, %v8213_v38  ;;  %v8221_v20 = vld [vmem:[#allocation29_spill] sm:$0xff] }
 0x201   : > { %v7459_v25 = vpop.f32.mrf.mxu1  ;;  %v5329_v15 = vpop.f32.mrf.mxu0 }
 0x202   : > { %8214 = vst [vmem:[#allocation23_spill] sm:$0xff] %v7457_v50  ;;  %8215 = vst [vmem:[#allocation143_spill] sm:$0xff] %v7459_v25  ;;  %v7462_v22 = vadd.f32 %v5329_v15, %v8216_v53  ;;  %v8224_v50 = vld [vmem:[#allocation31_spill] sm:$0xff] }
 0x203   : > { %v7464_v49 = vpop.f32.mrf.mxu1  ;;  %v2436_v10 = vpop.f32.mrf.mxu0 }
 0x204   : > { %8217 = vst [vmem:[#allocation25_spill] sm:$0xff] %v7462_v22  ;;  %8218 = vst [vmem:[#allocation144_spill] sm:$0xff] %v7464_v49  ;;  %v8226_v22 = vld [vmem:[#allocation33_spill] sm:$0xff] }
 0x205   : > { %v7466_v28 = vpop.f32.mrf.mxu1  ;;  %v5332_v39 = vpop.f32.mrf.mxu0 }
 0x206   : > { %8219 = vst [vmem:[#allocation145_spill] sm:$0xff] %v7466_v28 }
 0x207   : > { %v7468_v51 = vpop.f32.mrf.mxu1  ;;  %v2445_v46 = vpop.f32.mrf.mxu0 }
 0x208   : > { %8220 = vst [vmem:[#allocation146_spill] sm:$0xff] %v7468_v51  ;;  %v7471_v30 = vadd.f32 %v2445_v46, %v8221_v20  ;;  %v8228_v51 = vld [vmem:[#allocation35_spill] sm:$0xff] }
 0x209   : > { %v7473_v38 = vpop.f32.mrf.mxu1  ;;  %v5335_v8 = vpop.f32.mrf.mxu0 }
 0x20a   : > { %8222 = vst [vmem:[#allocation29_spill] sm:$0xff] %v7471_v30  ;;  %8223 = vst [vmem:[#allocation147_spill] sm:$0xff] %v7473_v38  ;;  %v7476_v25 = vadd.f32 %v5335_v8, %v8224_v50 }
 0x20b   : > { %v7478_v53 = vpop.f32.mrf.mxu1  ;;  %v2454_v15 = vpop.f32.mrf.mxu0 }
 0x20c   : > { %8225 = vst [vmem:[#allocation31_spill] sm:$0xff] %v7476_v25  ;;  %v7481_v10 = vadd.f32 %v2454_v15, %v8226_v22 }
 0x20d   : > { %v7483_v28 = vpop.f32.mrf.mxu1  ;;  %v5338_v39 = vpop.f32.mrf.mxu0 }
 0x20e   : > { %8227 = vst [vmem:[#allocation33_spill] sm:$0xff] %v7481_v10  ;;  %v7486_v49 = vadd.f32 %v5338_v39, %v8228_v51 }
 0x20f   : > { %v7488_v20 = vpop.f32.mrf.mxu1  ;;  %v2464_v46 = vpop.f32.mrf.mxu0 }
 0x210   : > { %8229 = vst [vmem:[#allocation35_spill] sm:$0xff] %v7486_v49  ;;  %8230 = vst [vmem:[#allocation148_spill] sm:$0xff] %v7488_v20  ;;  %v8237_v49 = vld [vmem:[#allocation41_spill] sm:$0xff] }
 0x211   : > { %v7490_v30 = vpop.f32.mrf.mxu1  ;;  %v5341_v38 = vpop.f32.mrf.mxu0 }
 0x212   : > { %8231 = vst [vmem:[#allocation149_spill] sm:$0xff] %v7490_v30 }
 0x213   : > { %v7492_v50 = vpop.f32.mrf.mxu1  ;;  %v2473_v8 = vpop.f32.mrf.mxu0 }
 0x214   : > { %8232 = vst [vmem:[#allocation150_spill] sm:$0xff] %v7492_v50  ;;  %v7495_v25 = vadd.f32 %v2473_v8, %v6885_v60  ;;  %v8240_v50 = vld [vmem:[#allocation43_spill] sm:$0xff] }
 0x215   : > { %v7497_v22 = vpop.f32.mrf.mxu1  ;;  %v5344_v15 = vpop.f32.mrf.mxu0 }
 0x216   : > { %8233 = vst [vmem:[#allocation151_spill] sm:$0xff] %v7495_v25  ;;  %8234 = vst [vmem:[#allocation152_spill] sm:$0xff] %v7497_v22  ;;  %v7500_v10 = vadd.f32 %v5344_v15, %v6899_v7 }
 0x217   : > { %v7502_v51 = vpop.f32.mrf.mxu1  ;;  %v2482_v39 = vpop.f32.mrf.mxu0 }
 0x218   : > { %8235 = vst [vmem:[#allocation153_spill] sm:$0xff] %v7500_v10  ;;  %8236 = vst [vmem:[#allocation154_spill] sm:$0xff] %v7502_v51  ;;  %v7505_v46 = vadd.f32 %v2482_v39, %v8237_v49  ;;  %v8245_v10 = vld [vmem:[#allocation47_spill] sm:$0xff] }
 0x219   : > { %v7507_v30 = vpop.f32.mrf.mxu1  ;;  %v5347_v38 = vpop.f32.mrf.mxu0 }
 0x21a   : > { %8238 = vst [vmem:[#allocation41_spill] sm:$0xff] %v7505_v46  ;;  %8239 = vst [vmem:[#allocation155_spill] sm:$0xff] %v7507_v30  ;;  %v7510_v20 = vadd.f32 %v5347_v38, %v8240_v50  ;;  %v8248_v46 = vld [vmem:[#allocation49_spill] sm:$0xff] }
 0x21b   : > { %v7512_v60 = vpop.f32.mrf.mxu1  ;;  %v2492_v8 = vpop.f32.mrf.mxu0 }
 0x21c   : > { %8241 = vst [vmem:[#allocation43_spill] sm:$0xff] %v7510_v20  ;;  %8242 = vst [vmem:[#allocation156_spill] sm:$0xff] %v7512_v60  ;;  %v8251_v20 = vld [vmem:[#allocation51_spill] sm:$0xff] }
 0x21d   : > { %v7514_v25 = vpop.f32.mrf.mxu1  ;;  %v5350_v22 = vpop.f32.mrf.mxu0 }
 0x21e   : > { %8243 = vst [vmem:[#allocation157_spill] sm:$0xff] %v7514_v25 }
 0x21f   : > { %v7516_v7 = vpop.f32.mrf.mxu1  ;;  %v2501_v15 = vpop.f32.mrf.mxu0 }
 0x220   : > { %8244 = vst [vmem:[#allocation158_spill] sm:$0xff] %v7516_v7  ;;  %v7519_v51 = vadd.f32 %v2501_v15, %v8245_v10  ;;  %v8254_v7 = vld [vmem:[#allocation53_spill] sm:$0xff] }
 0x221   : > { %v7521_v49 = vpop.f32.mrf.mxu1  ;;  %v5353_v39 = vpop.f32.mrf.mxu0 }
 0x222   : > { %8246 = vst [vmem:[#allocation47_spill] sm:$0xff] %v7519_v51  ;;  %8247 = vst [vmem:[#allocation159_spill] sm:$0xff] %v7521_v49  ;;  %v7524_v30 = vadd.f32 %v5353_v39, %v8248_v46 }
 0x223   : > { %v7526_v50 = vpop.f32.mrf.mxu1  ;;  %v2510_v38 = vpop.f32.mrf.mxu0 }
 0x224   : > { %8249 = vst [vmem:[#allocation49_spill] sm:$0xff] %v7524_v30  ;;  %8250 = vst [vmem:[#allocation160_spill] sm:$0xff] %v7526_v50  ;;  %v7529_v8 = vadd.f32 %v2510_v38, %v8251_v20  ;;  %v8259_v30 = vld [vmem:[#allocation57_spill] sm:$0xff] }
 0x225   : > { %v7531_v25 = vpop.f32.mrf.mxu1  ;;  %v5356_v22 = vpop.f32.mrf.mxu0 }
 0x226   : > { %8252 = vst [vmem:[#allocation51_spill] sm:$0xff] %v7529_v8  ;;  %8253 = vst [vmem:[#allocation161_spill] sm:$0xff] %v7531_v25  ;;  %v7534_v60 = vadd.f32 %v5356_v22, %v8254_v7  ;;  %v8262_v8 = vld [vmem:[#allocation59_spill] sm:$0xff] }
 0x227   : > { %v7536_v10 = vpop.f32.mrf.mxu1  ;;  %v2520_v15 = vpop.f32.mrf.mxu0 }
 0x228   : > { %8255 = vst [vmem:[#allocation53_spill] sm:$0xff] %v7534_v60  ;;  %8256 = vst [vmem:[#allocation162_spill] sm:$0xff] %v7536_v10  ;;  %v8265_v60 = vld [vmem:[#allocation61_spill] sm:$0xff] }
 0x229   : > { %v7538_v51 = vpop.f32.mrf.mxu1  ;;  %v5359_v49 = vpop.f32.mrf.mxu0 }
 0x22a   : > { %8257 = vst [vmem:[#allocation163_spill] sm:$0xff] %v7538_v51 }
 0x22b   : > { %v7540_v46 = vpop.f32.mrf.mxu1  ;;  %v2529_v39 = vpop.f32.mrf.mxu0 }
 0x22c   : > { %8258 = vst [vmem:[#allocation164_spill] sm:$0xff] %v7540_v46  ;;  %v7543_v50 = vadd.f32 %v2529_v39, %v8259_v30  ;;  %v8268_v46 = vld [vmem:[#allocation63_spill] sm:$0xff] }
 0x22d   : > { %v7545_v20 = vpop.f32.mrf.mxu1  ;;  %v5362_v38 = vpop.f32.mrf.mxu0 }
 0x22e   : > { %8260 = vst [vmem:[#allocation57_spill] sm:$0xff] %v7543_v50  ;;  %8261 = vst [vmem:[#allocation165_spill] sm:$0xff] %v7545_v20  ;;  %v7548_v25 = vadd.f32 %v5362_v38, %v8262_v8 }
 0x22f   : > { %v7550_v7 = vpop.f32.mrf.mxu1  ;;  %v2538_v22 = vpop.f32.mrf.mxu0 }
 0x230   : > { %8263 = vst [vmem:[#allocation59_spill] sm:$0xff] %v7548_v25  ;;  %8264 = vst [vmem:[#allocation166_spill] sm:$0xff] %v7550_v7  ;;  %v7553_v15 = vadd.f32 %v2538_v22, %v8265_v60  ;;  %v8271_v25 = vld [vmem:[#allocation67_spill] sm:$0xff] }
 0x231   : > { %v7555_v51 = vpop.f32.mrf.mxu1  ;;  %v5365_v49 = vpop.f32.mrf.mxu0 }
 0x232   : > { %8266 = vst [vmem:[#allocation61_spill] sm:$0xff] %v7553_v15  ;;  %8267 = vst [vmem:[#allocation167_spill] sm:$0xff] %v7555_v51  ;;  %v7558_v10 = vadd.f32 %v5365_v49, %v8268_v46  ;;  %v8274_v15 = vld [vmem:[#allocation69_spill] sm:$0xff] }
 0x233   : > { %v7560_v30 = vpop.f32.mrf.mxu1  ;;  %v2548_v39 = vpop.f32.mrf.mxu0 }
 0x234   : > { %8269 = vst [vmem:[#allocation63_spill] sm:$0xff] %v7558_v10 }
 0x235   : > { %v7562_v50 = vpop.f32.mrf.mxu1  ;;  %v5368_v20 = vpop.f32.mrf.mxu0 }
 0x237   : > { %v7564_v8 = vpop.f32.mrf.mxu1  ;;  %v2557_v38 = vpop.f32.mrf.mxu0 }
 0x238   : > { %8270 = vst [vmem:[#allocation168_spill] sm:$0xff] %v7564_v8  ;;  %v7567_v7 = vadd.f32 %v2557_v38, %v8271_v25 }
 0x239   : > { %v7569_v60 = vpop.f32.mrf.mxu1  ;;  %v5371_v22 = vpop.f32.mrf.mxu0 }
 0x23a   : > { %8272 = vst [vmem:[#allocation67_spill] sm:$0xff] %v7567_v7  ;;  %8273 = vst [vmem:[#allocation169_spill] sm:$0xff] %v7569_v60  ;;  %v7572_v51 = vadd.f32 %v5371_v22, %v8274_v15  ;;  %v8281_v7 = vld [vmem:[#allocation2_spill] sm:$0xff]  ;;  %v8282_v15 = vld [vmem:[#allocation3_spill] sm:$0xff] }
 0x23b   : > { %v7574_v46 = vpop.f32.mrf.mxu1  ;;  %v2566_v49 = vpop.f32.mrf.mxu0  ;;  %v1378_v60 = vadd.f32 %v7115_v40, %v8281_v7  ;;  %v1373_v22 = vadd.f32 %v7123_v17, %v8282_v15 }
 0x23c   : > { %8275 = vst [vmem:[#allocation69_spill] sm:$0xff] %v7572_v51  ;;  %8276 = vst [vmem:[#allocation170_spill] sm:$0xff] %v7574_v46  ;;  %v7577_v39 = vadd.f32 %v2566_v49, %v7088_v61  ;;  %v8283_v51 = vld [vmem:[#allocation4_spill] sm:$0xff]  ;;  %v8284_v61 = vld [vmem:[#allocation6_spill] sm:$0xff] }
 0x23d   : > { %v7579_v10 = vpop.f32.mrf.mxu1  ;;  %v5374_v20 = vpop.f32.mrf.mxu0  ;;  %v1388_v46 = vadd.f32 %v7127_v31, %v8283_v51  ;;  %v7594_v49 = vadd.f32 %v7135_v44, %v8284_v61  ;;  %v8289_v31 = vld [vmem:[#allocation12_spill] sm:$0xff]  ;;  %v8290_v44 = vld [vmem:[#allocation14_spill] sm:$0xff] }
 0x23e   : > { %8277 = vst [vmem:[#allocation171_spill] sm:$0xff] %v7577_v39  ;;  %8278 = vst [vmem:[#allocation172_spill] sm:$0xff] %v7579_v10  ;;  %v7582_v8 = vadd.f32 %v5374_v20, %v7095_v9  ;;  %v8285_v39 = vld [vmem:[#allocation7_spill] sm:$0xff]  ;;  %v8286_v20 = vld [vmem:[#allocation8_spill] sm:$0xff]  ;;  %v7612_v51 = vadd.f32 %v7159_v0, %v8289_v31  ;;  %v7616_v15 = vadd.f32 %v7163_v52, %v8290_v44 }
 0x23f   : > { %v7584_v25 = vpop.f32.mrf.mxu1  ;;  %v2576_v38 = vpop.f32.mrf.mxu0  ;;  %v7598_v9 = vadd.f32 %v7139_v48, %v8285_v39  ;;  %v8291_v48 = vld [vmem:[#allocation16_spill] sm:$0xff] }
 0x240   : > { %8279 = vst [vmem:[#allocation173_spill] sm:$0xff] %v7582_v8  ;;  %8280 = vst [vmem:[#allocation174_spill] sm:$0xff] %v7584_v25  ;;  %v7602_v38 = vadd.f32 %v7147_v32, %v8286_v20  ;;  %v8287_v8 = vld [vmem:[#allocation10_spill] sm:$0xff]  ;;  %v7620_v39 = vadd.f32 %v7171_v62, %v8291_v48  ;;  %v8292_v32 = vld [vmem:[#allocation17_spill] sm:$0xff] }
 0x241   : > { %v7606_v40 = vadd.f32 %v7151_v12, %v8287_v8  ;;  %v7608_v17 = vpop.f32.mrf.mxu1  ;;  %v5377_v7 = vpop.f32.mrf.mxu0  ;;  %v7624_v61 = vadd.f32 %v7175_v11, %v8292_v32  ;;  %v8293_v12 = vld [vmem:[#allocation18_spill] sm:$0xff]  ;;  %v8294_v20 = vld [vmem:[#allocation20_spill] sm:$0xff] }
 0x242   : > { %8288 = vst [vmem:[#allocation2_spill] sm:$0xff] %v7608_v17  ;;  %v7628_v8 = vadd.f32 %v7183_v4, %v8293_v12  ;;  %v7632_v0 = vadd.f32 %v7187_v58, %v8294_v20  ;;  %v8295_v7 = vld [vmem:[#allocation22_spill] sm:$0xff]  ;;  %v8296_v31 = vld [vmem:[#allocation24_spill] sm:$0xff]  ;;  %v8299_v4 = vld [vmem:[#allocation27_spill] sm:$0xff]  ;;  %v2005_v58 = vadd.f32 %v7401_v13, %v7117_v18 }
 0x243   : > { %v7636_v52 = vadd.f32 %v7195_v47, %v8295_v7  ;;  %v7640_v62 = vadd.f32 %v7199_v41, %v8296_v31  ;;  %v7642_v44 = vpop.f32.mrf.mxu1  ;;  %v2585_v11 = vpop.f32.mrf.mxu0  ;;  %v8298_v48 = vld [vmem:[#allocation26_spill] sm:$0xff]  ;;  %v7650_v12 = vadd.f32 %v7211_v23, %v8299_v4  ;;  %v8301_v20 = vld [vmem:[#allocation28_spill] sm:$0xff] }
 0x244   : > { %8297 = vst [vmem:[#allocation3_spill] sm:$0xff] %v7642_v44  ;;  %v7646_v32 = vadd.f32 %v7207_v26, %v8298_v48  ;;  %v7655_v47 = vadd.f32 %v2585_v11, %v7113_v36  ;;  %v7659_v41 = vadd.f32 %v7219_v54, %v8301_v20  ;;  %v8302_v7 = vld [vmem:[#allocation30_spill] sm:$0xff]  ;;  %v8303_v26 = vld [vmem:[#allocation32_spill] sm:$0xff]  ;;  %v2000_v54 = vadd.f32 %v7406_v5, %v7125_v27 }
 0x245   : > { %v7663_v31 = vadd.f32 %v7223_v43, %v8302_v7  ;;  %v7667_v48 = vadd.f32 %v7231_v42, %v8303_v26  ;;  %v8304_v23 = vld [vmem:[#allocation34_spill] sm:$0xff]  ;;  %v5412_v18 = vpop.f32.mrf.mxu1  ;;  %v5516_v13 = vpop.f32.mrf.mxu0  ;;  %v8305_v36 = vld [vmem:[#allocation36_spill] sm:$0xff]  ;;  %v8306_v7 = vld [vmem:[#allocation37_spill] sm:$0xff] }
 0x246   : > { %8300 = vst [vmem:[#allocation4_spill] sm:$0xff] %v7655_v47  ;;  %v7671_v4 = vadd.f32 %v7235_v45, %v8304_v23  ;;  %v7675_v11 = vadd.f32 %v7243_v19, %v8305_v36  ;;  %v2948_v20 = vadd.f32 %v5412_v18, %v1378_v60  ;;  %v3318_v43 = vadd.f32 %v5516_v13, %v2005_v58  ;;  %v8307_v42 = vld [vmem:[#allocation38_spill] sm:$0xff]  ;;  %v8308_v45 = vld [vmem:[#allocation39_spill] sm:$0xff]  ;;  %v8309_v44 = vld [vmem:[#allocation40_spill] sm:$0xff] }
 0x247   : > { %v7681_v47 = vadd.f32 %v7247_v6, %v8306_v7  ;;  %v7685_v26 = vadd.f32 %v7255_v2, %v8307_v42  ;;  %v7689_v23 = vadd.f32 %v7259_v63, %v8308_v45  ;;  %v7693_v19 = vadd.f32 %v7267_v56, %v8309_v44  ;;  %v2708_v36 = vpop.f32.mrf.mxu1  ;;  %v3078_v27 = vpop.f32.mrf.mxu0  ;;  %v8310_v5 = vld [vmem:[#allocation42_spill] sm:$0xff]  ;;  %v8311_v6 = vld [vmem:[#allocation44_spill] sm:$0xff]  ;;  %v8312_v13 = vld [vmem:[#allocation45_spill] sm:$0xff] }
 0x248   : > { %v7697_v60 = vadd.f32 %v7271_v16, %v8310_v5  ;;  %v7701_v58 = vadd.f32 %v7279_v1, %v8311_v6  ;;  %v2947_v2 = vadd.f32 %v2708_v36, %v1373_v22  ;;  %v3317_v18 = vadd.f32 %v3078_v27, %v2000_v54  ;;  %v8313_v7 = vld [vmem:[#allocation46_spill] sm:$0xff]  ;;  %v8314_v6 = vld [vmem:[#allocation48_spill] sm:$0xff]  ;;  %v8316_v36 = vld [vmem:[#allocation75_spill] sm:$0xff] }
 0x249   : > { %v7705_v63 = vadd.f32 %v7283_v29, %v8312_v13  ;;  %v7709_v56 = vadd.f32 %v7291_v37, %v8313_v7  ;;  %v5415_v44 = vpop.f32.mrf.mxu1  ;;  %v5519_v16 = vpop.f32.mrf.mxu0  ;;  %v3415_v42 = vrot.slane %v2948_v20, 1  ;;  %v3608_v45 = vrot.slane %v3318_v43, 2  ;;  %v8315_v54 = vld [vmem:[#allocation50_spill] sm:$0xff]  ;;  %v8317_v43 = vld [vmem:[#allocation76_spill] sm:$0xff] }
 0x24a   : > { %v3414_v5 = vrot.slane %v2947_v2, 1  ;;  %v3607_v1 = vrot.slane %v3317_v18, 2  ;;  %v7713_v22 = vadd.f32 %v7295_v24, %v8314_v6  ;;  %v7717_v29 = vadd.f32 %v7303_v57, %v8315_v54  ;;  %v8319_v25 = vld [vmem:[#allocation54_spill] sm:$0xff]  ;;  %v8327_v10 = vld [vmem:[#allocation136_spill] sm:$0xff] }
 0x24b   : > { %v2015_v37 = vadd.f32 %v7411_v34, %v7129_v3  ;;  %v2010_v27 = vadd.f32 %v7416_v35, %v8316_v36  ;;  %v2718_v13 = vpop.f32.mrf.mxu1  ;;  %v3088_v20 = vpop.f32.mrf.mxu0  ;;  %v2025_v2 = vadd.f32 %v7418_v21, %v8317_v43  ;;  %v2950_v7 = vadd.f32 %v5415_v44, %v1388_v46  ;;  %v8318_v35 = vld [vmem:[#allocation52_spill] sm:$0xff] }
 0x24c   : > { %v3416_v18 = vsel %vm3413_vm0, %v3414_v5, %v3415_v42  ;;  %v3609_v24 = vsel %vm3606_vm1, %v3607_v1, %v3608_v45  ;;  %v2949_v54 = vadd.f32 %v2718_v13, %v7594_v49  ;;  %v7732_v36 = vadd.f32 %v7307_v33, %v8318_v35  ;;  %v8320_v5 = vld [vmem:[#allocation77_spill] sm:$0xff]  ;;  %v8323_v13 = vld [vmem:[#allocation78_spill] sm:$0xff] }
 0x24d   : > { %v3526_v57 = vadd.f32 %v3416_v18, %v7409_v55  ;;  %v3320_v6 = vadd.f32 %v5519_v16, %v2015_v37  ;;  %v3319_v34 = vadd.f32 %v3088_v20, %v2010_v27  ;;  %v5418_v3 = vpop.f32.mrf.mxu1  ;;  %v5522_v17 = vpop.f32.mrf.mxu0  ;;  %v7736_v21 = vadd.f32 %v7315_v14, %v8319_v25  ;;  %v8321_v27 = vld [vmem:[#allocation55_spill] sm:$0xff]  ;;  %v8322_v14 = vld [vmem:[#allocation106_spill] sm:$0xff] }
 0x24e   : > { %v2020_v1 = vadd.f32 %v7420_v59, %v8320_v5  ;;  %v2952_v55 = vadd.f32 %v5418_v3, %v7598_v9  ;;  %v3417_v49 = vrot.slane %v2949_v54, 1  ;;  %v3322_v33 = vadd.f32 %v5522_v17, %v2025_v2  ;;  %v8324_v59 = vld [vmem:[#allocation135_spill] sm:$0xff] }
 0x24f   : > { %v3719_v46 = vadd.f32 %v3609_v24, %v3526_v57  ;;  %v3610_v44 = vrot.slane %v3319_v34, 2  ;;  %v2728_v16 = vpop.f32.mrf.mxu1  ;;  %v3098_v37 = vpop.f32.mrf.mxu0  ;;  %v7748_v25 = vadd.f32 %v8322_v14, %v8321_v27  ;;  %v2035_v20 = vadd.f32 %v8324_v59, %v8323_v13  ;;  %v8325_v57 = vld [vmem:[#allocation134_spill] sm:$0xff]  ;;  %v8326_v14 = vld [vmem:[#allocation79_spill] sm:$0xff] }
 0x250   : > { %v2951_v43 = vadd.f32 %v2728_v16, %v7602_v38  ;;  %v3321_v18 = vadd.f32 %v3098_v37, %v2020_v1  ;;  %v3419_v35 = vrot.slane %v2950_v7, 1  ;;  %v3612_v5 = vrot.slane %v3320_v6, 2  ;;  %v8330_v37 = vld [vmem:[#allocation5_spill] sm:$0xff] }
 0x251   : > { %3751 = vst [vmem:[%s7743_s19] sm:$0xff] %v3719_v46  ;;  %v3418_v9 = vsel %vm3413_vm0, %v3415_v42, %v3417_v49  ;;  %v3611_v24 = vsel %vm3606_vm1, %v3608_v45, %v3610_v44  ;;  %v5421_v17 = vpop.f32.mrf.mxu1  ;;  %v5525_v2 = vpop.f32.mrf.mxu0  ;;  %v3422_v34 = vrot.slane %v2952_v55, 1  ;;  %v2030_v13 = vadd.f32 %v8327_v10, %v8326_v14  ;;  %v8328_v55 = vld [vmem:[#allocation56_spill] sm:$0xff] }
 0x252   : > { %v3527_v54 = vadd.f32 %v3418_v9, %v8325_v57  ;;  %v3420_v3 = vrot.slane %v2951_v43, 1  ;;  %v3613_v27 = vrot.slane %v3321_v18, 2  ;;  %v3615_v59 = vrot.slane %v3322_v33, 2  ;;  %v8329_v44 = vld [vmem:[#allocation108_spill] sm:$0xff]  ;;  %v8331_v33 = vld [vmem:[#allocation9_spill] sm:$0xff] }
 0x253   : > { %v2954_v38 = vadd.f32 %v5421_v17, %v7606_v40  ;;  %v3324_v7 = vadd.f32 %v5525_v2, %v2035_v20  ;;  %v2738_v6 = vpop.f32.mrf.mxu1  ;;  %v3108_v1 = vpop.f32.mrf.mxu0  ;;  %v7765_v16 = vadd.f32 %v8329_v44, %v8328_v55  ;;  %v8332_v9 = vld [vmem:[#allocation80_spill] sm:$0xff]  ;;  %v8335_v2 = vld [vmem:[#allocation138_spill] sm:$0xff] }
 0x254   : > { %v3720_v42 = vadd.f32 %v3611_v24, %v3527_v54  ;;  %v3421_v45 = vsel %vm3413_vm0, %v3419_v35, %v3420_v3  ;;  %v3423_v46 = vsel %vm3413_vm0, %v3420_v3, %v3422_v34  ;;  %v3614_v49 = vsel %vm3606_vm1, %v3612_v5, %v3613_v27  ;;  %v8333_v24 = vld [vmem:[#allocation137_spill] sm:$0xff] }
 0x255   : > { %v3528_v10 = vadd.f32 %v3421_v45, %v8330_v37  ;;  %v3529_v43 = vadd.f32 %v3423_v46, %v8331_v33  ;;  %v3616_v40 = vsel %vm3606_vm1, %v3613_v27, %v3615_v59  ;;  %v5424_v20 = vpop.f32.mrf.mxu1  ;;  %v5528_v18 = vpop.f32.mrf.mxu0  ;;  %v2045_v17 = vadd.f32 %v8333_v24, %v8332_v9  ;;  %v8334_v35 = vld [vmem:[#allocation81_spill] sm:$0xff]  ;;  %v8336_v33 = vld [vmem:[#allocation82_spill] sm:$0xff]  ;;  %v8337_v9 = vld [vmem:[#allocation139_spill] sm:$0xff] }
 0x256   : > { %v2040_v57 = vadd.f32 %v8335_v2, %v8334_v35  ;;  %3752 = vst [vmem:[%s7743_s19 + $0x8] sm:$0xff] %v3720_v42  ;;  %v2953_v5 = vadd.f32 %v2738_v6, %v7612_v51  ;;  %v3323_v54 = vadd.f32 %v3108_v1, %v2030_v13  ;;  %v3425_v14 = vrot.slane %v2954_v38, 1  ;;  %v8338_v42 = vld [vmem:[#allocation83_spill] sm:$0xff]  ;;  %v8339_v35 = vld [vmem:[#allocation140_spill] sm:$0xff] }
 0x257   : > { %v3721_v34 = vadd.f32 %v3614_v49, %v3528_v10  ;;  %v3722_v3 = vadd.f32 %v3616_v40, %v3529_v43  ;;  %v3618_v45 = vrot.slane %v3324_v7, 2  ;;  %v2748_v46 = vpop.f32.mrf.mxu1  ;;  %v3118_v27 = vpop.f32.mrf.mxu0  ;;  %v2956_v44 = vadd.f32 %v5424_v20, %v7616_v15  ;;  %v8341_v10 = vld [vmem:[#allocation141_spill] sm:$0xff] }
 0x258   : > { %v3424_v59 = vrot.slane %v2953_v5, 1  ;;  %v3617_v55 = vrot.slane %v3323_v54, 2  ;;  %v2955_v37 = vadd.f32 %v2748_v46, %v7620_v39  ;;  %v2055_v24 = vadd.f32 %v8337_v9, %v8336_v33  ;;  %v8340_v39 = vld [vmem:[#allocation84_spill] sm:$0xff]  ;;  %v8342_v40 = vld [vmem:[#allocation13_spill] sm:$0xff] }
 0x259   : > { %v2050_v2 = vadd.f32 %v8339_v35, %v8338_v42  ;;  %3753 = vst [vmem:[%s7743_s19 + $0x10] sm:$0xff] %v3721_v34  ;;  %3754 = vst [vmem:[%s7743_s19 + $0x18] sm:$0xff] %v3722_v3  ;;  %v3326_v51 = vadd.f32 %v5528_v18, %v2045_v17  ;;  %v3325_v13 = vadd.f32 %v3118_v27, %v2040_v57  ;;  %v5427_v38 = vpop.f32.mrf.mxu1  ;;  %v5531_v7 = vpop.f32.mrf.mxu0  ;;  %v3429_v18 = vrot.slane %v2956_v44, 1  ;;  %v8345_v44 = vld [vmem:[#allocation142_spill] sm:$0xff] }
 0x25a   : > { %v3426_v6 = vsel %vm3413_vm0, %v3424_v59, %v3425_v14  ;;  %v3619_v1 = vsel %vm3606_vm1, %v3617_v55, %v3618_v45  ;;  %v3427_v49 = vrot.slane %v2955_v37, 1  ;;  %v2958_v15 = vadd.f32 %v5427_v38, %v7624_v61  ;;  %v8343_v55 = vld [vmem:[#allocation11_spill] sm:$0xff]  ;;  %v8344_v38 = vld [vmem:[#allocation85_spill] sm:$0xff] }
 0x25b   : > { %v2065_v43 = vadd.f32 %v8341_v10, %v8340_v39  ;;  %v3530_v20 = vadd.f32 %v3426_v6, %v8342_v40  ;;  %v3620_v5 = vrot.slane %v3325_v13, 2  ;;  %v3328_v54 = vadd.f32 %v5531_v7, %v2055_v24  ;;  %v2758_v34 = vpop.f32.mrf.mxu1  ;;  %v3128_v3 = vpop.f32.mrf.mxu0  ;;  %v8346_v39 = vld [vmem:[#allocation58_spill] sm:$0xff] }
 0x25c   : > { %v3428_v17 = vsel %vm3413_vm0, %v3425_v14, %v3427_v49  ;;  %v2957_v57 = vadd.f32 %v2758_v34, %v7628_v8  ;;  %v3327_v46 = vadd.f32 %v3128_v3, %v2050_v2  ;;  %v3622_v59 = vrot.slane %v3326_v51, 2  ;;  %v8347_v10 = vld [vmem:[#allocation110_spill] sm:$0xff]  ;;  %v8351_v34 = vld [vmem:[#allocation19_spill] sm:$0xff] }
 0x25d   : > { %v3723_v27 = vadd.f32 %v3619_v1, %v3530_v20  ;;  %v3531_v61 = vadd.f32 %v3428_v17, %v8343_v55  ;;  %v3621_v37 = vsel %vm3606_vm1, %v3618_v45, %v3620_v5  ;;  %v5430_v33 = vpop.f32.mrf.mxu1  ;;  %v5534_v9 = vpop.f32.mrf.mxu0  ;;  %v3432_v42 = vrot.slane %v2958_v15, 1  ;;  %v8348_v20 = vld [vmem:[#allocation60_spill] sm:$0xff]  ;;  %v8355_v55 = vld [vmem:[#allocation143_spill] sm:$0xff] }
 0x25e   : > { %v3625_v35 = vrot.slane %v3328_v54, 2  ;;  %v3430_v24 = vrot.slane %v2957_v57, 1  ;;  %v3623_v13 = vrot.slane %v3327_v46, 2  ;;  %v2060_v7 = vadd.f32 %v8345_v44, %v8344_v38  ;;  %v8349_v5 = vld [vmem:[#allocation112_spill] sm:$0xff]  ;;  %v8352_v57 = vld [vmem:[#allocation62_spill] sm:$0xff] }
 0x25f   : > { %3755 = vst [vmem:[%s7743_s19 + $0x20] sm:$0xff] %v3723_v27  ;;  %v3724_v14 = vadd.f32 %v3621_v37, %v3531_v61  ;;  %v2960_v8 = vadd.f32 %v5430_v33, %v7632_v0  ;;  %v3330_v2 = vadd.f32 %v5534_v9, %v2065_v43  ;;  %v2768_v51 = vpop.f32.mrf.mxu1  ;;  %v3138_v6 = vpop.f32.mrf.mxu0  ;;  %v7804_v40 = vadd.f32 %v8347_v10, %v8346_v39  ;;  %v8350_v0 = vld [vmem:[#allocation15_spill] sm:$0xff]  ;;  %v8353_v46 = vld [vmem:[#allocation114_spill] sm:$0xff] }
 0x260   : > { %v3431_v1 = vsel %vm3413_vm0, %v3429_v18, %v3430_v24  ;;  %v3433_v45 = vsel %vm3413_vm0, %v3430_v24, %v3432_v42  ;;  %v3624_v49 = vsel %vm3606_vm1, %v3622_v59, %v3623_v13  ;;  %v3626_v15 = vsel %vm3606_vm1, %v3623_v13, %v3625_v35  ;;  %v8354_v59 = vld [vmem:[#allocation86_spill] sm:$0xff]  ;;  %v8356_v9 = vld [vmem:[#allocation87_spill] sm:$0xff]  ;;  %v8357_v42 = vld [vmem:[#allocation144_spill] sm:$0xff] }
 0x261   : > { %v7808_v54 = vadd.f32 %v8349_v5, %v8348_v20  ;;  %3756 = vst [vmem:[%s7743_s19 + $0x28] sm:$0xff] %v3724_v14  ;;  %v3532_v43 = vadd.f32 %v3431_v1, %v8350_v0  ;;  %v3533_v3 = vadd.f32 %v3433_v45, %v8351_v34  ;;  %v5433_v18 = vpop.f32.mrf.mxu1  ;;  %v5537_v17 = vpop.f32.mrf.mxu0  ;;  %v7815_v27 = vadd.f32 %v8353_v46, %v8352_v57  ;;  %v8358_v20 = vld [vmem:[#allocation88_spill] sm:$0xff]  ;;  %v8359_v5 = vld [vmem:[#allocation145_spill] sm:$0xff] }
 0x262   : > { %v2075_v61 = vadd.f32 %v8355_v55, %v8354_v59  ;;  %v2959_v37 = vadd.f32 %v2768_v51, %v7636_v52  ;;  %v3329_v33 = vadd.f32 %v3138_v6, %v2060_v7  ;;  %v2070_v35 = vadd.f32 %v8357_v42, %v8356_v9 }
 0x263   : > { %v3725_v24 = vadd.f32 %v3624_v49, %v3532_v43  ;;  %v3726_v13 = vadd.f32 %v3626_v15, %v3533_v3  ;;  %v3435_v38 = vrot.slane %v2960_v8, 1  ;;  %v2778_v44 = vpop.f32.mrf.mxu1  ;;  %v3148_v14 = vpop.f32.mrf.mxu0  ;;  %v3628_v1 = vrot.slane %v3330_v2, 2  ;;  %v8360_v15 = vld [vmem:[#allocation89_spill] sm:$0xff]  ;;  %v8361_v8 = vld [vmem:[#allocation146_spill] sm:$0xff]  ;;  %v8362_v3 = vld [vmem:[#allocation23_spill] sm:$0xff] }
 0x264   : > { %v3434_v45 = vrot.slane %v2959_v37, 1  ;;  %v3627_v39 = vrot.slane %v3329_v33, 2  ;;  %v2962_v10 = vadd.f32 %v5433_v18, %v7640_v62  ;;  %v2085_v0 = vadd.f32 %v8359_v5, %v8358_v20 }
 0x265   : > { %3757 = vst [vmem:[%s7743_s19 + $0x30] sm:$0xff] %v3725_v24  ;;  %3758 = vst [vmem:[%s7743_s19 + $0x38] sm:$0xff] %v3726_v13  ;;  %v3332_v52 = vadd.f32 %v5537_v17, %v2075_v61  ;;  %v2961_v7 = vadd.f32 %v2778_v44, %v7646_v32  ;;  %v3331_v51 = vadd.f32 %v3148_v14, %v2070_v35  ;;  %v5436_v6 = vpop.f32.mrf.mxu1  ;;  %v5540_v49 = vpop.f32.mrf.mxu0  ;;  %v8363_v32 = vld [vmem:[#allocation90_spill] sm:$0xff]  ;;  %v8364_v61 = vld [vmem:[#allocation147_spill] sm:$0xff] }
 0x266   : > { %v2080_v43 = vadd.f32 %v8361_v8, %v8360_v15  ;;  %v3436_v2 = vsel %vm3413_vm0, %v3434_v45, %v3435_v38  ;;  %v3629_v34 = vsel %vm3606_vm1, %v3627_v39, %v3628_v1  ;;  %v2964_v62 = vadd.f32 %v5436_v6, %v7650_v12  ;;  %v8365_v45 = vld [vmem:[#allocation21_spill] sm:$0xff] }
 0x267   : > { %v3534_v18 = vadd.f32 %v3436_v2, %v8362_v3  ;;  %v3437_v57 = vrot.slane %v2961_v7, 1  ;;  %v3630_v46 = vrot.slane %v3331_v51, 2  ;;  %v3334_v59 = vadd.f32 %v5540_v49, %v2085_v0  ;;  %v2788_v17 = vpop.f32.mrf.mxu1  ;;  %v3158_v55 = vpop.f32.mrf.mxu0  ;;  %v8366_v7 = vld [vmem:[#allocation91_spill] sm:$0xff]  ;;  %v8368_v2 = vld [vmem:[#allocation116_spill] sm:$0xff]  ;;  %v8370_v3 = vld [vmem:[#allocation29_spill] sm:$0xff] }
 0x268   : > { %v2095_v37 = vadd.f32 %v8364_v61, %v8363_v32  ;;  %v3439_v33 = vrot.slane %v2962_v10, 1  ;;  %v2963_v9 = vadd.f32 %v2788_v17, %v7659_v41  ;;  %v3333_v42 = vadd.f32 %v3158_v55, %v2080_v43  ;;  %v8367_v43 = vld [vmem:[#allocation64_spill] sm:$0xff]  ;;  %v8372_v55 = vld [vmem:[#allocation93_spill] sm:$0xff] }
 0x269   : > { %v3727_v35 = vadd.f32 %v3629_v34, %v3534_v18  ;;  %v3632_v24 = vrot.slane %v3332_v52, 2  ;;  %v3438_v13 = vsel %vm3413_vm0, %v3435_v38, %v3437_v57  ;;  %v3631_v12 = vsel %vm3606_vm1, %v3628_v1, %v3630_v46  ;;  %v5439_v44 = vpop.f32.mrf.mxu1  ;;  %v5543_v14 = vpop.f32.mrf.mxu0  ;;  %v8373_v32 = vld [vmem:[#allocation148_spill] sm:$0xff] }
 0x26a   : > { %v3535_v39 = vadd.f32 %v3438_v13, %v8365_v45  ;;  %v3442_v20 = vrot.slane %v2964_v62, 1  ;;  %v3440_v5 = vrot.slane %v2963_v9, 1  ;;  %v3633_v0 = vrot.slane %v3333_v42, 2 }
 0x26b   : > { %v2090_v51 = vadd.f32 %v7478_v53, %v8366_v7  ;;  %3759 = vst [vmem:[%s7743_s19 + $0x40] sm:$0xff] %v3727_v35  ;;  %v3635_v10 = vrot.slane %v3334_v59, 2  ;;  %v2966_v41 = vadd.f32 %v5439_v44, %v7663_v31  ;;  %v3336_v52 = vadd.f32 %v5543_v14, %v2095_v37  ;;  %v2798_v6 = vpop.f32.mrf.mxu1  ;;  %v3168_v38 = vpop.f32.mrf.mxu0  ;;  %v8369_v53 = vld [vmem:[#allocation25_spill] sm:$0xff]  ;;  %v8371_v59 = vld [vmem:[#allocation92_spill] sm:$0xff]  ;;  %v8377_v7 = vld [vmem:[#allocation150_spill] sm:$0xff] }
 0x26c   : > { %v3728_v49 = vadd.f32 %v3631_v12, %v3535_v39  ;;  %v3441_v1 = vsel %vm3413_vm0, %v3439_v33, %v3440_v5  ;;  %v3443_v15 = vsel %vm3413_vm0, %v3440_v5, %v3442_v20  ;;  %v3634_v8 = vsel %vm3606_vm1, %v3632_v24, %v3633_v0  ;;  %v8374_v39 = vld [vmem:[#allocation94_spill] sm:$0xff]  ;;  %v8375_v20 = vld [vmem:[#allocation149_spill] sm:$0xff] }
 0x26d   : > { %v7849_v34 = vadd.f32 %v8368_v2, %v8367_v43  ;;  %v3536_v62 = vadd.f32 %v3441_v1, %v8369_v53  ;;  %v3537_v18 = vadd.f32 %v3443_v15, %v8370_v3  ;;  %v3636_v31 = vsel %vm3606_vm1, %v3633_v0, %v3635_v10  ;;  %v5442_v57 = vpop.f32.mrf.mxu1  ;;  %v5546_v46 = vpop.f32.mrf.mxu0  ;;  %v8376_v0 = vld [vmem:[#allocation95_spill] sm:$0xff]  ;;  %v8379_v1 = vld [vmem:[#allocation152_spill] sm:$0xff] }
 0x26e   : > { %v2105_v17 = vadd.f32 %v7483_v28, %v8371_v59  ;;  %v2100_v61 = vadd.f32 %v8373_v32, %v8372_v55  ;;  %3760 = vst [vmem:[%s7743_s19 + $0x48] sm:$0xff] %v3728_v49  ;;  %v2965_v37 = vadd.f32 %v2798_v6, %v7667_v48  ;;  %v3335_v33 = vadd.f32 %v3168_v38, %v2090_v51  ;;  %v8381_v55 = vld [vmem:[#allocation31_spill] sm:$0xff] }
 0x26f   : > { %v3729_v9 = vadd.f32 %v3634_v8, %v3536_v62  ;;  %v3730_v42 = vadd.f32 %v3636_v31, %v3537_v18  ;;  %v3445_v35 = vrot.slane %v2966_v41, 1  ;;  %v3638_v24 = vrot.slane %v3336_v52, 2  ;;  %v2808_v13 = vpop.f32.mrf.mxu1  ;;  %v3178_v12 = vpop.f32.mrf.mxu0  ;;  %v8380_v8 = vld [vmem:[#allocation33_spill] sm:$0xff] }
 0x270   : > { %v3444_v44 = vrot.slane %v2965_v37, 1  ;;  %v3637_v14 = vrot.slane %v3335_v33, 2  ;;  %v2968_v45 = vadd.f32 %v5442_v57, %v7671_v4  ;;  %v2967_v28 = vadd.f32 %v2808_v13, %v7675_v11  ;;  %v8378_v11 = vld [vmem:[#allocation96_spill] sm:$0xff] }
 0x271   : > { %v2115_v5 = vadd.f32 %v8375_v20, %v8374_v39  ;;  %v2110_v10 = vadd.f32 %v8377_v7, %v8376_v0  ;;  %3761 = vst [vmem:[%s7743_s19 + $0x50] sm:$0xff] %v3729_v9  ;;  %3762 = vst [vmem:[%s7743_s19 + $0x58] sm:$0xff] %v3730_v42  ;;  %v3338_v48 = vadd.f32 %v5546_v46, %v2105_v17  ;;  %v5445_v41 = vpop.f32.mrf.mxu1  ;;  %v5549_v52 = vpop.f32.mrf.mxu0  ;;  %v8384_v7 = vld [vmem:[#allocation65_spill] sm:$0xff] }
 0x272   : > { %v3337_v51 = vadd.f32 %v3178_v12, %v2100_v61  ;;  %v3446_v6 = vsel %vm3413_vm0, %v3444_v44, %v3445_v35  ;;  %v3639_v38 = vsel %vm3606_vm1, %v3637_v14, %v3638_v24  ;;  %v3447_v49 = vrot.slane %v2967_v28, 1  ;;  %v8382_v12 = vld [vmem:[#allocation97_spill] sm:$0xff]  ;;  %v8383_v44 = vld [vmem:[#allocation154_spill] sm:$0xff] }
 0x273   : > { %v2970_v4 = vadd.f32 %v5445_v41, %v7681_v47  ;;  %v2125_v15 = vadd.f32 %v8379_v1, %v8378_v11  ;;  %v3538_v43 = vadd.f32 %v3446_v6, %v8380_v8  ;;  %v3340_v53 = vadd.f32 %v5549_v52, %v2115_v5  ;;  %v2818_v62 = vpop.f32.mrf.mxu1  ;;  %v3188_v3 = vpop.f32.mrf.mxu0  ;;  %v8387_v41 = vld [vmem:[#allocation120_spill] sm:$0xff] }
 0x274   : > { %v3640_v2 = vrot.slane %v3337_v51, 2  ;;  %v3449_v18 = vrot.slane %v2968_v45, 1  ;;  %v3448_v31 = vsel %vm3413_vm0, %v3445_v35, %v3447_v49  ;;  %v2969_v57 = vadd.f32 %v2818_v62, %v7685_v26  ;;  %v8386_v51 = vld [vmem:[#allocation66_spill] sm:$0xff]  ;;  %v8390_v1 = vld [vmem:[#allocation68_spill] sm:$0xff] }
 0x275   : > { %v3339_v46 = vadd.f32 %v3188_v3, %v2110_v10  ;;  %v3731_v59 = vadd.f32 %v3639_v38, %v3538_v43  ;;  %v3642_v17 = vrot.slane %v3338_v48, 2  ;;  %v3539_v47 = vadd.f32 %v3448_v31, %v8381_v55  ;;  %v5448_v61 = vpop.f32.mrf.mxu1  ;;  %v5552_v37 = vpop.f32.mrf.mxu0  ;;  %v8385_v10 = vld [vmem:[#allocation118_spill] sm:$0xff]  ;;  %v8389_v38 = vld [vmem:[#allocation151_spill] sm:$0xff]  ;;  %v8395_v31 = vld [vmem:[#allocation156_spill] sm:$0xff] }
 0x276   : > { %v3641_v32 = vsel %vm3606_vm1, %v3638_v24, %v3640_v2  ;;  %v3452_v33 = vrot.slane %v2970_v4, 1  ;;  %v3645_v9 = vrot.slane %v3340_v53, 2  ;;  %v3450_v42 = vrot.slane %v2969_v57, 1  ;;  %v8392_v43 = vld [vmem:[#allocation98_spill] sm:$0xff]  ;;  %v8393_v2 = vld [vmem:[#allocation155_spill] sm:$0xff] }
 0x277   : > { %v3643_v13 = vrot.slane %v3339_v46, 2  ;;  %v2120_v14 = vadd.f32 %v8383_v44, %v8382_v12  ;;  %3763 = vst [vmem:[%s7743_s19 + $0x60] sm:$0xff] %v3731_v59  ;;  %v3732_v35 = vadd.f32 %v3641_v32, %v3539_v47  ;;  %v2972_v26 = vadd.f32 %v5448_v61, %v7689_v23  ;;  %v2828_v28 = vpop.f32.mrf.mxu1  ;;  %v3198_v39 = vpop.f32.mrf.mxu0  ;;  %v8388_v23 = vld [vmem:[#allocation35_spill] sm:$0xff] }
 0x278   : > { %v3342_v45 = vadd.f32 %v5552_v37, %v2125_v15  ;;  %v3451_v20 = vsel %vm3413_vm0, %v3449_v18, %v3450_v42  ;;  %v3453_v24 = vsel %vm3413_vm0, %v3450_v42, %v3452_v33  ;;  %v7888_v48 = vadd.f32 %v8385_v10, %v8384_v7  ;;  %v8391_v15 = vld [vmem:[#allocation122_spill] sm:$0xff]  ;;  %v8394_v18 = vld [vmem:[#allocation99_spill] sm:$0xff]  ;;  %v8397_v42 = vld [vmem:[#allocation157_spill] sm:$0xff] }
 0x279   : > { %v3644_v5 = vsel %vm3606_vm1, %v3642_v17, %v3643_v13  ;;  %v3646_v0 = vsel %vm3606_vm1, %v3643_v13, %v3645_v9  ;;  %v7892_v52 = vadd.f32 %v8387_v41, %v8386_v51  ;;  %3764 = vst [vmem:[%s7743_s19 + $0x68] sm:$0xff] %v3732_v35  ;;  %v3540_v6 = vadd.f32 %v3451_v20, %v8388_v23  ;;  %v5451_v4 = vpop.f32.mrf.mxu1  ;;  %v5555_v11 = vpop.f32.mrf.mxu0  ;;  %v8396_v9 = vld [vmem:[#allocation100_spill] sm:$0xff]  ;;  %v8402_v23 = vld [vmem:[#allocation159_spill] sm:$0xff] }
 0x27a   : > { %v3541_v49 = vadd.f32 %v3453_v24, %v8389_v38  ;;  %v7899_v8 = vadd.f32 %v8391_v15, %v8390_v1  ;;  %v2135_v53 = vadd.f32 %v8393_v2, %v8392_v43  ;;  %v2971_v62 = vadd.f32 %v2828_v28, %v7693_v19  ;;  %v8398_v28 = vld [vmem:[#allocation101_spill] sm:$0xff] }
 0x27b   : > { %v3341_v3 = vadd.f32 %v3198_v39, %v2120_v14  ;;  %v2130_v57 = vadd.f32 %v8395_v31, %v8394_v18  ;;  %v3733_v46 = vadd.f32 %v3644_v5, %v3540_v6  ;;  %v3455_v17 = vrot.slane %v2972_v26, 1  ;;  %v2838_v55 = vpop.f32.mrf.mxu1  ;;  %v3208_v47 = vpop.f32.mrf.mxu0  ;;  %v8399_v26 = vld [vmem:[#allocation158_spill] sm:$0xff]  ;;  %v8400_v24 = vld [vmem:[#allocation41_spill] sm:$0xff] }
 0x27c   : > { %v3734_v59 = vadd.f32 %v3646_v0, %v3541_v49  ;;  %v3648_v32 = vrot.slane %v3342_v45, 2  ;;  %v3454_v61 = vrot.slane %v2971_v62, 1  ;;  %v2974_v33 = vadd.f32 %v5451_v4, %v7697_v60 }
 0x27d   : > { %v3647_v37 = vrot.slane %v3341_v3, 2  ;;  %v2145_v13 = vadd.f32 %v8397_v42, %v8396_v9  ;;  %3765 = vst [vmem:[%s7743_s19 + $0x70] sm:$0xff] %v3733_v46  ;;  %v3344_v19 = vadd.f32 %v5555_v11, %v2135_v53  ;;  %v2973_v12 = vadd.f32 %v2838_v55, %v7701_v58  ;;  %v5454_v14 = vpop.f32.mrf.mxu1  ;;  %v5558_v35 = vpop.f32.mrf.mxu0  ;;  %v8401_v58 = vld [vmem:[#allocation102_spill] sm:$0xff]  ;;  %v8403_v53 = vld [vmem:[#allocation153_spill] sm:$0xff]  ;;  %v8405_v46 = vld [vmem:[#allocation160_spill] sm:$0xff] }
 0x27e   : > { %3766 = vst [vmem:[%s7743_s19 + $0x78] sm:$0xff] %v3734_v59  ;;  %v3343_v44 = vadd.f32 %v3208_v47, %v2130_v57  ;;  %v2140_v39 = vadd.f32 %v8399_v26, %v8398_v28  ;;  %v3456_v45 = vsel %vm3413_vm0, %v3454_v61, %v3455_v17  ;;  %v2976_v60 = vadd.f32 %v5454_v14, %v7705_v63  ;;  %v8404_v57 = vld [vmem:[#allocation103_spill] sm:$0xff]  ;;  %v8406_v42 = vld [vmem:[#allocation70_spill] sm:$0xff] }
 0x27f   : > { %v3649_v20 = vsel %vm3606_vm1, %v3647_v37, %v3648_v32  ;;  %v3542_v5 = vadd.f32 %v3456_v45, %v8400_v24  ;;  %v3457_v0 = vrot.slane %v2973_v12, 1  ;;  %v3346_v10 = vadd.f32 %v5558_v35, %v2145_v13  ;;  %v2848_v51 = vpop.f32.mrf.mxu1  ;;  %v3218_v41 = vpop.f32.mrf.mxu0  ;;  %v8407_v13 = vld [vmem:[#allocation124_spill] sm:$0xff]  ;;  %v8408_v12 = vld [vmem:[#allocation43_spill] sm:$0xff]  ;;  %v8411_v45 = vld [vmem:[#allocation161_spill] sm:$0xff] }
 0x280   : > { %v3650_v7 = vrot.slane %v3343_v44, 2  ;;  %v2155_v6 = vadd.f32 %v8402_v23, %v8401_v58  ;;  %v3459_v38 = vrot.slane %v2974_v33, 1  ;;  %v2975_v49 = vadd.f32 %v2848_v51, %v7709_v56  ;;  %v8409_v14 = vld [vmem:[#allocation47_spill] sm:$0xff]  ;;  %v8413_v24 = vld [vmem:[#allocation162_spill] sm:$0xff] }
 0x281   : > { %v3345_v4 = vadd.f32 %v3218_v41, %v2140_v39  ;;  %v3735_v11 = vadd.f32 %v3649_v20, %v3542_v5  ;;  %v3652_v1 = vrot.slane %v3344_v19, 2  ;;  %v3458_v15 = vsel %vm3413_vm0, %v3455_v17, %v3457_v0  ;;  %v5457_v43 = vpop.f32.mrf.mxu1  ;;  %v5561_v2 = vpop.f32.mrf.mxu0  ;;  %v8410_v39 = vld [vmem:[#allocation104_spill] sm:$0xff] }
 0x282   : > { %v3651_v63 = vsel %vm3606_vm1, %v3648_v32, %v3650_v7  ;;  %v3543_v62 = vadd.f32 %v3458_v15, %v8403_v53  ;;  %v3462_v3 = vrot.slane %v2976_v60, 1  ;;  %v3460_v18 = vrot.slane %v2975_v49, 1  ;;  %v8412_v60 = vld [vmem:[#allocation105_spill] sm:$0xff]  ;;  %v8415_v15 = vld [vmem:[#allocation163_spill] sm:$0xff] }
 0x283   : > { %v3653_v31 = vrot.slane %v3345_v4, 2  ;;  %v2150_v59 = vadd.f32 %v8405_v46, %v8404_v57  ;;  %3767 = vst [vmem:[%s7743_s19 + $0x80] sm:$0xff] %v3735_v11  ;;  %v3655_v55 = vrot.slane %v3346_v10, 2  ;;  %v2978_v56 = vadd.f32 %v5457_v43, %v7713_v22  ;;  %v2858_v61 = vpop.f32.mrf.mxu1  ;;  %v3228_v17 = vpop.f32.mrf.mxu0  ;;  %v8416_v43 = vld [vmem:[#allocation109_spill] sm:$0xff] }
 0x284   : > { %v3348_v47 = vadd.f32 %v5561_v2, %v2155_v6  ;;  %v3736_v37 = vadd.f32 %v3651_v63, %v3543_v62  ;;  %v3461_v32 = vsel %vm3413_vm0, %v3459_v38, %v3460_v18  ;;  %v3463_v33 = vsel %vm3413_vm0, %v3460_v18, %v3462_v3  ;;  %v8417_v2 = vld [vmem:[#allocation164_spill] sm:$0xff] }
 0x285   : > { %v3654_v9 = vsel %vm3606_vm1, %v3652_v1, %v3653_v31  ;;  %v7933_v19 = vadd.f32 %v8407_v13, %v8406_v42  ;;  %v3544_v44 = vadd.f32 %v3461_v32, %v8408_v12  ;;  %v3545_v35 = vadd.f32 %v3463_v33, %v8409_v14  ;;  %v5460_v28 = vpop.f32.mrf.mxu1  ;;  %v5564_v26 = vpop.f32.mrf.mxu0  ;;  %v8414_v1 = vld [vmem:[#allocation107_spill] sm:$0xff]  ;;  %v8421_v14 = vld [vmem:[#allocation49_spill] sm:$0xff] }
 0x286   : > { %v3656_v22 = vsel %vm3606_vm1, %v3653_v31, %v3655_v55  ;;  %v2165_v20 = vadd.f32 %v8411_v45, %v8410_v39  ;;  %v2160_v5 = vadd.f32 %v8413_v24, %v8412_v60  ;;  %3768 = vst [vmem:[%s7743_s19 + $0x88] sm:$0xff] %v3736_v37  ;;  %v2977_v0 = vadd.f32 %v2858_v61, %v7717_v29  ;;  %v8422_v60 = vld [vmem:[#allocation113_spill] sm:$0xff]  ;;  %v8423_v24 = vld [vmem:[#allocation166_spill] sm:$0xff] }
 0x287   : > { %v3347_v7 = vadd.f32 %v3228_v17, %v2150_v59  ;;  %v3737_v10 = vadd.f32 %v3654_v9, %v3544_v44  ;;  %v3738_v51 = vadd.f32 %v3656_v22, %v3545_v35  ;;  %v3465_v41 = vrot.slane %v2978_v56, 1  ;;  %v2868_v23 = vpop.f32.mrf.mxu1  ;;  %v3238_v6 = vpop.f32.mrf.mxu0  ;;  %v8419_v59 = vld [vmem:[#allocation165_spill] sm:$0xff]  ;;  %v8420_v56 = vld [vmem:[#allocation51_spill] sm:$0xff] }
 0x288   : > { %v3658_v58 = vrot.slane %v3348_v47, 2  ;;  %v3464_v38 = vrot.slane %v2977_v0, 1  ;;  %v2980_v4 = vadd.f32 %v5460_v28, %v7732_v36  ;;  %v2979_v11 = vadd.f32 %v2868_v23, %v7736_v21  ;;  %v8418_v21 = vld [vmem:[#allocation111_spill] sm:$0xff] }
 0x289   : > { %v3657_v49 = vrot.slane %v3347_v7, 2  ;;  %v2175_v63 = vadd.f32 %v8415_v15, %v8414_v1  ;;  %v2170_v53 = vadd.f32 %v8417_v2, %v8416_v43  ;;  %3769 = vst [vmem:[%s7743_s19 + $0x90] sm:$0xff] %v3737_v10  ;;  %3770 = vst [vmem:[%s7743_s19 + $0x98] sm:$0xff] %v3738_v51  ;;  %v3350_v29 = vadd.f32 %v5564_v26, %v2165_v20  ;;  %v5463_v3 = vpop.f32.mrf.mxu1  ;;  %v5567_v18 = vpop.f32.mrf.mxu0  ;;  %v8427_v1 = vld [vmem:[#allocation128_spill] sm:$0xff]  ;;  %v8429_v43 = vld [vmem:[#allocation57_spill] sm:$0xff] }
 0x28a   : > { %v3349_v62 = vadd.f32 %v3238_v6, %v2160_v5  ;;  %v3466_v31 = vsel %vm3413_vm0, %v3464_v38, %v3465_v41  ;;  %v3467_v46 = vrot.slane %v2979_v11, 1  ;;  %v2982_v36 = vadd.f32 %v5463_v3, %v7748_v25  ;;  %v8424_v38 = vld [vmem:[#allocation71_spill] sm:$0xff]  ;;  %v8426_v11 = vld [vmem:[#allocation72_spill] sm:$0xff]  ;;  %v8431_v3 = vld [vmem:[#allocation130_spill] sm:$0xff] }
 0x28b   : > { %v3659_v57 = vsel %vm3606_vm1, %v3657_v49, %v3658_v58  ;;  %v2185_v55 = vadd.f32 %v8419_v59, %v8418_v21  ;;  %v3546_v47 = vadd.f32 %v3466_v31, %v8420_v56  ;;  %v3352_v17 = vadd.f32 %v5567_v18, %v2175_v63  ;;  %v2878_v37 = vpop.f32.mrf.mxu1  ;;  %v3248_v32 = vpop.f32.mrf.mxu0  ;;  %v8425_v49 = vld [vmem:[#allocation126_spill] sm:$0xff]  ;;  %v8432_v31 = vld [vmem:[#allocation115_spill] sm:$0xff]  ;;  %v8434_v59 = vld [vmem:[#allocation117_spill] sm:$0xff] }
 0x28c   : > { %v3660_v61 = vrot.slane %v3349_v62, 2  ;;  %v3469_v33 = vrot.slane %v2980_v4, 1  ;;  %v3468_v9 = vsel %vm3413_vm0, %v3465_v41, %v3467_v46  ;;  %v2981_v42 = vadd.f32 %v2878_v37, %v7765_v16  ;;  %v8430_v62 = vld [vmem:[#allocation73_spill] sm:$0xff] }
 0x28d   : > { %v3351_v13 = vadd.f32 %v3248_v32, %v2170_v53  ;;  %v3739_v12 = vadd.f32 %v3659_v57, %v3546_v47  ;;  %v3662_v44 = vrot.slane %v3350_v29, 2  ;;  %v3547_v25 = vadd.f32 %v3468_v9, %v8421_v14  ;;  %v5466_v22 = vpop.f32.mrf.mxu1  ;;  %v5570_v28 = vpop.f32.mrf.mxu0  ;;  %v8433_v57 = vld [vmem:[#allocation167_spill] sm:$0xff] }
 0x28e   : > { %v3661_v35 = vsel %vm3606_vm1, %v3658_v58, %v3660_v61  ;;  %v3472_v26 = vrot.slane %v2982_v36, 1  ;;  %v3665_v39 = vrot.slane %v3352_v17, 2  ;;  %v3470_v45 = vrot.slane %v2981_v42, 1 }
 0x28f   : > { %v3663_v20 = vrot.slane %v3351_v13, 2  ;;  %v2180_v5 = vadd.f32 %v8423_v24, %v8422_v60  ;;  %3771 = vst [vmem:[%s7743_s19 + $0xa0] sm:$0xff] %v3739_v12  ;;  %v3740_v0 = vadd.f32 %v3661_v35, %v3547_v25  ;;  %v2984_v16 = vadd.f32 %v5466_v22, %v7804_v40  ;;  %v2888_v10 = vpop.f32.mrf.mxu1  ;;  %v3258_v51 = vpop.f32.mrf.mxu0  ;;  %v8428_v40 = vld [vmem:[#allocation53_spill] sm:$0xff]  ;;  %v8435_v13 = vld [vmem:[#allocation119_spill] sm:$0xff]  ;;  %v8437_v22 = vld [vmem:[#allocation168_spill] sm:$0xff] }
 0x290   : > { %v3354_v7 = vadd.f32 %v5570_v28, %v2185_v55  ;;  %v3471_v41 = vsel %vm3413_vm0, %v3469_v33, %v3470_v45  ;;  %v3473_v58 = vsel %vm3413_vm0, %v3470_v45, %v3472_v26  ;;  %v7972_v4 = vadd.f32 %v8425_v49, %v8424_v38  ;;  %v8436_v35 = vld [vmem:[#allocation121_spill] sm:$0xff] }
 0x291   : > { %v3664_v23 = vsel %vm3606_vm1, %v3662_v44, %v3663_v20  ;;  %v3666_v6 = vsel %vm3606_vm1, %v3663_v20, %v3665_v39  ;;  %v7976_v15 = vadd.f32 %v8427_v1, %v8426_v11  ;;  %3772 = vst [vmem:[%s7743_s19 + $0xa8] sm:$0xff] %v3740_v0  ;;  %v3548_v63 = vadd.f32 %v3471_v41, %v8428_v40  ;;  %v5469_v53 = vpop.f32.mrf.mxu1  ;;  %v5573_v29 = vpop.f32.mrf.mxu0  ;;  %v8438_v45 = vld [vmem:[#allocation61_spill] sm:$0xff]  ;;  %v8441_v11 = vld [vmem:[#allocation59_spill] sm:$0xff] }
 0x292   : > { %v3549_v2 = vadd.f32 %v3473_v58, %v8429_v43  ;;  %v7983_v18 = vadd.f32 %v8431_v3, %v8430_v62  ;;  %v2195_v46 = vadd.f32 %v8433_v57, %v8432_v31  ;;  %v2983_v36 = vadd.f32 %v2888_v10, %v7808_v54 }
 0x293   : > { %v3353_v21 = vadd.f32 %v3258_v51, %v2180_v5  ;;  %v2190_v55 = vadd.f32 %v7560_v30, %v8434_v59  ;;  %v3741_v56 = vadd.f32 %v3664_v23, %v3548_v63  ;;  %v3475_v61 = vrot.slane %v2984_v16, 1  ;;  %v2898_v17 = vpop.f32.mrf.mxu1  ;;  %v3268_v37 = vpop.f32.mrf.mxu0  ;;  %v8440_v16 = vld [vmem:[#allocation169_spill] sm:$0xff] }
 0x294   : > { %v3742_v47 = vadd.f32 %v3666_v6, %v3549_v2  ;;  %v3668_v32 = vrot.slane %v3354_v7, 2  ;;  %v3474_v33 = vrot.slane %v2983_v36, 1  ;;  %v2986_v42 = vadd.f32 %v5469_v53, %v7815_v27  ;;  %v8442_v2 = vld [vmem:[#allocation125_spill] sm:$0xff]  ;;  %v8443_v53 = vld [vmem:[#allocation170_spill] sm:$0xff] }
 0x295   : > { %v3667_v9 = vrot.slane %v3353_v21, 2  ;;  %v2205_v12 = vadd.f32 %v7562_v50, %v8435_v13  ;;  %3773 = vst [vmem:[%s7743_s19 + $0xb0] sm:$0xff] %v3741_v56  ;;  %v3356_v54 = vadd.f32 %v5573_v29, %v2195_v46  ;;  %v2985_v44 = vadd.f32 %v2898_v17, %v7849_v34  ;;  %v5472_v30 = vpop.f32.mrf.mxu1  ;;  %v5576_v25 = vpop.f32.mrf.mxu0  ;;  %v8439_v34 = vld [vmem:[#allocation123_spill] sm:$0xff]  ;;  %v8445_v56 = vld [vmem:[#allocation132_spill] sm:$0xff] }
 0x296   : > { %3774 = vst [vmem:[%s7743_s19 + $0xb8] sm:$0xff] %v3742_v47  ;;  %v3355_v14 = vadd.f32 %v3268_v37, %v2190_v55  ;;  %v2200_v28 = vadd.f32 %v8437_v22, %v8436_v35  ;;  %v3476_v26 = vsel %vm3413_vm0, %v3474_v33, %v3475_v61  ;;  %v2988_v27 = vadd.f32 %v5472_v30, %v7888_v48  ;;  %v8444_v55 = vld [vmem:[#allocation74_spill] sm:$0xff]  ;;  %v8447_v37 = vld [vmem:[#allocation67_spill] sm:$0xff]  ;;  %v8449_v13 = vld [vmem:[#allocation172_spill] sm:$0xff] }
 0x297   : > { %v3669_v39 = vsel %vm3606_vm1, %v3667_v9, %v3668_v32  ;;  %v3550_v20 = vadd.f32 %v3476_v26, %v8438_v45  ;;  %v3477_v50 = vrot.slane %v2985_v44, 1  ;;  %v3358_v24 = vadd.f32 %v5576_v25, %v2205_v12  ;;  %v2908_v5 = vpop.f32.mrf.mxu1  ;;  %v3278_v0 = vpop.f32.mrf.mxu0  ;;  %v8451_v44 = vld [vmem:[#allocation174_spill] sm:$0xff] }
 0x298   : > { %v3670_v60 = vrot.slane %v3355_v14, 2  ;;  %v2215_v7 = vadd.f32 %v8440_v16, %v8439_v34  ;;  %v3479_v10 = vrot.slane %v2986_v42, 1  ;;  %v2987_v51 = vadd.f32 %v2908_v5, %v7892_v52  ;;  %v8448_v42 = vld [vmem:[#allocation127_spill] sm:$0xff]  ;;  %v8453_v5 = vld [vmem:[#allocation2_spill] sm:$0xff]  ;;  %v8454_v34 = vld [vmem:[#allocation133_spill] sm:$0xff] }
 0x299   : > { %v3357_v41 = vadd.f32 %v3278_v0, %v2200_v28  ;;  %v3743_v58 = vadd.f32 %v3669_v39, %v3550_v20  ;;  %v3672_v23 = vrot.slane %v3356_v54, 2  ;;  %v3478_v6 = vsel %vm3413_vm0, %v3475_v61, %v3477_v50  ;;  %v5475_v38 = vpop.f32.mrf.mxu1  ;;  %v5579_v49 = vpop.f32.mrf.mxu0  ;;  %v8446_v61 = vld [vmem:[#allocation63_spill] sm:$0xff]  ;;  %v8450_v54 = vld [vmem:[#allocation129_spill] sm:$0xff] }
 0x29a   : > { %v3671_v48 = vsel %vm3606_vm1, %v3668_v32, %v3670_v60  ;;  %v3551_v1 = vadd.f32 %v3478_v6, %v8441_v11  ;;  %v3482_v40 = vrot.slane %v2988_v27, 1  ;;  %v3480_v63 = vrot.slane %v2987_v51, 1  ;;  %v8455_v16 = vld [vmem:[#allocation3_spill] sm:$0xff] }
 0x29b   : > { %v3673_v43 = vrot.slane %v3357_v41, 2  ;;  %v2210_v29 = vadd.f32 %v8443_v53, %v8442_v2  ;;  %3775 = vst [vmem:[%s7743_s19 + $0xc0] sm:$0xff] %v3743_v58  ;;  %v3675_v62 = vrot.slane %v3358_v24, 2  ;;  %v2990_v52 = vadd.f32 %v5475_v38, %v7899_v8  ;;  %v2918_v31 = vpop.f32.mrf.mxu1  ;;  %v3288_v57 = vpop.f32.mrf.mxu0  ;;  %v8452_v24 = vld [vmem:[#allocation131_spill] sm:$0xff] }
 0x29c   : > { %v3360_v3 = vadd.f32 %v5579_v49, %v2215_v7  ;;  %v3744_v46 = vadd.f32 %v3671_v48, %v3551_v1  ;;  %v3481_v36 = vsel %vm3413_vm0, %v3479_v10, %v3480_v63  ;;  %v3483_v21 = vsel %vm3413_vm0, %v3480_v63, %v3482_v40 }
 0x29d   : > { %v3674_v59 = vsel %vm3606_vm1, %v3672_v23, %v3673_v43  ;;  %v1603_v47 = vadd.f32 %v8445_v56, %v8444_v55  ;;  %v3552_v17 = vadd.f32 %v3481_v36, %v8446_v61  ;;  %v3553_v32 = vadd.f32 %v3483_v21, %v8447_v37  ;;  %v5478_v33 = vpop.f32.mrf.mxu1  ;;  %v5582_v9 = vpop.f32.mrf.mxu0 }
 0x29e   : > { %v3676_v8 = vsel %vm3606_vm1, %v3673_v43, %v3675_v62  ;;  %v2225_v12 = vadd.f32 %v8449_v13, %v8448_v42  ;;  %v2220_v14 = vadd.f32 %v8451_v44, %v8450_v54  ;;  %3776 = vst [vmem:[%s7743_s19 + $0xc8] sm:$0xff] %v3744_v46  ;;  %v2989_v30 = vadd.f32 %v2918_v31, %v7933_v19  ;;  %v8457_v62 = vld [vmem:[#allocation69_spill] sm:$0xff] }
 0x29f   : > { %v3359_v25 = vadd.f32 %v3288_v57, %v2210_v29  ;;  %v3745_v35 = vadd.f32 %v3674_v59, %v3552_v17  ;;  %v3746_v22 = vadd.f32 %v3676_v8, %v3553_v32  ;;  %v3485_v28 = vrot.slane %v2990_v52, 1  ;;  %v2928_v39 = vpop.f32.mrf.mxu1  ;;  %v3298_v27 = vpop.f32.mrf.mxu0  ;;  %v8459_v17 = vld [vmem:[#allocation4_spill] sm:$0xff] }
 0x2a0   : > { %v3678_v26 = vrot.slane %v3360_v3, 2  ;;  %v3484_v45 = vrot.slane %v2989_v30, 1  ;;  %v2992_v50 = vadd.f32 %v5478_v33, %v7972_v4  ;;  %v2991_v60 = vadd.f32 %v2928_v39, %v7976_v15  ;;  %v8456_v15 = vld [vmem:[#allocation171_spill] sm:$0xff] }
 0x2a1   : > { %v3677_v20 = vrot.slane %v3359_v25, 2  ;;  %v2235_v0 = vadd.f32 %v8453_v5, %v8452_v24  ;;  %v2230_v7 = vadd.f32 %v8455_v16, %v8454_v34  ;;  %3777 = vst [vmem:[%s7743_s19 + $0xd0] sm:$0xff] %v3745_v35  ;;  %3778 = vst [vmem:[%s7743_s19 + $0xd8] sm:$0xff] %v3746_v22  ;;  %v3362_v19 = vadd.f32 %v5582_v9, %v2225_v12  ;;  %v5481_v51 = vpop.f32.mrf.mxu1  ;;  %v5585_v41 = vpop.f32.mrf.mxu0 }
 0x2a2   : > { %v3361_v10 = vadd.f32 %v3298_v27, %v2220_v14  ;;  %v3486_v58 = vsel %vm3413_vm0, %v3484_v45, %v3485_v28  ;;  %v3487_v6 = vrot.slane %v2991_v60, 1  ;;  %v2994_v4 = vadd.f32 %v5481_v51, %v7983_v18 }
 0x2a3   : > { %v3679_v23 = vsel %vm3606_vm1, %v3677_v20, %v3678_v26  ;;  %v3554_v48 = vadd.f32 %v3486_v58, %v8456_v15  ;;  %v3364_v49 = vadd.f32 %v5585_v41, %v2235_v0  ;;  %v2938_v11 = vpop.f32.mrf.mxu1  ;;  %v3308_v1 = vpop.f32.mrf.mxu0  ;;  %v3489_v40 = vrot.slane %v2992_v50, 1 }
 0x2a4   : > { %v3680_v38 = vrot.slane %v3361_v10, 2  ;;  %v3488_v63 = vsel %vm3413_vm0, %v3485_v28, %v3487_v6  ;;  %v2993_v43 = vadd.f32 %v2938_v11, %v1603_v47  ;;  %v3363_v2 = vadd.f32 %v3308_v1, %v2230_v7  ;;  %v8458_v47 = vld [vmem:[#allocation173_spill] sm:$0xff] }
 0x2a5   : > { %v3747_v53 = vadd.f32 %v3679_v23, %v3554_v48  ;;  %v3682_v29 = vrot.slane %v3362_v19, 2  ;;  %v3555_v52 = vadd.f32 %v3488_v63, %v8457_v62  ;;  %v3492_v18 = vrot.slane %v2994_v4, 1 }
 0x2a6   : > { %v3681_v3 = vsel %vm3606_vm1, %v3678_v26, %v3680_v38  ;;  %v3685_v31 = vrot.slane %v3364_v49, 2  ;;  %v3490_v57 = vrot.slane %v2993_v43, 1  ;;  %v3683_v46 = vrot.slane %v3363_v2, 2 }
 0x2a7   : > { %3779 = vst [vmem:[%s7743_s19 + $0xe0] sm:$0xff] %v3747_v53  ;;  %v3748_v36 = vadd.f32 %v3681_v3, %v3555_v52 }
 0x2a8   : > { %v3491_v21 = vsel %vm3413_vm0, %v3489_v40, %v3490_v57  ;;  %v3493_v59 = vsel %vm3413_vm0, %v3490_v57, %v3492_v18  ;;  %v3684_v55 = vsel %vm3606_vm1, %v3682_v29, %v3683_v46  ;;  %v3686_v56 = vsel %vm3606_vm1, %v3683_v46, %v3685_v31 }
 0x2a9   : > { %3780 = vst [vmem:[%s7743_s19 + $0xe8] sm:$0xff] %v3748_v36  ;;  %v3556_v61 = vadd.f32 %v3491_v21, %v8458_v47  ;;  %v3557_v37 = vadd.f32 %v3493_v59, %v8459_v17 }
 0x2ab   : > { %v3749_v32 = vadd.f32 %v3684_v55, %v3556_v61  ;;  %v3750_v8 = vadd.f32 %v3686_v56, %v3557_v37 }
 0x2ad   : > { %3781 = vst [vmem:[%s7743_s19 + $0xf0] sm:$0xff] %v3749_v32  ;;  %3782 = vst [vmem:[%s7743_s19 + $0xf8] sm:$0xff] %v3750_v8 }
 0x2ae PF: > { %s13_s12 = sadd.s32 1, %s5681_s12  }
 0x2af   : > { %p10_p4 = scmp.ge.s32.totalorder %s13_s12, 4  }
 0x2b1   :  { %12 = sbr.rel (!%p10_p4) target bundleno = 1 (0x1), region = 72 }

</bundles_post_ra>
